<compile_context>
chip_gen: v5e
topology: v5e:2x2
jax: 0.10.0
libtpu: 0.0.40
codegen_flags: <defaults>
</compile_context>

<pallas_src>
import functools

import jax
import jax.numpy as jnp
import numpy as np
from jax import lax
from jax.experimental import pallas as pl
from jax.experimental.pallas import tpu as pltpu

NUM_BINS = 1100
EMB_DIM = 8
MN, MX = -1.0, 300.0

OUT_PAD = 128                                   # per-net lane-dense output width
OUT2 = 2 * OUT_PAD                              # fused actor|critic output width
NB_PAD = ((NUM_BINS + 127) // 128) * 128        # 1152


def _round_up(x, m):
    return ((x + m - 1) // m) * m


def _param_rows(in_dim):
    # packed fused-parameter buffer, lane width OUT2:
    #   [0       : 2E)            W_in  block-diag  (2E, 6E)
    #   [2E      : 4E)            W_out block-diag  (2E, 2E)
    #   [4E      : 4E+N*2E)       W_lin block-diag  (N*2E, OUT2)
    #   [4E+N*2E]                 b_in   (6E,)
    #   [4E+N*2E+1]               b_out  (2E,)
    #   [4E+N*2E+2]               b_lin  (OUT2,)
    return _round_up(4 * EMB_DIM + in_dim * 2 * EMB_DIM + 3, 8)


def _make_bins():
    return jnp.linspace(MN, MX, NUM_BINS, dtype=jnp.float32)


# ------------------------------ Pallas kernel -------------------------------
def _fused_kernel(B, N, act_dim, heads_a, heads_c, lp,
                  xcol_ref,    # (N*lp, 1)        f32   state, n-major / l-minor
                  bins_ref,    # (2, NB_PAD)      f32   row0=bins, row1=prev bins
                  tbl_ref,     # (N, NB_PAD, 2E)  bf16  [.., :E]=actor, [.., E:]=critic
                  params_ref,  # (ROWS, OUT2)     f32   fused block-diag weights/biases
                  o_ref):      # (lp, OUT2)       f32   [:,:128]=actor probs, [:,128]=value
    E = EMB_DIM
    NLP = N * lp
    f32 = jnp.float32
    neg = f32(-1e30)

    # ---- discretize + one-hot (matches torch.bucketize right=False) ----
    xc = jnp.clip(xcol_ref[...], MN, MX)                       # (NLP, 1)
    bins = bins_ref[0:1, :]                                    # (1, NB_PAD)
    prev = bins_ref[1:2, :]
    oh = jnp.logical_and(bins >= xc, prev < xc).astype(jnp.bfloat16)  # (NLP, NB_PAD)

    # ---- per-feature embedding gather: bf16 one-hot @ bf16 table, f32 accum ----
    parts = [jnp.dot(oh[n * lp:(n + 1) * lp, :], tbl_ref[n],
                     preferred_element_type=f32) for n in range(N)]   # (lp, 2E)
    emb = jnp.concatenate(parts, axis=0)                       # (NLP, 2E)  [actor|critic]

    # ---- fused qkv projection (block-diagonal actor|critic weights) ----
    w_in = params_ref[0:2 * E, 0:6 * E]                        # (2E, 6E)
    w_out = params_ref[2 * E:4 * E, 0:2 * E]                   # (2E, 2E)
    lin0 = 4 * E
    brow = 4 * E + N * 2 * E
    b_in = params_ref[brow:brow + 1, 0:6 * E]                  # (1, 6E)
    b_out = params_ref[brow + 1:brow + 2, 0:2 * E]             # (1, 2E)
    b_lin = params_ref[brow + 2:brow + 3, :]                   # (1, OUT2)

    qkv = jnp.dot(emb, w_in, preferred_element_type=f32) + b_in    # (NLP, 6E)
    qkv3 = qkv.reshape(N, lp, 6 * E)                               # (N, lp, 6E)

    # key mask: padded batch rows (m >= B) never contribute as keys
    kmask = lax.broadcasted_iota(jnp.int32, (1, lp, lp), 2) < B

    def attn_heads(qs, ks, vs, heads):
        # per-feature attention over the batch axis (PyTorch batch_first=False quirk)
        dh = E // heads
        scale = f32(1.0 / float(dh) ** 0.5)
        ctx = []
        for h in range(heads):                                  # static unroll
            q = qs[..., h * dh:(h + 1) * dh] * scale            # (N, lp, dh)
            k = ks[..., h * dh:(h + 1) * dh]
            v = vs[..., h * dh:(h + 1) * dh]
            s = jnp.einsum('nld,nmd->nlm', q, k,
                           preferred_element_type=f32)          # (N, lp, lp)
            s = jnp.where(kmask, s, neg)
            s = s - jnp.max(s, axis=-1, keepdims=True)
            p = jnp.exp(s)
            p = p * pl.reciprocal(jnp.sum(p, axis=-1, keepdims=True), approx=True)
            ctx.append(jnp.einsum('nlm,nmd->nld', p, v,
                                  preferred_element_type=f32))  # (N, lp, dh)
        return ctx[0] if heads == 1 else jnp.concatenate(ctx, axis=-1)  # (N, lp, E)

    ctx_a = attn_heads(qkv3[..., 0:E], qkv3[..., E:2 * E], qkv3[..., 2 * E:3 * E],
                       heads_a)
    ctx_c = attn_heads(qkv3[..., 3 * E:4 * E], qkv3[..., 4 * E:5 * E],
                       qkv3[..., 5 * E:6 * E], heads_c)
    ctx = jnp.concatenate([ctx_a, ctx_c], axis=-1).reshape(NLP, 2 * E)  # (NLP, 2E)

    # ---- fused out_proj ----
    attn = jnp.dot(ctx, w_out, preferred_element_type=f32) + b_out      # (NLP, 2E)

    # ---- final Linear: accumulated per-feature matmuls (no lane-offset concat) ----
    logits = jnp.dot(attn[0:lp, :], params_ref[lin0:lin0 + 2 * E, :],
                     preferred_element_type=f32)                         # (lp, OUT2)
    for n in range(1, N):                                                # static unroll
        logits = logits + jnp.dot(
            attn[n * lp:(n + 1) * lp, :],
            params_ref[lin0 + n * 2 * E:lin0 + (n + 1) * 2 * E, :],
            preferred_element_type=f32)
    logits = logits + b_lin

    # ---- actor softmax (exact divide) on lanes [0, act_dim); critic raw value ----
    lane = lax.broadcasted_iota(jnp.int32, (lp, OUT2), 1)
    act_masked = jnp.where(lane < act_dim, logits, neg)
    m = jnp.max(act_masked, axis=-1, keepdims=True)
    e = jnp.exp(act_masked - m)
    probs = e / jnp.sum(e, axis=-1, keepdims=True)
    o_ref[...] = jnp.where(lane < OUT_PAD, probs, logits)


# ------------------------------ host wrappers --------------------------------
def init_attn_net(key, in_dim, out_dim, num_heads):
    E = EMB_DIM
    ks = jax.random.split(key, 7)
    return dict(
        tables=0.1 * jax.random.normal(ks[0], (in_dim, NUM_BINS, E), jnp.float32),
        in_proj_w=0.2 * jax.random.normal(ks[1], (3 * E, E), jnp.float32),
        in_proj_b=0.05 * jax.random.normal(ks[2], (3 * E,), jnp.float32),
        out_proj_w=0.2 * jax.random.normal(ks[3], (E, E), jnp.float32),
        out_proj_b=0.05 * jax.random.normal(ks[4], (E,), jnp.float32),
        lin_w=0.2 * jax.random.normal(ks[5], (out_dim, in_dim * E), jnp.float32),
        lin_b=0.05 * jax.random.normal(ks[6], (out_dim,), jnp.float32),
        num_heads=num_heads, out_dim=out_dim, in_dim=in_dim,
    )


def pack_actor_critic(actor_net, critic_net):
    """Done ONCE at init: pack both nets into 3 contiguous kernel operands."""
    E = EMB_DIM
    N = actor_net['in_dim']
    rows = _param_rows(N)

    bins = _make_bins()
    prev = jnp.concatenate([jnp.array([-1e30], jnp.float32), bins[:-1]])
    bins2 = jnp.full((2, NB_PAD), 1e30, jnp.float32)
    bins2 = bins2.at[0, :NUM_BINS].set(bins).at[1, :NUM_BINS].set(prev)

    # bf16 embedding tables: halves the dominant per-call HBM DMA / VMEM residency.
    tables2 = jnp.zeros((N, NB_PAD, 2 * E), jnp.float32)
    tables2 = tables2.at[:, :NUM_BINS, :E].set(actor_net['tables'])
    tables2 = tables2.at[:, :NUM_BINS, E:].set(critic_net['tables'])
    tables2 = tables2.astype(jnp.bfloat16)

    Oa, Oc = actor_net['out_dim'], critic_net['out_dim']
    params = jnp.zeros((rows, OUT2), jnp.float32)
    # block-diagonal fused in_proj (2E, 6E)
    params = params.at[0:E, 0:3 * E].set(actor_net['in_proj_w'].T)
    params = params.at[E:2 * E, 3 * E:6 * E].set(critic_net['in_proj_w'].T)
    # block-diagonal fused out_proj (2E, 2E)
    params = params.at[2 * E:3 * E, 0:E].set(actor_net['out_proj_w'].T)
    params = params.at[3 * E:4 * E, E:2 * E].set(critic_net['out_proj_w'].T)
    # block-diagonal fused final Linear (N*2E, OUT2), per-feature row blocks
    lin0 = 4 * E
    wa, wc = actor_net['lin_w'], critic_net['lin_w']
    for n in range(N):
        params = params.at[lin0 + n * 2 * E:lin0 + n * 2 * E + E, 0:Oa].set(
            wa[:, n * E:(n + 1) * E].T)
        params = params.at[lin0 + n * 2 * E + E:lin0 + (n + 1) * 2 * E,
                           OUT_PAD:OUT_PAD + Oc].set(wc[:, n * E:(n + 1) * E].T)
    brow = 4 * E + N * 2 * E
    params = params.at[brow, 0:3 * E].set(actor_net['in_proj_b'])
    params = params.at[brow, 3 * E:6 * E].set(critic_net['in_proj_b'])
    params = params.at[brow + 1, 0:E].set(actor_net['out_proj_b'])
    params = params.at[brow + 1, E:2 * E].set(critic_net['out_proj_b'])
    params = params.at[brow + 2, 0:Oa].set(actor_net['lin_b'])
    params = params.at[brow + 2, OUT_PAD:OUT_PAD + Oc].set(critic_net['lin_b'])
    return bins2, tables2, params


def make_actor_critic_forward(in_dim, action_dim, heads_a, heads_c):
    @jax.jit
    def fwd(state, bins2, tables2, params):
        B = state.shape[0]
        lp = _round_up(max(B, 8), 8)
        if lp > B:
            state_p = jnp.concatenate(
                [state, jnp.zeros((lp - B, in_dim), state.dtype)], axis=0)
        else:
            state_p = state
        # layout plumbing only: (lp, N) -> rows ordered n-major, l-minor
        xcol = jnp.transpose(state_p).reshape(in_dim * lp, 1)

        kern = functools.partial(_fused_kernel, B, in_dim, action_dim,
                                 heads_a, heads_c, lp)
        vmem = pl.BlockSpec(memory_space=pltpu.MemorySpace.VMEM)
        out = pl.pallas_call(
            kern,
            out_shape=jax.ShapeDtypeStruct((lp, OUT2), jnp.float32),
            in_specs=[vmem, vmem, vmem, vmem],
            out_specs=vmem,
            compiler_params=pltpu.CompilerParams(vmem_limit_bytes=32 * 1024 * 1024),
        )(xcol, bins2, tables2, params)
        return out[:B, :action_dim], out[:B, OUT_PAD:OUT_PAD + 1]
    return fwd

# TODO(synk): Categorical sampling / log_prob / entropy in ActorCritic.act and
# evaluate are stochastic host-side glue on top of these probabilities; not
# part of the kernel math.


# ---------------------------- pure-JAX reference -----------------------------
def _discretize_embed_ref(x, tables):
    xc = jnp.clip(x, MN, MX)
    bins = _make_bins()
    idx = jnp.searchsorted(bins, xc, side='left')            # == torch.bucketize
    emb = jax.vmap(lambda tbl, ind: tbl[ind],
                   in_axes=(0, 1), out_axes=1)(tables, idx)  # (B, in_dim, E)
    return emb


def _mha_ref(x_lne, ipw, ipb, opw, opb, H):
    L, N, E = x_lne.shape
    Dh = E // H
    qkv = x_lne @ ipw.T + ipb
    q, k, v = qkv[..., :E], qkv[..., E:2 * E], qkv[..., 2 * E:]
    q = q / float(Dh) ** 0.5

    def split(t):
        return jnp.transpose(t.reshape(L, N * H, Dh), (1, 0, 2))

    qh, kh, vh = split(q), split(k), split(v)
    s = qh @ jnp.transpose(kh, (0, 2, 1))
    p = jax.nn.softmax(s, axis=-1)
    ctx = jnp.transpose(p @ vh, (1, 0, 2)).reshape(L, N, E)
    return ctx @ opw.T + opb


def _net_ref(state, net, apply_softmax):
    x_emb = _discretize_embed_ref(state, net['tables'])      # (B, in_dim, E)
    attn = _mha_ref(x_emb, net['in_proj_w'], net['in_proj_b'],
                    net['out_proj_w'], net['out_proj_b'], net['num_heads'])
    flat = attn.reshape(attn.shape[0], -1)
    ret = flat @ net['lin_w'].T + net['lin_b']
    if apply_softmax:
        ret = jax.nn.softmax(ret, axis=-1)
    return ret


# ----------------------------------- main ------------------------------------
if __name__ == "__main__":
    key = jax.random.PRNGKey(0)
    B, state_dim, action_dim = 4, 8, 6
    k_state, k_actor, k_critic = jax.random.split(key, 3)

    state = jax.random.uniform(k_state, (B, state_dim), jnp.float32,
                               minval=-5.0, maxval=310.0)    # exercises clamping
    actor_net = init_attn_net(k_actor, state_dim, action_dim, num_heads=2)
    critic_net = init_attn_net(k_critic, state_dim, 1, num_heads=1)

    bins2, tables2, params = pack_actor_critic(actor_net, critic_net)
    fwd = make_actor_critic_forward(state_dim, action_dim,
                                    actor_net['num_heads'],
                                    critic_net['num_heads'])

    probs, values = fwd(state, bins2, tables2, params)
    probs = jax.block_until_ready(probs)
    values = jax.block_until_ready(values)

    probs_ref = np.asarray(_net_ref(state, actor_net, True))
    values_ref = np.asarray(_net_ref(state, critic_net, False))

    assert probs.shape == (B, action_dim) and values.shape == (B, 1)
    assert np.all(np.isfinite(np.asarray(probs)))
    assert np.all(np.isfinite(np.asarray(values)))
    assert np.allclose(np.asarray(probs).sum(-1), 1.0, atol=1e-5)
    assert np.allclose(np.asarray(probs), probs_ref, atol=1e-2, rtol=1e-2)
    assert np.allclose(np.asarray(values), values_ref, atol=1e-2, rtol=1e-2)
    print("KERNEL_OK")
</pallas_src>

<mosaic_0001>
module attributes {stable_mosaic.version = 11 : i64} {
  func.func @_fused_kernel(%arg0: memref<64x1xf32, #tpu.memory_space<vmem>>, %arg1: memref<2x1152xf32, #tpu.memory_space<vmem>>, %arg2: memref<8x1152x16xbf16, #tpu.memory_space<vmem>>, %arg3: memref<168x256xf32, #tpu.memory_space<vmem>>, %arg4: memref<8x256xf32, #tpu.memory_space<vmem>>) attributes {dimension_semantics = [], scalar_prefetch = 0 : i64, scratch_operands = 0 : i64, tpu.core_type = #tpu.core_type<tc>} {
    %c0 = arith.constant 0 : index
    %c0_0 = arith.constant 0 : index
    %0 = vector.load %arg0[%c0, %c0_0] : memref<64x1xf32, #tpu.memory_space<vmem>>, vector<64x1xf32>
    %cst = arith.constant -1.000000e+00 : f32
    %cst_1 = arith.constant 3.000000e+02 : f32
    %1 = vector.broadcast %cst : f32 to vector<64x1xf32>
    %2 = arith.maximumf %1, %0 : vector<64x1xf32>
    %3 = vector.broadcast %cst_1 : f32 to vector<64x1xf32>
    %4 = arith.minimumf %3, %2 : vector<64x1xf32>
    %c0_2 = arith.constant 0 : index
    %c0_3 = arith.constant 0 : index
    %5 = vector.load %arg1[%c0_2, %c0_3] : memref<2x1152xf32, #tpu.memory_space<vmem>>, vector<1x1152xf32>
    %c1 = arith.constant 1 : index
    %c0_4 = arith.constant 0 : index
    %6 = vector.load %arg1[%c1, %c0_4] : memref<2x1152xf32, #tpu.memory_space<vmem>>, vector<1x1152xf32>
    %7 = vector.broadcast %5 : vector<1x1152xf32> to vector<64x1152xf32>
    %8 = vector.broadcast %4 : vector<64x1xf32> to vector<64x1152xf32>
    %9 = arith.cmpf oge, %7, %8 : vector<64x1152xf32>
    %10 = vector.broadcast %6 : vector<1x1152xf32> to vector<64x1152xf32>
    %11 = vector.broadcast %4 : vector<64x1xf32> to vector<64x1152xf32>
    %12 = arith.cmpf olt, %10, %11 : vector<64x1152xf32>
    %13 = arith.andi %9, %12 : vector<64x1152xi1>
    %14 = arith.extui %13 : vector<64x1152xi1> to vector<64x1152xi32>
    %15 = arith.sitofp %14 : vector<64x1152xi32> to vector<64x1152xf32>
    %16 = arith.truncf %15 : vector<64x1152xf32> to vector<64x1152xbf16>
    %17 = vector.extract_strided_slice %16 {offsets = [0, 0], sizes = [8, 1152], strides = [1, 1]} : vector<64x1152xbf16> to vector<8x1152xbf16>
    %c0_5 = arith.constant 0 : index
    %c0_6 = arith.constant 0 : index
    %c0_7 = arith.constant 0 : index
    %18 = vector.load %arg2[%c0_5, %c0_6, %c0_7] : memref<8x1152x16xbf16, #tpu.memory_space<vmem>>, vector<1x1152x16xbf16>
    %19 = vector.shape_cast %18 : vector<1x1152x16xbf16> to vector<1152x16xbf16>
    %cst_8 = arith.constant dense<0.000000e+00> : vector<8x16xf32>
    %20 = tpu.matmul %17, %19, %cst_8 {dimension_numbers = #tpu.dot_dimension_numbers<[1], [0], [0], [1], [0, 0, 1, 1], [], []>} : vector<8x1152xbf16>, vector<1152x16xbf16>, vector<8x16xf32> -> vector<8x16xf32>
    %21 = vector.extract_strided_slice %16 {offsets = [8, 0], sizes = [8, 1152], strides = [1, 1]} : vector<64x1152xbf16> to vector<8x1152xbf16>
    %c1_9 = arith.constant 1 : index
    %c0_10 = arith.constant 0 : index
    %c0_11 = arith.constant 0 : index
    %22 = vector.load %arg2[%c1_9, %c0_10, %c0_11] : memref<8x1152x16xbf16, #tpu.memory_space<vmem>>, vector<1x1152x16xbf16>
    %23 = vector.shape_cast %22 : vector<1x1152x16xbf16> to vector<1152x16xbf16>
    %cst_12 = arith.constant dense<0.000000e+00> : vector<8x16xf32>
    %24 = tpu.matmul %21, %23, %cst_12 {dimension_numbers = #tpu.dot_dimension_numbers<[1], [0], [0], [1], [0, 0, 1, 1], [], []>} : vector<8x1152xbf16>, vector<1152x16xbf16>, vector<8x16xf32> -> vector<8x16xf32>
    %25 = vector.extract_strided_slice %16 {offsets = [16, 0], sizes = [8, 1152], strides = [1, 1]} : vector<64x1152xbf16> to vector<8x1152xbf16>
    %c2 = arith.constant 2 : index
    %c0_13 = arith.constant 0 : index
    %c0_14 = arith.constant 0 : index
    %26 = vector.load %arg2[%c2, %c0_13, %c0_14] : memref<8x1152x16xbf16, #tpu.memory_space<vmem>>, vector<1x1152x16xbf16>
    %27 = vector.shape_cast %26 : vector<1x1152x16xbf16> to vector<1152x16xbf16>
    %cst_15 = arith.constant dense<0.000000e+00> : vector<8x16xf32>
    %28 = tpu.matmul %25, %27, %cst_15 {dimension_numbers = #tpu.dot_dimension_numbers<[1], [0], [0], [1], [0, 0, 1, 1], [], []>} : vector<8x1152xbf16>, vector<1152x16xbf16>, vector<8x16xf32> -> vector<8x16xf32>
    %29 = vector.extract_strided_slice %16 {offsets = [24, 0], sizes = [8, 1152], strides = [1, 1]} : vector<64x1152xbf16> to vector<8x1152xbf16>
    %c3 = arith.constant 3 : index
    %c0_16 = arith.constant 0 : index
    %c0_17 = arith.constant 0 : index
    %30 = vector.load %arg2[%c3, %c0_16, %c0_17] : memref<8x1152x16xbf16, #tpu.memory_space<vmem>>, vector<1x1152x16xbf16>
    %31 = vector.shape_cast %30 : vector<1x1152x16xbf16> to vector<1152x16xbf16>
    %cst_18 = arith.constant dense<0.000000e+00> : vector<8x16xf32>
    %32 = tpu.matmul %29, %31, %cst_18 {dimension_numbers = #tpu.dot_dimension_numbers<[1], [0], [0], [1], [0, 0, 1, 1], [], []>} : vector<8x1152xbf16>, vector<1152x16xbf16>, vector<8x16xf32> -> vector<8x16xf32>
    %33 = vector.extract_strided_slice %16 {offsets = [32, 0], sizes = [8, 1152], strides = [1, 1]} : vector<64x1152xbf16> to vector<8x1152xbf16>
    %c4 = arith.constant 4 : index
    %c0_19 = arith.constant 0 : index
    %c0_20 = arith.constant 0 : index
    %34 = vector.load %arg2[%c4, %c0_19, %c0_20] : memref<8x1152x16xbf16, #tpu.memory_space<vmem>>, vector<1x1152x16xbf16>
    %35 = vector.shape_cast %34 : vector<1x1152x16xbf16> to vector<1152x16xbf16>
    %cst_21 = arith.constant dense<0.000000e+00> : vector<8x16xf32>
    %36 = tpu.matmul %33, %35, %cst_21 {dimension_numbers = #tpu.dot_dimension_numbers<[1], [0], [0], [1], [0, 0, 1, 1], [], []>} : vector<8x1152xbf16>, vector<1152x16xbf16>, vector<8x16xf32> -> vector<8x16xf32>
    %37 = vector.extract_strided_slice %16 {offsets = [40, 0], sizes = [8, 1152], strides = [1, 1]} : vector<64x1152xbf16> to vector<8x1152xbf16>
    %c5 = arith.constant 5 : index
    %c0_22 = arith.constant 0 : index
    %c0_23 = arith.constant 0 : index
    %38 = vector.load %arg2[%c5, %c0_22, %c0_23] : memref<8x1152x16xbf16, #tpu.memory_space<vmem>>, vector<1x1152x16xbf16>
    %39 = vector.shape_cast %38 : vector<1x1152x16xbf16> to vector<1152x16xbf16>
    %cst_24 = arith.constant dense<0.000000e+00> : vector<8x16xf32>
    %40 = tpu.matmul %37, %39, %cst_24 {dimension_numbers = #tpu.dot_dimension_numbers<[1], [0], [0], [1], [0, 0, 1, 1], [], []>} : vector<8x1152xbf16>, vector<1152x16xbf16>, vector<8x16xf32> -> vector<8x16xf32>
    %41 = vector.extract_strided_slice %16 {offsets = [48, 0], sizes = [8, 1152], strides = [1, 1]} : vector<64x1152xbf16> to vector<8x1152xbf16>
    %c6 = arith.constant 6 : index
    %c0_25 = arith.constant 0 : index
    %c0_26 = arith.constant 0 : index
    %42 = vector.load %arg2[%c6, %c0_25, %c0_26] : memref<8x1152x16xbf16, #tpu.memory_space<vmem>>, vector<1x1152x16xbf16>
    %43 = vector.shape_cast %42 : vector<1x1152x16xbf16> to vector<1152x16xbf16>
    %cst_27 = arith.constant dense<0.000000e+00> : vector<8x16xf32>
    %44 = tpu.matmul %41, %43, %cst_27 {dimension_numbers = #tpu.dot_dimension_numbers<[1], [0], [0], [1], [0, 0, 1, 1], [], []>} : vector<8x1152xbf16>, vector<1152x16xbf16>, vector<8x16xf32> -> vector<8x16xf32>
    %45 = vector.extract_strided_slice %16 {offsets = [56, 0], sizes = [8, 1152], strides = [1, 1]} : vector<64x1152xbf16> to vector<8x1152xbf16>
    %c7 = arith.constant 7 : index
    %c0_28 = arith.constant 0 : index
    %c0_29 = arith.constant 0 : index
    %46 = vector.load %arg2[%c7, %c0_28, %c0_29] : memref<8x1152x16xbf16, #tpu.memory_space<vmem>>, vector<1x1152x16xbf16>
    %47 = vector.shape_cast %46 : vector<1x1152x16xbf16> to vector<1152x16xbf16>
    %cst_30 = arith.constant dense<0.000000e+00> : vector<8x16xf32>
    %48 = tpu.matmul %45, %47, %cst_30 {dimension_numbers = #tpu.dot_dimension_numbers<[1], [0], [0], [1], [0, 0, 1, 1], [], []>} : vector<8x1152xbf16>, vector<1152x16xbf16>, vector<8x16xf32> -> vector<8x16xf32>
    %49 = tpu.concatenate %20, %24, %28, %32, %36, %40, %44, %48 in 0 : vector<8x16xf32>, vector<8x16xf32>, vector<8x16xf32>, vector<8x16xf32>, vector<8x16xf32>, vector<8x16xf32>, vector<8x16xf32>, vector<8x16xf32> -> vector<64x16xf32>
    %c0_31 = arith.constant 0 : index
    %c0_32 = arith.constant 0 : index
    %50 = vector.load %arg3[%c0_31, %c0_32] : memref<168x256xf32, #tpu.memory_space<vmem>>, vector<16x48xf32>
    %c16 = arith.constant 16 : index
    %c0_33 = arith.constant 0 : index
    %51 = vector.load %arg3[%c16, %c0_33] : memref<168x256xf32, #tpu.memory_space<vmem>>, vector<16x16xf32>
    %c160 = arith.constant 160 : index
    %c0_34 = arith.constant 0 : index
    %52 = vector.load %arg3[%c160, %c0_34] : memref<168x256xf32, #tpu.memory_space<vmem>>, vector<1x48xf32>
    %c161 = arith.constant 161 : index
    %c0_35 = arith.constant 0 : index
    %53 = vector.load %arg3[%c161, %c0_35] : memref<168x256xf32, #tpu.memory_space<vmem>>, vector<1x16xf32>
    %c162 = arith.constant 162 : index
    %c0_36 = arith.constant 0 : index
    %54 = vector.load %arg3[%c162, %c0_36] : memref<168x256xf32, #tpu.memory_space<vmem>>, vector<1x256xf32>
    %cst_37 = arith.constant dense<0.000000e+00> : vector<64x48xf32>
    %55 = tpu.matmul %49, %50, %cst_37 {dimension_numbers = #tpu.dot_dimension_numbers<[1], [0], [0], [1], [0, 0, 1, 1], [], []>} : vector<64x16xf32>, vector<16x48xf32>, vector<64x48xf32> -> vector<64x48xf32>
    %56 = vector.broadcast %52 : vector<1x48xf32> to vector<64x48xf32>
    %57 = arith.addf %55, %56 : vector<64x48xf32>
    %58 = vector.shape_cast %57 : vector<64x48xf32> to vector<8x8x48xf32>
    %59 = tpu.iota {dimensions = array<i32: 2>} : vector<1x8x8xi32>
    %c4_i32 = arith.constant 4 : i32
    %60 = vector.broadcast %c4_i32 : i32 to vector<1x8x8xi32>
    %61 = arith.cmpi slt, %59, %60 : vector<1x8x8xi32>
    %62 = vector.extract_strided_slice %58 {offsets = [0, 0, 0], sizes = [8, 8, 8], strides = [1, 1, 1]} : vector<8x8x48xf32> to vector<8x8x8xf32>
    %63 = vector.extract_strided_slice %58 {offsets = [0, 0, 8], sizes = [8, 8, 8], strides = [1, 1, 1]} : vector<8x8x48xf32> to vector<8x8x8xf32>
    %64 = vector.extract_strided_slice %58 {offsets = [0, 0, 16], sizes = [8, 8, 8], strides = [1, 1, 1]} : vector<8x8x48xf32> to vector<8x8x8xf32>
    %65 = vector.extract_strided_slice %62 {offsets = [0, 0, 0], sizes = [8, 8, 4], strides = [1, 1, 1]} : vector<8x8x8xf32> to vector<8x8x4xf32>
    %cst_38 = arith.constant 5.000000e-01 : f32
    %66 = vector.broadcast %cst_38 : f32 to vector<8x8x4xf32>
    %67 = arith.mulf %65, %66 : vector<8x8x4xf32>
    %68 = vector.extract_strided_slice %63 {offsets = [0, 0, 0], sizes = [8, 8, 4], strides = [1, 1, 1]} : vector<8x8x8xf32> to vector<8x8x4xf32>
    %69 = vector.extract_strided_slice %64 {offsets = [0, 0, 0], sizes = [8, 8, 4], strides = [1, 1, 1]} : vector<8x8x8xf32> to vector<8x8x4xf32>
    "tpu.trace_start"() <{level = 10 : i32, message = "nld,nmd->nlm"}> : () -> ()
    %cst_39 = arith.constant dense<0.000000e+00> : vector<8x8x8xf32>
    %70 = tpu.matmul %67, %68, %cst_39 {dimension_numbers = #tpu.dot_dimension_numbers<[2], [2], [1], [1], [0, 0, 0, 1, 1, 1], [0], [0]>} : vector<8x8x4xf32>, vector<8x8x4xf32>, vector<8x8x8xf32> -> vector<8x8x8xf32>
    %cst_40 = arith.constant -1.000000e+30 : f32
    "tpu.trace_stop"() : () -> ()
    %71 = vector.shape_cast %61 : vector<1x8x8xi1> to vector<1x8x8xi1>
    %72 = vector.broadcast %71 : vector<1x8x8xi1> to vector<8x8x8xi1>
    %73 = vector.broadcast %cst_40 : f32 to vector<8x8x8xf32>
    %74 = arith.select %72, %70, %73 : vector<8x8x8xi1>, vector<8x8x8xf32>
    %cst_41 = arith.constant dense<0xFF800000> : vector<8x8xf32>
    %75 = vector.multi_reduction <maximumf>, %74, %cst_41 [2] : vector<8x8x8xf32> to vector<8x8xf32>
    %76 = vector.shape_cast %75 : vector<8x8xf32> to vector<8x8x1xf32>
    %77 = vector.broadcast %76 : vector<8x8x1xf32> to vector<8x8x8xf32>
    %78 = arith.subf %74, %77 : vector<8x8x8xf32>
    %79 = math.exp %78 : vector<8x8x8xf32>
    %cst_42 = arith.constant dense<0.000000e+00> : vector<8x8xf32>
    %80 = vector.multi_reduction <add>, %79, %cst_42 [2] : vector<8x8x8xf32> to vector<8x8xf32>
    %81 = vector.shape_cast %80 : vector<8x8xf32> to vector<8x8x1xf32>
    %82 = tpu.reciprocal %81 {approx = true} : vector<8x8x1xf32> -> vector<8x8x1xf32>
    %83 = vector.broadcast %82 : vector<8x8x1xf32> to vector<8x8x8xf32>
    %84 = arith.mulf %79, %83 : vector<8x8x8xf32>
    "tpu.trace_start"() <{level = 10 : i32, message = "nlm,nmd->nld"}> : () -> ()
    %cst_43 = arith.constant dense<0.000000e+00> : vector<8x8x4xf32>
    %85 = tpu.matmul %84, %69, %cst_43 {dimension_numbers = #tpu.dot_dimension_numbers<[2], [1], [1], [2], [0, 0, 0, 1, 1, 2], [0], [0]>} : vector<8x8x8xf32>, vector<8x8x4xf32>, vector<8x8x4xf32> -> vector<8x8x4xf32>
    "tpu.trace_stop"() : () -> ()
    %86 = vector.extract_strided_slice %62 {offsets = [0, 0, 4], sizes = [8, 8, 4], strides = [1, 1, 1]} : vector<8x8x8xf32> to vector<8x8x4xf32>
    %cst_44 = arith.constant 5.000000e-01 : f32
    %87 = vector.broadcast %cst_44 : f32 to vector<8x8x4xf32>
    %88 = arith.mulf %86, %87 : vector<8x8x4xf32>
    %89 = vector.extract_strided_slice %63 {offsets = [0, 0, 4], sizes = [8, 8, 4], strides = [1, 1, 1]} : vector<8x8x8xf32> to vector<8x8x4xf32>
    %90 = vector.extract_strided_slice %64 {offsets = [0, 0, 4], sizes = [8, 8, 4], strides = [1, 1, 1]} : vector<8x8x8xf32> to vector<8x8x4xf32>
    "tpu.trace_start"() <{level = 10 : i32, message = "nld,nmd->nlm"}> : () -> ()
    %cst_45 = arith.constant dense<0.000000e+00> : vector<8x8x8xf32>
    %91 = tpu.matmul %88, %89, %cst_45 {dimension_numbers = #tpu.dot_dimension_numbers<[2], [2], [1], [1], [0, 0, 0, 1, 1, 1], [0], [0]>} : vector<8x8x4xf32>, vector<8x8x4xf32>, vector<8x8x8xf32> -> vector<8x8x8xf32>
    %cst_46 = arith.constant -1.000000e+30 : f32
    "tpu.trace_stop"() : () -> ()
    %92 = vector.shape_cast %61 : vector<1x8x8xi1> to vector<1x8x8xi1>
    %93 = vector.broadcast %92 : vector<1x8x8xi1> to vector<8x8x8xi1>
    %94 = vector.broadcast %cst_46 : f32 to vector<8x8x8xf32>
    %95 = arith.select %93, %91, %94 : vector<8x8x8xi1>, vector<8x8x8xf32>
    %cst_47 = arith.constant dense<0xFF800000> : vector<8x8xf32>
    %96 = vector.multi_reduction <maximumf>, %95, %cst_47 [2] : vector<8x8x8xf32> to vector<8x8xf32>
    %97 = vector.shape_cast %96 : vector<8x8xf32> to vector<8x8x1xf32>
    %98 = vector.broadcast %97 : vector<8x8x1xf32> to vector<8x8x8xf32>
    %99 = arith.subf %95, %98 : vector<8x8x8xf32>
    %100 = math.exp %99 : vector<8x8x8xf32>
    %cst_48 = arith.constant dense<0.000000e+00> : vector<8x8xf32>
    %101 = vector.multi_reduction <add>, %100, %cst_48 [2] : vector<8x8x8xf32> to vector<8x8xf32>
    %102 = vector.shape_cast %101 : vector<8x8xf32> to vector<8x8x1xf32>
    %103 = tpu.reciprocal %102 {approx = true} : vector<8x8x1xf32> -> vector<8x8x1xf32>
    %104 = vector.broadcast %103 : vector<8x8x1xf32> to vector<8x8x8xf32>
    %105 = arith.mulf %100, %104 : vector<8x8x8xf32>
    "tpu.trace_start"() <{level = 10 : i32, message = "nlm,nmd->nld"}> : () -> ()
    %cst_49 = arith.constant dense<0.000000e+00> : vector<8x8x4xf32>
    %106 = tpu.matmul %105, %90, %cst_49 {dimension_numbers = #tpu.dot_dimension_numbers<[2], [1], [1], [2], [0, 0, 0, 1, 1, 2], [0], [0]>} : vector<8x8x8xf32>, vector<8x8x4xf32>, vector<8x8x4xf32> -> vector<8x8x4xf32>
    "tpu.trace_stop"() : () -> ()
    %107 = tpu.concatenate %85, %106 in 2 : vector<8x8x4xf32>, vector<8x8x4xf32> -> vector<8x8x8xf32>
    %108 = vector.extract_strided_slice %58 {offsets = [0, 0, 24], sizes = [8, 8, 8], strides = [1, 1, 1]} : vector<8x8x48xf32> to vector<8x8x8xf32>
    %109 = vector.extract_strided_slice %58 {offsets = [0, 0, 32], sizes = [8, 8, 8], strides = [1, 1, 1]} : vector<8x8x48xf32> to vector<8x8x8xf32>
    %110 = vector.extract_strided_slice %58 {offsets = [0, 0, 40], sizes = [8, 8, 8], strides = [1, 1, 1]} : vector<8x8x48xf32> to vector<8x8x8xf32>
    %cst_50 = arith.constant 0.353553385 : f32
    %111 = vector.broadcast %cst_50 : f32 to vector<8x8x8xf32>
    %112 = arith.mulf %108, %111 : vector<8x8x8xf32>
    "tpu.trace_start"() <{level = 10 : i32, message = "nld,nmd->nlm"}> : () -> ()
    %cst_51 = arith.constant dense<0.000000e+00> : vector<8x8x8xf32>
    %113 = tpu.matmul %112, %109, %cst_51 {dimension_numbers = #tpu.dot_dimension_numbers<[2], [2], [1], [1], [0, 0, 0, 1, 1, 1], [0], [0]>} : vector<8x8x8xf32>, vector<8x8x8xf32>, vector<8x8x8xf32> -> vector<8x8x8xf32>
    %cst_52 = arith.constant -1.000000e+30 : f32
    "tpu.trace_stop"() : () -> ()
    %114 = vector.shape_cast %61 : vector<1x8x8xi1> to vector<1x8x8xi1>
    %115 = vector.broadcast %114 : vector<1x8x8xi1> to vector<8x8x8xi1>
    %116 = vector.broadcast %cst_52 : f32 to vector<8x8x8xf32>
    %117 = arith.select %115, %113, %116 : vector<8x8x8xi1>, vector<8x8x8xf32>
    %cst_53 = arith.constant dense<0xFF800000> : vector<8x8xf32>
    %118 = vector.multi_reduction <maximumf>, %117, %cst_53 [2] : vector<8x8x8xf32> to vector<8x8xf32>
    %119 = vector.shape_cast %118 : vector<8x8xf32> to vector<8x8x1xf32>
    %120 = vector.broadcast %119 : vector<8x8x1xf32> to vector<8x8x8xf32>
    %121 = arith.subf %117, %120 : vector<8x8x8xf32>
    %122 = math.exp %121 : vector<8x8x8xf32>
    %cst_54 = arith.constant dense<0.000000e+00> : vector<8x8xf32>
    %123 = vector.multi_reduction <add>, %122, %cst_54 [2] : vector<8x8x8xf32> to vector<8x8xf32>
    %124 = vector.shape_cast %123 : vector<8x8xf32> to vector<8x8x1xf32>
    %125 = tpu.reciprocal %124 {approx = true} : vector<8x8x1xf32> -> vector<8x8x1xf32>
    %126 = vector.broadcast %125 : vector<8x8x1xf32> to vector<8x8x8xf32>
    %127 = arith.mulf %122, %126 : vector<8x8x8xf32>
    "tpu.trace_start"() <{level = 10 : i32, message = "nlm,nmd->nld"}> : () -> ()
    %cst_55 = arith.constant dense<0.000000e+00> : vector<8x8x8xf32>
    %128 = tpu.matmul %127, %110, %cst_55 {dimension_numbers = #tpu.dot_dimension_numbers<[2], [1], [1], [2], [0, 0, 0, 1, 1, 2], [0], [0]>} : vector<8x8x8xf32>, vector<8x8x8xf32>, vector<8x8x8xf32> -> vector<8x8x8xf32>
    "tpu.trace_stop"() : () -> ()
    %129 = tpu.concatenate %107, %128 in 2 : vector<8x8x8xf32>, vector<8x8x8xf32> -> vector<8x8x16xf32>
    %130 = vector.shape_cast %129 : vector<8x8x16xf32> to vector<64x16xf32>
    %cst_56 = arith.constant dense<0.000000e+00> : vector<64x16xf32>
    %131 = tpu.matmul %130, %51, %cst_56 {dimension_numbers = #tpu.dot_dimension_numbers<[1], [0], [0], [1], [0, 0, 1, 1], [], []>} : vector<64x16xf32>, vector<16x16xf32>, vector<64x16xf32> -> vector<64x16xf32>
    %132 = vector.broadcast %53 : vector<1x16xf32> to vector<64x16xf32>
    %133 = arith.addf %131, %132 : vector<64x16xf32>
    %134 = vector.extract_strided_slice %133 {offsets = [0, 0], sizes = [8, 16], strides = [1, 1]} : vector<64x16xf32> to vector<8x16xf32>
    %c32 = arith.constant 32 : index
    %c0_57 = arith.constant 0 : index
    %135 = vector.load %arg3[%c32, %c0_57] : memref<168x256xf32, #tpu.memory_space<vmem>>, vector<16x256xf32>
    %cst_58 = arith.constant dense<0.000000e+00> : vector<8x256xf32>
    %136 = tpu.matmul %134, %135, %cst_58 {dimension_numbers = #tpu.dot_dimension_numbers<[1], [0], [0], [1], [0, 0, 1, 1], [], []>} : vector<8x16xf32>, vector<16x256xf32>, vector<8x256xf32> -> vector<8x256xf32>
    %137 = vector.extract_strided_slice %133 {offsets = [8, 0], sizes = [8, 16], strides = [1, 1]} : vector<64x16xf32> to vector<8x16xf32>
    %c48 = arith.constant 48 : index
    %c0_59 = arith.constant 0 : index
    %138 = vector.load %arg3[%c48, %c0_59] : memref<168x256xf32, #tpu.memory_space<vmem>>, vector<16x256xf32>
    %cst_60 = arith.constant dense<0.000000e+00> : vector<8x256xf32>
    %139 = tpu.matmul %137, %138, %cst_60 {dimension_numbers = #tpu.dot_dimension_numbers<[1], [0], [0], [1], [0, 0, 1, 1], [], []>} : vector<8x16xf32>, vector<16x256xf32>, vector<8x256xf32> -> vector<8x256xf32>
    %140 = arith.addf %136, %139 : vector<8x256xf32>
    %141 = vector.extract_strided_slice %133 {offsets = [16, 0], sizes = [8, 16], strides = [1, 1]} : vector<64x16xf32> to vector<8x16xf32>
    %c64 = arith.constant 64 : index
    %c0_61 = arith.constant 0 : index
    %142 = vector.load %arg3[%c64, %c0_61] : memref<168x256xf32, #tpu.memory_space<vmem>>, vector<16x256xf32>
    %cst_62 = arith.constant dense<0.000000e+00> : vector<8x256xf32>
    %143 = tpu.matmul %141, %142, %cst_62 {dimension_numbers = #tpu.dot_dimension_numbers<[1], [0], [0], [1], [0, 0, 1, 1], [], []>} : vector<8x16xf32>, vector<16x256xf32>, vector<8x256xf32> -> vector<8x256xf32>
    %144 = arith.addf %140, %143 : vector<8x256xf32>
    %145 = vector.extract_strided_slice %133 {offsets = [24, 0], sizes = [8, 16], strides = [1, 1]} : vector<64x16xf32> to vector<8x16xf32>
    %c80 = arith.constant 80 : index
    %c0_63 = arith.constant 0 : index
    %146 = vector.load %arg3[%c80, %c0_63] : memref<168x256xf32, #tpu.memory_space<vmem>>, vector<16x256xf32>
    %cst_64 = arith.constant dense<0.000000e+00> : vector<8x256xf32>
    %147 = tpu.matmul %145, %146, %cst_64 {dimension_numbers = #tpu.dot_dimension_numbers<[1], [0], [0], [1], [0, 0, 1, 1], [], []>} : vector<8x16xf32>, vector<16x256xf32>, vector<8x256xf32> -> vector<8x256xf32>
    %148 = arith.addf %144, %147 : vector<8x256xf32>
    %149 = vector.extract_strided_slice %133 {offsets = [32, 0], sizes = [8, 16], strides = [1, 1]} : vector<64x16xf32> to vector<8x16xf32>
    %c96 = arith.constant 96 : index
    %c0_65 = arith.constant 0 : index
    %150 = vector.load %arg3[%c96, %c0_65] : memref<168x256xf32, #tpu.memory_space<vmem>>, vector<16x256xf32>
    %cst_66 = arith.constant dense<0.000000e+00> : vector<8x256xf32>
    %151 = tpu.matmul %149, %150, %cst_66 {dimension_numbers = #tpu.dot_dimension_numbers<[1], [0], [0], [1], [0, 0, 1, 1], [], []>} : vector<8x16xf32>, vector<16x256xf32>, vector<8x256xf32> -> vector<8x256xf32>
    %152 = arith.addf %148, %151 : vector<8x256xf32>
    %153 = vector.extract_strided_slice %133 {offsets = [40, 0], sizes = [8, 16], strides = [1, 1]} : vector<64x16xf32> to vector<8x16xf32>
    %c112 = arith.constant 112 : index
    %c0_67 = arith.constant 0 : index
    %154 = vector.load %arg3[%c112, %c0_67] : memref<168x256xf32, #tpu.memory_space<vmem>>, vector<16x256xf32>
    %cst_68 = arith.constant dense<0.000000e+00> : vector<8x256xf32>
    %155 = tpu.matmul %153, %154, %cst_68 {dimension_numbers = #tpu.dot_dimension_numbers<[1], [0], [0], [1], [0, 0, 1, 1], [], []>} : vector<8x16xf32>, vector<16x256xf32>, vector<8x256xf32> -> vector<8x256xf32>
    %156 = arith.addf %152, %155 : vector<8x256xf32>
    %157 = vector.extract_strided_slice %133 {offsets = [48, 0], sizes = [8, 16], strides = [1, 1]} : vector<64x16xf32> to vector<8x16xf32>
    %c128 = arith.constant 128 : index
    %c0_69 = arith.constant 0 : index
    %158 = vector.load %arg3[%c128, %c0_69] : memref<168x256xf32, #tpu.memory_space<vmem>>, vector<16x256xf32>
    %cst_70 = arith.constant dense<0.000000e+00> : vector<8x256xf32>
    %159 = tpu.matmul %157, %158, %cst_70 {dimension_numbers = #tpu.dot_dimension_numbers<[1], [0], [0], [1], [0, 0, 1, 1], [], []>} : vector<8x16xf32>, vector<16x256xf32>, vector<8x256xf32> -> vector<8x256xf32>
    %160 = arith.addf %156, %159 : vector<8x256xf32>
    %161 = vector.extract_strided_slice %133 {offsets = [56, 0], sizes = [8, 16], strides = [1, 1]} : vector<64x16xf32> to vector<8x16xf32>
    %c144 = arith.constant 144 : index
    %c0_71 = arith.constant 0 : index
    %162 = vector.load %arg3[%c144, %c0_71] : memref<168x256xf32, #tpu.memory_space<vmem>>, vector<16x256xf32>
    %cst_72 = arith.constant dense<0.000000e+00> : vector<8x256xf32>
    %163 = tpu.matmul %161, %162, %cst_72 {dimension_numbers = #tpu.dot_dimension_numbers<[1], [0], [0], [1], [0, 0, 1, 1], [], []>} : vector<8x16xf32>, vector<16x256xf32>, vector<8x256xf32> -> vector<8x256xf32>
    %164 = arith.addf %160, %163 : vector<8x256xf32>
    %165 = vector.broadcast %54 : vector<1x256xf32> to vector<8x256xf32>
    %166 = arith.addf %164, %165 : vector<8x256xf32>
    %167 = tpu.iota {dimensions = array<i32: 1>} : vector<8x256xi32>
    %c6_i32 = arith.constant 6 : i32
    %168 = vector.broadcast %c6_i32 : i32 to vector<8x256xi32>
    %169 = arith.cmpi slt, %167, %168 : vector<8x256xi32>
    %cst_73 = arith.constant -1.000000e+30 : f32
    %170 = vector.broadcast %cst_73 : f32 to vector<8x256xf32>
    %171 = arith.select %169, %166, %170 : vector<8x256xi1>, vector<8x256xf32>
    %cst_74 = arith.constant dense<0xFF800000> : vector<8xf32>
    %172 = vector.multi_reduction <maximumf>, %171, %cst_74 [1] : vector<8x256xf32> to vector<8xf32>
    %173 = vector.shape_cast %172 : vector<8xf32> to vector<8x1xf32>
    %174 = vector.broadcast %173 : vector<8x1xf32> to vector<8x256xf32>
    %175 = arith.subf %171, %174 : vector<8x256xf32>
    %176 = math.exp %175 : vector<8x256xf32>
    %cst_75 = arith.constant dense<0.000000e+00> : vector<8xf32>
    %177 = vector.multi_reduction <add>, %176, %cst_75 [1] : vector<8x256xf32> to vector<8xf32>
    %178 = vector.shape_cast %177 : vector<8xf32> to vector<8x1xf32>
    %179 = vector.broadcast %178 : vector<8x1xf32> to vector<8x256xf32>
    %180 = arith.divf %176, %179 : vector<8x256xf32>
    %c128_i32 = arith.constant 128 : i32
    %181 = vector.broadcast %c128_i32 : i32 to vector<8x256xi32>
    %182 = arith.cmpi slt, %167, %181 : vector<8x256xi32>
    %183 = arith.select %182, %180, %166 : vector<8x256xi1>, vector<8x256xf32>
    %c0_76 = arith.constant 0 : index
    %c0_77 = arith.constant 0 : index
    %184 = vector.load %arg4[%c0_76, %c0_77] : memref<8x256xf32, #tpu.memory_space<vmem>>, vector<8x256xf32>
    tpu.vector_store %arg4[%c0_76, %c0_77], %183 {strides = array<i32>} : memref<8x256xf32, #tpu.memory_space<vmem>>, vector<8x256xf32>,
    return
  }
}

</mosaic_0001>

<bundles_post_ra>
// kernel: fwd.1
= control target key start
LH: loop header
LB: loop body
LE: loop exit
PB: predicated region body
PF: predicated region fallthrough
CT: control target
= control target key end

     0   :  { %v12857_v0 = vmov 0   ;;  %s12859_s21 = smov 120   ;;  %s12860_s22 = smov 112   ;;  %s16253_s0 = inlined_call_operand.vmem [shape: f32[64,1], index: 0, kind: input, shape index: {}]   ;;  %s16254_s2 = inlined_call_operand.vmem [shape: bf16[8,1152,16], index: 2, kind: input, shape index: {}]   ;;  %s16255_s1 = inlined_call_operand.vmem [shape: f32[2,1152], index: 1, kind: input, shape index: {}]   ;;  %s16256_s3 = inlined_call_operand.vmem [shape: f32[168,256], index: 3, kind: input, shape index: {}]   ;;  %s16257_s4 = inlined_call_operand.vmem [shape: f32[8,256], index: 4, kind: output, shape index: {}]  }
   0x1   :  { %12691 = vset.pattern.permute.xlu0 %v12857_v0  ;;  %v17_v1 = vld [vmem:[%s16253_s0] sm:$0xff]  ;;  %12692 = vset.pattern.permute.xlu1 %v12857_v0  ;;  %v12106_v3 = vld [vmem:[%s16254_s2 + $0x38] sm:$0xff]  ;;  %v18_v6 = vld [vmem:[%s16253_s0 + $0x8] sm:$0xff]  ;;  %s12861_s23 = smov 124   ;;  %s12862_s24 = smov 116  }
   0x2   :  { %v25_v2 = vmax.f32 %v17_v1, -1.0  ;;  %v12114_v4 = vld [vmem:[%s16254_s2 + $0x78] sm:$0xff]  ;;  %12693 = vset.pattern.permute.xlu2 %v12857_v0  ;;  %1136 = vmatpush.bf16.msra.mxu0 %v12106_v3  ;;  %v12105_v9 = vld [vmem:[%s16254_s2 + $0x30] sm:$0xff]  ;;  %v26_v13 = vmax.f32 %v18_v6, -1.0  ;;  %v12104_v14 = vld [vmem:[%s16254_s2 + $0x28] sm:$0xff]  ;;  %s12863_s25 = smov 108  }
   0x3   :  { %v12122_v5 = vld [vmem:[%s16254_s2 + $0xb8] sm:$0xff]  ;;  %1149 = vmatpush.bf16.msra.mxu1 %v12114_v4  ;;  %v12113_v10 = vld [vmem:[%s16254_s2 + $0x70] sm:$0xff]  ;;  %v12112_v15 = vld [vmem:[%s16254_s2 + $0x68] sm:$0xff]  ;;  %s12864_s26 = smov 96   ;;  %s12865_s27 = smov 104  }
   0x4   :  { %v12130_v7 = vld [vmem:[%s16254_s2 + $0xf8] sm:$0xff]  ;;  %v33_v8 = vmin.f32 %v25_v2, 300.0  ;;  %1162 = vmatpush.bf16.msra.mxu2 %v12122_v5  ;;  %v12121_v11 = vld [vmem:[%s16254_s2 + $0xb0] sm:$0xff]  ;;  %v12120_v16 = vld [vmem:[%s16254_s2 + $0xa8] sm:$0xff]  ;;  %v34_v18 = vmin.f32 %v26_v13, 300.0  ;;  %s12866_s28 = smov 88  }
   0x5   :  { %1175 = vmatpush.bf16.msra.mxu3 %v12130_v7  ;;  %v12129_v12 = vld [vmem:[%s16254_s2 + $0xf0] sm:$0xff]  ;;  %v12128_v17 = vld [vmem:[%s16254_s2 + $0xe8] sm:$0xff]  ;;  %v12103_v20 = vld [vmem:[%s16254_s2 + $0x20] sm:$0xff]  ;;  %s12867_s29 = smov 4   ;;  %s12868_s30 = smov 8  }
   0x6   :  { %70 = vperm.xlu0 %12691, %v33_v8   ;;  %1137 = vmatpush.bf16.msra.mxu0 %v12105_v9  ;;  %v23_v19 = vld [vmem:[%s16253_s0 + $0x30] sm:$0xff]  ;;  %v12111_v21 = vld [vmem:[%s16254_s2 + $0x60] sm:$0xff]  ;;  %v12102_v26 = vld [vmem:[%s16254_s2 + $0x18] sm:$0xff] }
   0x7   :  { %1150 = vmatpush.bf16.msra.mxu1 %v12113_v10  ;;  %v12119_v22 = vld [vmem:[%s16254_s2 + $0xa0] sm:$0xff]  ;;  %v31_v24 = vmax.f32 %v23_v19, -1.0  ;;  %v19_v25 = vld [vmem:[%s16253_s0 + $0x10] sm:$0xff]  ;;  %v12110_v27 = vld [vmem:[%s16254_s2 + $0x58] sm:$0xff] }
   0x8   :  { %1163 = vmatpush.bf16.msra.mxu2 %v12121_v11  ;;  %v12127_v23 = vld [vmem:[%s16254_s2 + $0xe0] sm:$0xff]  ;;  %v27_v28 = vmax.f32 %v19_v25, -1.0  ;;  %v12118_v29 = vld [vmem:[%s16254_s2 + $0x98] sm:$0xff]  ;;  %v12101_v33 = vld [vmem:[%s16254_s2 + $0x10] sm:$0xff] }
   0x9   :  { %1176 = vmatpush.bf16.msra.mxu3 %v12129_v12  ;;  %v12126_v30 = vld [vmem:[%s16254_s2 + $0xd8] sm:$0xff]  ;;  %v39_v31 = vmin.f32 %v31_v24, 300.0  ;;  %v12109_v34 = vld [vmem:[%s16254_s2 + $0x50] sm:$0xff]  ;;  %v12100_v39 = vld [vmem:[%s16254_s2 + $0x8] sm:$0xff] }
   0xa   :  { %1138 = vmatpush.bf16.msra.mxu0 %v12104_v14  ;;  %v35_v32 = vmin.f32 %v27_v28, 300.0  ;;  %v20_v35 = vld [vmem:[%s16253_s0 + $0x18] sm:$0xff]  ;;  %v12117_v36 = vld [vmem:[%s16254_s2 + $0x90] sm:$0xff]  ;;  %v12108_v40 = vld [vmem:[%s16254_s2 + $0x48] sm:$0xff] }
   0xb   :  { %1151 = vmatpush.bf16.msra.mxu1 %v12112_v15  ;;  %v12125_v37 = vld [vmem:[%s16254_s2 + $0xd0] sm:$0xff]  ;;  %v28_v38 = vmax.f32 %v20_v35, -1.0  ;;  %v12116_v41 = vld [vmem:[%s16254_s2 + $0x88] sm:$0xff]  ;;  %v12099_v44 = vld [vmem:[%s16254_s2] sm:$0xff] }
   0xc   :  { %1164 = vmatpush.bf16.msra.mxu2 %v12120_v16  ;;  %80 = vperm.xlu1 %12692, %v35_v32   ;;  %v12124_v42 = vld [vmem:[%s16254_s2 + $0xc8] sm:$0xff]  ;;  %v12107_v45 = vld [vmem:[%s16254_s2 + $0x40] sm:$0xff]  ;;  %v12138_v48 = vld [vmem:[%s16254_s2 + $0x138] sm:$0xff] }
   0xd   :  { %1177 = vmatpush.bf16.msra.mxu3 %v12128_v17  ;;  %v36_v43 = vmin.f32 %v28_v38, 300.0  ;;  %v12115_v46 = vld [vmem:[%s16254_s2 + $0x80] sm:$0xff]  ;;  %v12146_v49 = vld [vmem:[%s16254_s2 + $0x178] sm:$0xff]  ;;  %v12137_v52 = vld [vmem:[%s16254_s2 + $0x130] sm:$0xff] }
   0xe   :  { %75 = vperm.xlu0 %12691, %v34_v18   ;;  %1139 = vmatpush.bf16.msra.mxu0 %v12103_v20  ;;  %v12123_v47 = vld [vmem:[%s16254_s2 + $0xc0] sm:$0xff]  ;;  %v12154_v50 = vld [vmem:[%s16254_s2 + $0x1b8] sm:$0xff]  ;;  %v12145_v53 = vld [vmem:[%s16254_s2 + $0x170] sm:$0xff] }
   0xf   :  { %1152 = vmatpush.bf16.msra.mxu1 %v12111_v21  ;;  %v12162_v51 = vld [vmem:[%s16254_s2 + $0x1f8] sm:$0xff]  ;;  %v12153_v54 = vld [vmem:[%s16254_s2 + $0x1b0] sm:$0xff]  ;;  %v12136_v56 = vld [vmem:[%s16254_s2 + $0x128] sm:$0xff] }
  0x10   :  { %1165 = vmatpush.bf16.msra.mxu2 %v12119_v22  ;;  %v12161_v55 = vld [vmem:[%s16254_s2 + $0x1f0] sm:$0xff]  ;;  %v12144_v57 = vld [vmem:[%s16254_s2 + $0x168] sm:$0xff]  ;;  %v12135_v60 = vld [vmem:[%s16254_s2 + $0x120] sm:$0xff] }
  0x11   :  { %1178 = vmatpush.bf16.msra.mxu3 %v12127_v23  ;;  %v12152_v58 = vld [vmem:[%s16254_s2 + $0x1a8] sm:$0xff]  ;;  %v12143_v61 = vld [vmem:[%s16254_s2 + $0x160] sm:$0xff]  ;;  %v12134_v0 = vld [vmem:[%s16254_s2 + $0x118] sm:$0xff] }
  0x12   :  { %1140 = vmatpush.bf16.msra.mxu0 %v12102_v26  ;;  %v12160_v59 = vld [vmem:[%s16254_s2 + $0x1e8] sm:$0xff]  ;;  %v12151_v62 = vld [vmem:[%s16254_s2 + $0x1a0] sm:$0xff]  ;;  %v12142_v1 = vld [vmem:[%s16254_s2 + $0x158] sm:$0xff] }
  0x13   :  { %1153 = vmatpush.bf16.msra.mxu1 %v12110_v27  ;;  %v12159_v63 = vld [vmem:[%s16254_s2 + $0x1e0] sm:$0xff]  ;;  %v12150_v2 = vld [vmem:[%s16254_s2 + $0x198] sm:$0xff]  ;;  %v12133_v6 = vld [vmem:[%s16254_s2 + $0x110] sm:$0xff] }
  0x14   :  { %1166 = vmatpush.bf16.msra.mxu2 %v12118_v29  ;;  %85 = vperm.xlu1 %12692, %v36_v43   ;;  %v12158_v3 = vld [vmem:[%s16254_s2 + $0x1d8] sm:$0xff]  ;;  %v12141_v7 = vld [vmem:[%s16254_s2 + $0x150] sm:$0xff]  ;;  %v12132_v11 = vld [vmem:[%s16254_s2 + $0x108] sm:$0xff] }
  0x15   :  { %1179 = vmatpush.bf16.msra.mxu3 %v12126_v30  ;;  %v24_v4 = vld [vmem:[%s16253_s0 + $0x38] sm:$0xff]  ;;  %v12149_v8 = vld [vmem:[%s16254_s2 + $0x190] sm:$0xff]  ;;  %v12140_v12 = vld [vmem:[%s16254_s2 + $0x148] sm:$0xff] }
  0x16   :  { %100 = vperm.xlu0 %12691, %v39_v31   ;;  %1141 = vmatpush.bf16.msra.mxu0 %v12101_v33  ;;  %v32_v5 = vmax.f32 %v24_v4, -1.0  ;;  %v12157_v9 = vld [vmem:[%s16254_s2 + $0x1d0] sm:$0xff]  ;;  %v12148_v13 = vld [vmem:[%s16254_s2 + $0x188] sm:$0xff]  ;;  %v12131_v15 = vld [vmem:[%s16254_s2 + $0x100] sm:$0xff]  ;;  %v12858_v31 = vmov 0.0  }
  0x17   :  { %1154 = vmatpush.bf16.msra.mxu1 %v12109_v34  ;;  %v12156_v14 = vld [vmem:[%s16254_s2 + $0x1c8] sm:$0xff]  ;;  %v12139_v16 = vld [vmem:[%s16254_s2 + $0x140] sm:$0xff] }
  0x18   :  { %1167 = vmatpush.bf16.msra.mxu2 %v12117_v36  ;;  %v40_v10 = vmin.f32 %v32_v5, 300.0  ;;  %v12147_v17 = vld [vmem:[%s16254_s2 + $0x180] sm:$0xff]  ;;  %v13238_v5 = vld [vmem:[%s16255_s1 + $0x10] ss:$0 sm:$0xff] }
  0x19   :  { %1180 = vmatpush.bf16.msra.mxu3 %v12125_v37  ;;  %v12155_v18 = vld [vmem:[%s16254_s2 + $0x1c0] sm:$0xff] }
  0x1a   :  { %1142 = vmatpush.bf16.msra.mxu0 %v12100_v39  ;;  %v41_v19 = vld [vmem:[%s16255_s1] ss:$2 sm:$0xff]  ;;  %v8608_v20 = vld [vmem:[%s16255_s1 + $0x1] ss:$2 sm:$0xff] }
  0x1b   :  { %1155 = vmatpush.bf16.msra.mxu1 %v12108_v40  ;;  %v13110_v21 = vperm.slane %v41_v19, 0  ;;  %v13112_v22 = vperm.slane %v41_v19, 1  ;;  %v13114_v23 = vperm.slane %v8608_v20, 0  ;;  %v13116_v24 = vperm.slane %v8608_v20, 1 }
  0x1c   :  { %1168 = vmatpush.bf16.msra.mxu2 %v12116_v41  ;;  %105 = vperm.xlu1 %12692, %v40_v10   ;;  %v13118_v25 = vperm.slane %v41_v19, 2  ;;  %v13120_v26 = vperm.slane %v41_v19, 3  ;;  %v13122_v27 = vperm.slane %v8608_v20, 2  ;;  %v13124_v28 = vperm.slane %v8608_v20, 3 }
  0x1d   :  { %1181 = vmatpush.bf16.msra.mxu3 %v12124_v42  ;;  %v13128_v30 = vperm.slane %v41_v19, 4  ;;  %v13147_v33 = vperm.slane %v41_v19, 5  ;;  %v13149_v34 = vperm.slane %v8608_v20, 4  ;;  %v13152_v36 = vperm.slane %v8608_v20, 5 }
  0x1e   :  { %1143 = vmatpush.bf16.msra.mxu0 %v12099_v44  ;;  %v13154_v37 = vperm.slane %v41_v19, 6  ;;  %v13156_v38 = vperm.slane %v8608_v20, 6  ;;  %v13162_v42 = vperm.slane %v41_v19, 7  ;;  %v13164_v43 = vperm.slane %v8608_v20, 7  ;;  %v12166_v19 = vld [vmem:[%s16254_s2 + $0x218] sm:$0xff] }
  0x1f   :  { %1156 = vmatpush.bf16.msra.mxu1 %v12107_v45  ;;  %v12174_v20 = vld [vmem:[%s16254_s2 + $0x258] sm:$0xff] }
  0x20   :  { %1169 = vmatpush.bf16.msra.mxu2 %v12115_v46 }
  0x21   :  { %1182 = vmatpush.bf16.msra.mxu3 %v12123_v47  ;;  %v12170_v47 = vld [vmem:[%s16254_s2 + $0x238] sm:$0xff] }
  0x22   :  { %1188 = vmatpush.bf16.msrb.mxu0 %v12138_v48  ;;  %v12178_v48 = vld [vmem:[%s16254_s2 + $0x278] sm:$0xff] }
  0x23   :  { %1201 = vmatpush.bf16.msrb.mxu1 %v12146_v49 }
  0x24   :  { %1214 = vmatpush.bf16.msrb.mxu2 %v12154_v50 }
  0x25   :  { %1227 = vmatpush.bf16.msrb.mxu3 %v12162_v51 }
  0x26   :  { %1189 = vmatpush.bf16.msrb.mxu0 %v12137_v52 }
  0x27   :  { %1202 = vmatpush.bf16.msrb.mxu1 %v12145_v53  ;;  %v12186_v53 = vld [vmem:[%s16254_s2 + $0x2b8] sm:$0xff] }
  0x28   :  { %1215 = vmatpush.bf16.msrb.mxu2 %v12153_v54  ;;  %v12194_v54 = vld [vmem:[%s16254_s2 + $0x2f8] sm:$0xff] }
  0x29   :  { %1228 = vmatpush.bf16.msrb.mxu3 %v12161_v55 }
  0x2a   :  { %1190 = vmatpush.bf16.msrb.mxu0 %v12136_v56 }
  0x2b   :  { %1203 = vmatpush.bf16.msrb.mxu1 %v12144_v57 }
  0x2c   :  { %1216 = vmatpush.bf16.msrb.mxu2 %v12152_v58  ;;  %v12169_v58 = vld [vmem:[%s16254_s2 + $0x230] sm:$0xff] }
  0x2d   :  { %1229 = vmatpush.bf16.msrb.mxu3 %v12160_v59  ;;  %v12177_v59 = vld [vmem:[%s16254_s2 + $0x270] sm:$0xff] }
  0x2e   :  { %1191 = vmatpush.bf16.msrb.mxu0 %v12135_v60  ;;  %v12185_v60 = vld [vmem:[%s16254_s2 + $0x2b0] sm:$0xff] }
  0x2f   :  { %1204 = vmatpush.bf16.msrb.mxu1 %v12143_v61  ;;  %v12193_v61 = vld [vmem:[%s16254_s2 + $0x2f0] sm:$0xff] }
  0x30   :  { %1217 = vmatpush.bf16.msrb.mxu2 %v12151_v62 }
  0x31   :  { %1230 = vmatpush.bf16.msrb.mxu3 %v12159_v63 }
  0x32   :  { %1192 = vmatpush.bf16.msrb.mxu0 %v12134_v0  ;;  %v12168_v0 = vld [vmem:[%s16254_s2 + $0x228] sm:$0xff] }
  0x33   :  { %1205 = vmatpush.bf16.msrb.mxu1 %v12142_v1  ;;  %v12176_v1 = vld [vmem:[%s16254_s2 + $0x268] sm:$0xff] }
  0x34   :  { %1218 = vmatpush.bf16.msrb.mxu2 %v12150_v2 }
  0x35   :  { %1231 = vmatpush.bf16.msrb.mxu3 %v12158_v3 }
  0x36   :  { %1193 = vmatpush.bf16.msrb.mxu0 %v12133_v6  ;;  %v12184_v6 = vld [vmem:[%s16254_s2 + $0x2a8] sm:$0xff] }
  0x37   :  { %1206 = vmatpush.bf16.msrb.mxu1 %v12141_v7  ;;  %v12192_v7 = vld [vmem:[%s16254_s2 + $0x2e8] sm:$0xff] }
  0x38   :  { %1219 = vmatpush.bf16.msrb.mxu2 %v12149_v8  ;;  %v13249_v8 = vld [vmem:[%s16255_s1 + $0x11] ss:$0 sm:$0xff] }
  0x39   :  { %1232 = vmatpush.bf16.msrb.mxu3 %v12157_v9 }
  0x3a   :  { %1194 = vmatpush.bf16.msrb.mxu0 %v12132_v11  ;;  %v12167_v11 = vld [vmem:[%s16254_s2 + $0x220] sm:$0xff] }
  0x3b   :  { %1207 = vmatpush.bf16.msrb.mxu1 %v12140_v12  ;;  %v12175_v12 = vld [vmem:[%s16254_s2 + $0x260] sm:$0xff] }
  0x3c   :  { %1220 = vmatpush.bf16.msrb.mxu2 %v12148_v13 }
  0x3d   :  { %1233 = vmatpush.bf16.msrb.mxu3 %v12156_v14 }
  0x3e   :  { %1195 = vmatpush.bf16.msrb.mxu0 %v12131_v15  ;;  %v12183_v15 = vld [vmem:[%s16254_s2 + $0x2a0] sm:$0xff] }
  0x3f   :  { %1208 = vmatpush.bf16.msrb.mxu1 %v12139_v16  ;;  %v12191_v16 = vld [vmem:[%s16254_s2 + $0x2e0] sm:$0xff] }
  0x40   :  { %1221 = vmatpush.bf16.msrb.mxu2 %v12147_v17 }
  0x41   :  { %1234 = vmatpush.bf16.msrb.mxu3 %v12155_v18 }
  0x78   :  { %v13126_v29 = vpop.permute.xlu0 %70 }
  0x79   :  { %vm108_vm0 = vcmp.ge.f32.partialorder %v13110_v21, %v13126_v29  ;;  %vm109_vm1 = vcmp.ge.f32.partialorder %v13112_v22, %v13126_v29  ;;  %vm200_vm2 = vcmp.lt.f32.partialorder %v13114_v23, %v13126_v29  ;;  %vm201_vm3 = vcmp.lt.f32.partialorder %v13116_v24, %v13126_v29 }
  0x7a   :  { %vm272_vm4 = vmand %vm108_vm0, %vm200_vm2  ;;  %vm110_vm5 = vcmp.ge.f32.partialorder %v13118_v25, %v13126_v29  ;;  %vm111_vm6 = vcmp.ge.f32.partialorder %v13120_v26, %v13126_v29  ;;  %vm202_vm7 = vcmp.lt.f32.partialorder %v13122_v27, %v13126_v29  ;;  %vm203_vm8 = vcmp.lt.f32.partialorder %v13124_v28, %v13126_v29 }
  0x7b   :  { %vm273_vm9 = vmand %vm109_vm1, %vm201_vm3  ;;  %v8610_v32 = vsel %vm272_vm4, 1.0, %v12858_v31  ;;  %vm112_vm12 = vcmp.ge.f32.partialorder %v13128_v30, %v13126_v29  ;;  %vm204_vm13 = vcmp.lt.f32.partialorder %v13149_v34, %v13126_v29  ;;  %vm113_vm14 = vcmp.ge.f32.partialorder %v13147_v33, %v13126_v29 }
  0x7c   :  { %v8611_v35 = vsel %vm273_vm9, 1.0, %v12858_v31  ;;  %vm274_vm10 = vmand %vm110_vm5, %vm202_vm7  ;;  %vm205_vm15 = vcmp.lt.f32.partialorder %v13152_v36, %v13126_v29  ;;  %vm114_vm0 = vcmp.ge.f32.partialorder %v13154_v37, %v13126_v29  ;;  %vm206_vm1 = vcmp.lt.f32.partialorder %v13156_v38, %v13126_v29 }
  0x7d   :  { %v488_v39 = vpack.c.bf16 %v8611_v35, %v8610_v32  ;;  %vm275_vm11 = vmand %vm111_vm6, %vm203_vm8  ;;  %v8612_v40 = vsel %vm274_vm10, 1.0, %v12858_v31  ;;  %vm115_vm3 = vcmp.ge.f32.partialorder %v13162_v42, %v13126_v29  ;;  %vm207_vm4 = vcmp.lt.f32.partialorder %v13164_v43, %v13126_v29  ;;  %v12216_v35 = vld [vmem:[%s16254_s2 + $0x3a8] sm:$0xff] }
  0x7e   :  { %v8613_v41 = vsel %vm275_vm11, 1.0, %v12858_v31  ;;  %vm13191_vm2 = vmand %vm112_vm12, %vm204_vm13  ;;  %vm116_vm8 = vcmp.ge.f32.partialorder %v13238_v5, %v13126_v29  ;;  %vm208_vm9 = vcmp.lt.f32.partialorder %v13249_v8, %v13126_v29 }
  0x7f   :  { %v677_v44 = vunpack.c.l.b16 %v488_v39  ;;  %v678_v45 = vunpack.c.h.b16 %v488_v39  ;;  %v489_v46 = vpack.c.bf16 %v8613_v41, %v8612_v40  ;;  %vm277_vm5 = vmand %vm113_vm14, %vm205_vm15  ;;  %v8614_v62 = vsel %vm13191_vm2, 1.0, %v12858_v31  ;;  %v12182_v39 = vld [vmem:[%s16254_s2 + $0x298] sm:$0xff]  ;;  %v12207_v41 = vld [vmem:[%s16254_s2 + $0x360] sm:$0xff] }
  0x80   :  { %vm278_vm6 = vmand %vm114_vm0, %vm206_vm1  ;;  %v8615_v63 = vsel %vm277_vm5, 1.0, %v12858_v31  ;;  %v13251_v10 = vpop.permute.xlu0 %75  ;;  %v12190_v40 = vld [vmem:[%s16254_s2 + $0x2d8] sm:$0xff] }
  0x81   :  { %v686_v49 = vpack.c.b16 %v677_v44, %v677_v44  ;;  %v687_v50 = vpack.c.b16 %v678_v45, %v678_v45  ;;  %v679_v51 = vunpack.c.l.b16 %v489_v46  ;;  %v680_v52 = vunpack.c.h.b16 %v489_v46  ;;  %vm279_vm7 = vmand %vm115_vm3, %vm207_vm4  ;;  %v12165_v46 = vld [vmem:[%s16254_s2 + $0x210] sm:$0xff] }
  0x82   :  { %v8616_v2 = vsel %vm278_vm6, 1.0, %v12858_v31  ;;  %v8617_v3 = vsel %vm279_vm7, 1.0, %v12858_v31  ;;  %v490_v4 = vpack.c.bf16 %v8615_v63, %v8614_v62  ;;  %vm117_vm10 = vcmp.ge.f32.partialorder %v13110_v21, %v13251_v10  ;;  %vm13283_vm14 = vmand %vm116_vm8, %vm208_vm9  ;;  %v12163_v62 = vld [vmem:[%s16254_s2 + $0x200] sm:$0xff] }
  0x83   :  { %1144 = vmatmul.bf16.vlgmr.msra.gmra.mxu0 %v686_v49  ;;  %1157 = vmatmul.bf16.vlgmr.msra.gmra.mxu1 %v687_v50  ;;  %v688_v56 = vpack.c.b16 %v679_v51, %v679_v51  ;;  %v689_v57 = vpack.c.b16 %v680_v52, %v680_v52  ;;  %v491_v9 = vpack.c.bf16 %v8617_v3, %v8616_v2  ;;  %v12189_v49 = vld [vmem:[%s16254_s2 + $0x2d0] sm:$0xff]  ;;  %v8618_v50 = vsel %vm13283_vm14, 1.0, %v12858_v31  ;;  %v12171_v63 = vld [vmem:[%s16254_s2 + $0x240] sm:$0xff] }
  0x84   :  { %1240 = vmatpush.bf16.msra.mxu0 %v12170_v47  ;;  %1862 = vmatpush.bf16.msra.mxu1 %v12178_v48  ;;  %v681_v13 = vunpack.c.l.b16 %v490_v4  ;;  %v682_v14 = vunpack.c.h.b16 %v490_v4  ;;  %vm209_vm11 = vcmp.lt.f32.partialorder %v13114_v23, %v13251_v10  ;;  %vm118_vm12 = vcmp.ge.f32.partialorder %v13112_v22, %v13251_v10  ;;  %v12173_v47 = vld [vmem:[%s16254_s2 + $0x250] sm:$0xff]  ;;  %v12179_v2 = vld [vmem:[%s16254_s2 + $0x280] sm:$0xff] }
  0x85   :  { %1170 = vmatmul.bf16.vlgmr.msra.gmra.mxu2 %v688_v56  ;;  %1183 = vmatmul.bf16.vlgmr.msra.gmra.mxu3 %v689_v57  ;;  %v683_v17 = vunpack.c.l.b16 %v491_v9  ;;  %v684_v18 = vunpack.c.h.b16 %v491_v9  ;;  %vm210_vm13 = vcmp.lt.f32.partialorder %v13116_v24, %v13251_v10  ;;  %vm119_vm15 = vcmp.ge.f32.partialorder %v13118_v25, %v13251_v10  ;;  %vm13303_vm1 = vmand %vm117_vm10, %vm209_vm11  ;;  %v12181_v48 = vld [vmem:[%s16254_s2 + $0x290] sm:$0xff]  ;;  %v12180_v57 = vld [vmem:[%s16254_s2 + $0x288] sm:$0xff] }
  0x86   :  { %1875 = vmatpush.bf16.msra.mxu2 %v12186_v53  ;;  %1888 = vmatpush.bf16.msra.mxu3 %v12194_v54  ;;  %v690_v29 = vpack.c.b16 %v681_v13, %v681_v13  ;;  %v691_v32 = vpack.c.b16 %v682_v14, %v682_v14  ;;  %vm211_vm0 = vcmp.lt.f32.partialorder %v13122_v27, %v13251_v10  ;;  %vm282_vm4 = vmand %vm118_vm12, %vm210_vm13  ;;  %v8619_v51 = vsel %vm13303_vm1, 1.0, %v12858_v31  ;;  %v12164_v53 = vld [vmem:[%s16254_s2 + $0x208] sm:$0xff]  ;;  %v12187_v3 = vld [vmem:[%s16254_s2 + $0x2c0] sm:$0xff] }
  0x87   :  { %vm120_vm2 = vcmp.ge.f32.partialorder %v13120_v26, %v13251_v10  ;;  %vm212_vm3 = vcmp.lt.f32.partialorder %v13124_v28, %v13251_v10  ;;  %v692_v44 = vpack.c.b16 %v683_v17, %v683_v17  ;;  %v693_v45 = vpack.c.b16 %v684_v18, %v684_v18  ;;  %vm283_vm5 = vmand %vm119_vm15, %vm211_vm0  ;;  %v12172_v54 = vld [vmem:[%s16254_s2 + $0x248] sm:$0xff]  ;;  %v12226_v9 = vld [vmem:[%s16254_s2 + $0x3f8] sm:$0xff] }
  0x88   :  { %1241 = vmatpush.bf16.msra.mxu0 %v12169_v58  ;;  %1863 = vmatpush.bf16.msra.mxu1 %v12177_v59  ;;  %vm284_vm6 = vmand %vm120_vm2, %vm212_vm3  ;;  %v8620_v52 = vsel %vm282_vm4, 1.0, %v12858_v31  ;;  %v8621_v55 = vsel %vm283_vm5, 1.0, %v12858_v31  ;;  %v12188_v58 = vld [vmem:[%s16254_s2 + $0x2c8] sm:$0xff]  ;;  %v492_v59 = vpack.c.bf16 %v8618_v50, %v8618_v50  ;;  %vm121_vm7 = vcmp.ge.f32.partialorder %v13128_v30, %v13251_v10  ;;  %v12197_v50 = vld [vmem:[%s16254_s2 + $0x310] sm:$0xff] }
  0x89   :  { %v8622_v56 = vsel %vm284_vm6, 1.0, %v12858_v31  ;;  %vm213_vm8 = vcmp.lt.f32.partialorder %v13149_v34, %v13251_v10  ;;  %vm122_vm9 = vcmp.ge.f32.partialorder %v13147_v33, %v13251_v10  ;;  %vm214_vm10 = vcmp.lt.f32.partialorder %v13152_v36, %v13251_v10 }
  0x8a   :  { %1876 = vmatpush.bf16.msra.mxu2 %v12185_v60  ;;  %1889 = vmatpush.bf16.msra.mxu3 %v12193_v61  ;;  %v493_v60 = vpack.c.bf16 %v8620_v52, %v8619_v51  ;;  %v13356_v61 = vpack.c.bf16 %v8622_v56, %v8621_v55  ;;  %v685_v4 = vunpack.c.l.b16 %v492_v59  ;;  %vm123_vm11 = vcmp.ge.f32.partialorder %v13154_v37, %v13251_v10  ;;  %vm285_vm13 = vmand %vm121_vm7, %vm213_vm8  ;;  %v12205_v51 = vld [vmem:[%s16254_s2 + $0x350] sm:$0xff]  ;;  %v12196_v56 = vld [vmem:[%s16254_s2 + $0x308] sm:$0xff] }
  0x8b   :  { %vm215_vm12 = vcmp.lt.f32.partialorder %v13156_v38, %v13251_v10  ;;  %vm124_vm14 = vcmp.ge.f32.partialorder %v13162_v42, %v13251_v10  ;;  %vm216_vm15 = vcmp.lt.f32.partialorder %v13164_v43, %v13251_v10  ;;  %vm286_vm0 = vmand %vm122_vm9, %vm214_vm10  ;;  %v12213_v52 = vld [vmem:[%s16254_s2 + $0x390] sm:$0xff]  ;;  %vm125_vm7 = vcmp.ge.f32.partialorder %v13238_v5, %v13251_v10 }
  0x8c   :  { %1242 = vmatpush.bf16.msra.mxu0 %v12168_v0  ;;  %1864 = vmatpush.bf16.msra.mxu1 %v12176_v1  ;;  %v12202_v0 = vld [vmem:[%s16254_s2 + $0x338] sm:$0xff]  ;;  %v694_v13 = vpack.c.b16 %v685_v4, %v685_v4  ;;  %vm287_vm1 = vmand %vm123_vm11, %vm215_vm12  ;;  %v8624_v55 = vsel %vm286_vm0, 1.0, %v12858_v31  ;;  %v12219_v4 = vld [vmem:[%s16254_s2 + $0x3c0] sm:$0xff]  ;;  %vm217_vm8 = vcmp.lt.f32.partialorder %v13249_v8, %v13251_v10 }
  0x8d   :  { %v12210_v1 = vld [vmem:[%s16254_s2 + $0x378] sm:$0xff]  ;;  %vm288_vm2 = vmand %vm124_vm14, %vm216_vm15  ;;  %v12253_v10 = vld [vmem:[%s16254_s2 + $0x4d0] sm:$0xff] }
  0x8e   :  { %1877 = vmatpush.bf16.msra.mxu2 %v12184_v6  ;;  %1890 = vmatpush.bf16.msra.mxu3 %v12192_v7  ;;  %v1403_v6 = vunpack.c.l.b16 %v493_v60  ;;  %v12218_v7 = vld [vmem:[%s16254_s2 + $0x3b8] sm:$0xff]  ;;  %v8626_v59 = vsel %vm288_vm2, 1.0, %v12858_v31  ;;  %vm289_vm11 = vmand %vm125_vm7, %vm217_vm8 }
  0x90   :  { %1243 = vmatpush.bf16.msra.mxu0 %v12167_v11  ;;  %1865 = vmatpush.bf16.msra.mxu1 %v12175_v12  ;;  %v1404_v11 = vunpack.c.h.b16 %v493_v60  ;;  %v1405_v12 = vunpack.c.l.b16 %v13356_v61  ;;  %v1412_v14 = vpack.c.b16 %v1403_v6, %v1403_v6  ;;  %v12212_v60 = vld [vmem:[%s16254_s2 + $0x388] sm:$0xff]  ;;  %v12234_v6 = vld [vmem:[%s16254_s2 + $0x438] sm:$0xff] }
  0x92   :  { %1878 = vmatpush.bf16.msra.mxu2 %v12183_v15  ;;  %1891 = vmatpush.bf16.msra.mxu3 %v12191_v16  ;;  %v12201_v15 = vld [vmem:[%s16254_s2 + $0x330] sm:$0xff]  ;;  %v1413_v17 = vpack.c.b16 %v1404_v11, %v1404_v11  ;;  %v1414_v18 = vpack.c.b16 %v1405_v12, %v1405_v12  ;;  %v12250_v12 = vld [vmem:[%s16254_s2 + $0x4b8] sm:$0xff] }
  0x93   :  { %1196 = vmatmul.bf16.vlgmr.msrb.gmra.mxu0 %v690_v29  ;;  %1209 = vmatmul.bf16.vlgmr.msrb.gmra.mxu1 %v691_v32  ;;  %v12209_v16 = vld [vmem:[%s16254_s2 + $0x370] sm:$0xff]  ;;  %v12200_v29 = vld [vmem:[%s16254_s2 + $0x328] sm:$0xff] }
  0x94   :  { %1244 = vmatpush.bf16.msra.mxu0 %v12166_v19  ;;  %1866 = vmatpush.bf16.msra.mxu1 %v12174_v20  ;;  %v12217_v19 = vld [vmem:[%s16254_s2 + $0x3b0] sm:$0xff]  ;;  %v12208_v32 = vld [vmem:[%s16254_s2 + $0x368] sm:$0xff] }
  0x95   :  { %1222 = vmatmul.bf16.vlgmr.msrb.gmra.mxu2 %v692_v44  ;;  %1235 = vmatmul.bf16.vlgmr.msrb.gmra.mxu3 %v693_v45  ;;  %v12225_v20 = vld [vmem:[%s16254_s2 + $0x3f0] sm:$0xff]  ;;  %v12215_v44 = vld [vmem:[%s16254_s2 + $0x3a0] sm:$0xff] }
  0x96   :  { %1879 = vmatpush.bf16.msra.mxu2 %v12182_v39  ;;  %1892 = vmatpush.bf16.msra.mxu3 %v12190_v40  ;;  %v12224_v39 = vld [vmem:[%s16254_s2 + $0x3e8] sm:$0xff]  ;;  %v12199_v40 = vld [vmem:[%s16254_s2 + $0x320] sm:$0xff] }
  0x97   :  { %v12223_v45 = vld [vmem:[%s16254_s2 + $0x3e0] sm:$0xff] }
  0x98   :  { %1245 = vmatpush.bf16.msra.mxu0 %v12165_v46  ;;  %1867 = vmatpush.bf16.msra.mxu1 %v12173_v47  ;;  %v12198_v46 = vld [vmem:[%s16254_s2 + $0x318] sm:$0xff] }
  0x99   :  { %v12206_v47 = vld [vmem:[%s16254_s2 + $0x358] sm:$0xff] }
  0x9a   :  { %1880 = vmatpush.bf16.msra.mxu2 %v12181_v48  ;;  %1893 = vmatpush.bf16.msra.mxu3 %v12189_v49  ;;  %v12214_v48 = vld [vmem:[%s16254_s2 + $0x398] sm:$0xff] }
  0x9b   :  { %v12222_v49 = vld [vmem:[%s16254_s2 + $0x3d8] sm:$0xff] }
  0x9c   :  { %1246 = vmatpush.bf16.msra.mxu0 %v12164_v53  ;;  %1868 = vmatpush.bf16.msra.mxu1 %v12172_v54  ;;  %v12221_v53 = vld [vmem:[%s16254_s2 + $0x3d0] sm:$0xff]  ;;  %v8623_v54 = vsel %vm285_vm13, 1.0, %v12858_v31 }
  0x9e   :  { %1881 = vmatpush.bf16.msra.mxu2 %v12180_v57  ;;  %1894 = vmatpush.bf16.msra.mxu3 %v12188_v58  ;;  %v12204_v57 = vld [vmem:[%s16254_s2 + $0x348] sm:$0xff]  ;;  %v8625_v58 = vsel %vm287_vm1, 1.0, %v12858_v31 }
  0xa0   :  { %1247 = vmatpush.bf16.msra.mxu0 %v12163_v62  ;;  %1869 = vmatpush.bf16.msra.mxu1 %v12171_v63  ;;  %v12220_v62 = vld [vmem:[%s16254_s2 + $0x3c8] sm:$0xff]  ;;  %v495_v63 = vpack.c.bf16 %v8624_v55, %v8623_v54  ;;  %v12237_v54 = vld [vmem:[%s16254_s2 + $0x450] sm:$0xff] }
  0xa1   :  { %v12245_v55 = vld [vmem:[%s16254_s2 + $0x490] sm:$0xff] }
  0xa2   :  { %1882 = vmatpush.bf16.msra.mxu2 %v12179_v2  ;;  %1895 = vmatpush.bf16.msra.mxu3 %v12187_v3  ;;  %v12203_v2 = vld [vmem:[%s16254_s2 + $0x340] sm:$0xff]  ;;  %v1407_v11 = vunpack.c.l.b16 %v495_v63 }
  0xa3   :  { %1248 = vmatmul.bf16.vlgmr.msra.gmra.mxu0 %v694_v13  ;;  %1870 = vmatmul.bf16.vlgmr.msra.gmra.mxu1 %v1412_v14  ;;  %v12211_v3 = vld [vmem:[%s16254_s2 + $0x380] sm:$0xff]  ;;  %v12258_v13 = vld [vmem:[%s16254_s2 + $0x4f8] sm:$0xff]  ;;  %v1408_v14 = vunpack.c.h.b16 %v495_v63  ;;  %v12252_v63 = vld [vmem:[%s16254_s2 + $0x4c8] sm:$0xff] }
  0xa4   :  { %1901 = vmatpush.bf16.msrb.mxu0 %v12202_v0  ;;  %1914 = vmatpush.bf16.msrb.mxu1 %v12210_v1  ;;  %v13475_v0 = vpack.c.bf16 %v8626_v59, %v8625_v58  ;;  %v12195_v1 = vld [vmem:[%s16254_s2 + $0x300] sm:$0xff]  ;;  %v8627_v58 = vsel %vm289_vm11, 1.0, %v12858_v31  ;;  %v12228_v59 = vld [vmem:[%s16254_s2 + $0x408] sm:$0xff] }
  0xa5   :  { %1883 = vmatmul.bf16.vlgmr.msra.gmra.mxu2 %v1413_v17  ;;  %1896 = vmatmul.bf16.vlgmr.msra.gmra.mxu3 %v1414_v18  ;;  %v12233_v17 = vld [vmem:[%s16254_s2 + $0x430] sm:$0xff] }
  0xa6   :  { %1927 = vmatpush.bf16.msrb.mxu2 %v12218_v7  ;;  %1940 = vmatpush.bf16.msrb.mxu3 %v12226_v9  ;;  %v12242_v7 = vld [vmem:[%s16254_s2 + $0x478] sm:$0xff]  ;;  %v1406_v9 = vunpack.c.h.b16 %v13356_v61  ;;  %v1416_v61 = vpack.c.b16 %v1407_v11, %v1407_v11  ;;  %v12241_v18 = vld [vmem:[%s16254_s2 + $0x470] sm:$0xff] }
  0xa8   :  { %1902 = vmatpush.bf16.msrb.mxu0 %v12201_v15  ;;  %1915 = vmatpush.bf16.msrb.mxu1 %v12209_v16  ;;  %v1409_v15 = vunpack.c.l.b16 %v13475_v0  ;;  %v1415_v16 = vpack.c.b16 %v1406_v9, %v1406_v9 }
  0xaa   :  { %1928 = vmatpush.bf16.msrb.mxu2 %v12217_v19  ;;  %1941 = vmatpush.bf16.msrb.mxu3 %v12225_v20  ;;  %v1417_v19 = vpack.c.b16 %v1408_v14, %v1408_v14  ;;  %v1418_v20 = vpack.c.b16 %v1409_v15, %v1409_v15  ;;  %v1410_v14 = vunpack.c.h.b16 %v13475_v0  ;;  %v12265_v0 = vld [vmem:[%s16254_s2 + $0x530] sm:$0xff] }
  0xac   :  { %1903 = vmatpush.bf16.msrb.mxu0 %v12200_v29  ;;  %1916 = vmatpush.bf16.msrb.mxu1 %v12208_v32  ;;  %v12249_v29 = vld [vmem:[%s16254_s2 + $0x4b0] sm:$0xff] }
  0xad   :  { %v12257_v32 = vld [vmem:[%s16254_s2 + $0x4f0] sm:$0xff] }
  0xae   :  { %1929 = vmatpush.bf16.msrb.mxu2 %v12216_v35  ;;  %1942 = vmatpush.bf16.msrb.mxu3 %v12224_v39  ;;  %v12232_v35 = vld [vmem:[%s16254_s2 + $0x428] sm:$0xff] }
  0xaf   :  { %v12240_v39 = vld [vmem:[%s16254_s2 + $0x468] sm:$0xff] }
  0xb0   :  { %1904 = vmatpush.bf16.msrb.mxu0 %v12199_v40  ;;  %1917 = vmatpush.bf16.msrb.mxu1 %v12207_v41  ;;  %v12248_v40 = vld [vmem:[%s16254_s2 + $0x4a8] sm:$0xff] }
  0xb1   :  { %v12256_v41 = vld [vmem:[%s16254_s2 + $0x4e8] sm:$0xff] }
  0xb2   :  { %1930 = vmatpush.bf16.msrb.mxu2 %v12215_v44  ;;  %1943 = vmatpush.bf16.msrb.mxu3 %v12223_v45  ;;  %v12231_v44 = vld [vmem:[%s16254_s2 + $0x420] sm:$0xff] }
  0xb3   :  { %v12239_v45 = vld [vmem:[%s16254_s2 + $0x460] sm:$0xff] }
  0xb4   :  { %1905 = vmatpush.bf16.msrb.mxu0 %v12198_v46  ;;  %1918 = vmatpush.bf16.msrb.mxu1 %v12206_v47  ;;  %v12247_v46 = vld [vmem:[%s16254_s2 + $0x4a0] sm:$0xff] }
  0xb5   :  { %v12255_v47 = vld [vmem:[%s16254_s2 + $0x4e0] sm:$0xff] }
  0xb6   :  { %1931 = vmatpush.bf16.msrb.mxu2 %v12214_v48  ;;  %1944 = vmatpush.bf16.msrb.mxu3 %v12222_v49  ;;  %v13539_v48 = vpop.permute.xlu1 %80  ;;  %v12230_v49 = vld [vmem:[%s16254_s2 + $0x418] sm:$0xff] }
  0xb7   :  { %vm126_vm3 = vcmp.ge.f32.partialorder %v13110_v21, %v13539_v48  ;;  %vm218_vm4 = vcmp.lt.f32.partialorder %v13114_v23, %v13539_v48  ;;  %vm127_vm5 = vcmp.ge.f32.partialorder %v13112_v22, %v13539_v48  ;;  %vm219_vm6 = vcmp.lt.f32.partialorder %v13116_v24, %v13539_v48 }
  0xb8   :  { %1906 = vmatpush.bf16.msrb.mxu0 %v12197_v50  ;;  %1919 = vmatpush.bf16.msrb.mxu1 %v12205_v51  ;;  %v12238_v50 = vld [vmem:[%s16254_s2 + $0x458] sm:$0xff]  ;;  %vm290_vm9 = vmand %vm126_vm3, %vm218_vm4  ;;  %vm128_vm12 = vcmp.ge.f32.partialorder %v13118_v25, %v13539_v48  ;;  %vm220_vm13 = vcmp.lt.f32.partialorder %v13122_v27, %v13539_v48  ;;  %vm129_vm14 = vcmp.ge.f32.partialorder %v13120_v26, %v13539_v48 }
  0xb9   :  { %v12246_v51 = vld [vmem:[%s16254_s2 + $0x498] sm:$0xff]  ;;  %vm291_vm10 = vmand %vm127_vm5, %vm219_vm6  ;;  %vm221_vm15 = vcmp.lt.f32.partialorder %v13124_v28, %v13539_v48  ;;  %vm130_vm0 = vcmp.ge.f32.partialorder %v13128_v30, %v13539_v48  ;;  %vm222_vm1 = vcmp.lt.f32.partialorder %v13149_v34, %v13539_v48  ;;  %vm131_vm3 = vcmp.ge.f32.partialorder %v13147_v33, %v13539_v48 }
  0xba   :  { %1932 = vmatpush.bf16.msrb.mxu2 %v12213_v52  ;;  %1945 = vmatpush.bf16.msrb.mxu3 %v12221_v53  ;;  %v12254_v52 = vld [vmem:[%s16254_s2 + $0x4d8] sm:$0xff]  ;;  %v12229_v53 = vld [vmem:[%s16254_s2 + $0x410] sm:$0xff]  ;;  %vm292_vm2 = vmand %vm128_vm12, %vm220_vm13  ;;  %vm223_vm4 = vcmp.lt.f32.partialorder %v13152_v36, %v13539_v48  ;;  %vm132_vm8 = vcmp.ge.f32.partialorder %v13154_v37, %v13539_v48  ;;  %vm225_vm11 = vcmp.lt.f32.partialorder %v13164_v43, %v13539_v48 }
  0xbb   :  { %vm293_vm5 = vmand %vm129_vm14, %vm221_vm15  ;;  %vm134_vm12 = vcmp.ge.f32.partialorder %v13238_v5, %v13539_v48  ;;  %vm226_vm13 = vcmp.lt.f32.partialorder %v13249_v8, %v13539_v48  ;;  %v12309_v5 = vld [vmem:[%s16254_s2 + $0x690] sm:$0xff] }
  0xbc   :  { %1907 = vmatpush.bf16.msrb.mxu0 %v12196_v56  ;;  %1920 = vmatpush.bf16.msrb.mxu1 %v12204_v57  ;;  %v8628_v56 = vsel %vm290_vm9, 1.0, %v12858_v31  ;;  %v8629_v57 = vsel %vm291_vm10, 1.0, %v12858_v31  ;;  %vm294_vm6 = vmand %vm130_vm0, %vm222_vm1  ;;  %vm224_vm9 = vcmp.lt.f32.partialorder %v13156_v38, %v13539_v48  ;;  %vm133_vm10 = vcmp.ge.f32.partialorder %v13162_v42, %v13539_v48  ;;  %v12317_v8 = vld [vmem:[%s16254_s2 + $0x6d0] sm:$0xff] }
  0xbd   :  { %vm295_vm7 = vmand %vm131_vm3, %vm223_vm4 }
  0xbe   :  { %1933 = vmatpush.bf16.msrb.mxu2 %v12212_v60  ;;  %1946 = vmatpush.bf16.msrb.mxu3 %v12220_v62  ;;  %v12236_v60 = vld [vmem:[%s16254_s2 + $0x448] sm:$0xff]  ;;  %vm13807_vm14 = vmand %vm132_vm8, %vm224_vm9 }
  0xbf   :  { %v12244_v62 = vld [vmem:[%s16254_s2 + $0x488] sm:$0xff]  ;;  %vm13821_vm1 = vmand %vm133_vm10, %vm225_vm11  ;;  %v8634_v48 = vsel %vm13807_vm14, 1.0, %v12858_v31 }
  0xc0   :  { %1908 = vmatpush.bf16.msrb.mxu0 %v12195_v1  ;;  %1921 = vmatpush.bf16.msrb.mxu1 %v12203_v2  ;;  %v498_v1 = vpack.c.bf16 %v8629_v57, %v8628_v56  ;;  %v497_v2 = vpack.c.bf16 %v8627_v58, %v8627_v58  ;;  %v12285_v56 = vld [vmem:[%s16254_s2 + $0x5d0] sm:$0xff]  ;;  %v8630_v57 = vsel %vm292_vm2, 1.0, %v12858_v31  ;;  %v8631_v58 = vsel %vm293_vm5, 1.0, %v12858_v31  ;;  %vm13835_vm4 = vmand %vm134_vm12, %vm226_vm13 }
  0xc2   :  { %1934 = vmatpush.bf16.msrb.mxu2 %v12211_v3  ;;  %1947 = vmatpush.bf16.msrb.mxu3 %v12219_v4  ;;  %v12227_v3 = vld [vmem:[%s16254_s2 + $0x400] sm:$0xff]  ;;  %v2129_v9 = vunpack.c.l.b16 %v498_v1  ;;  %v2130_v11 = vunpack.c.h.b16 %v498_v1  ;;  %v1411_v15 = vunpack.c.l.b16 %v497_v2  ;;  %v12276_v1 = vld [vmem:[%s16254_s2 + $0x588] sm:$0xff] }
  0xc3   :  { %1909 = vmatmul.bf16.vlgmr.msrb.gmra.mxu0 %v1415_v16  ;;  %1922 = vmatmul.bf16.vlgmr.msrb.gmra.mxu1 %v1416_v61  ;;  %v12235_v4 = vld [vmem:[%s16254_s2 + $0x440] sm:$0xff]  ;;  %v12282_v16 = vld [vmem:[%s16254_s2 + $0x5b8] sm:$0xff]  ;;  %v12284_v2 = vld [vmem:[%s16254_s2 + $0x5c8] sm:$0xff] }
  0xc4   :  { %1953 = vmatpush.bf16.msra.mxu0 %v12234_v6  ;;  %1966 = vmatpush.bf16.msra.mxu1 %v12242_v7  ;;  %v12243_v6 = vld [vmem:[%s16254_s2 + $0x480] sm:$0xff]  ;;  %v12290_v61 = vld [vmem:[%s16254_s2 + $0x5f8] sm:$0xff] }
  0xc5   :  { %1935 = vmatmul.bf16.vlgmr.msrb.gmra.mxu2 %v1417_v19  ;;  %1948 = vmatmul.bf16.vlgmr.msrb.gmra.mxu3 %v1418_v20  ;;  %v12251_v7 = vld [vmem:[%s16254_s2 + $0x4c0] sm:$0xff]  ;;  %v1419_v19 = vpack.c.b16 %v1410_v14, %v1410_v14  ;;  %v1420_v20 = vpack.c.b16 %v1411_v15, %v1411_v15 }
  0xc6   :  { %2588 = vmatpush.bf16.msra.mxu2 %v12250_v12  ;;  %2601 = vmatpush.bf16.msra.mxu3 %v12258_v13  ;;  %v12266_v12 = vld [vmem:[%s16254_s2 + $0x538] sm:$0xff] }
  0xc7   :  { %v12274_v13 = vld [vmem:[%s16254_s2 + $0x578] sm:$0xff] }
  0xc8   :  { %1954 = vmatpush.bf16.msra.mxu0 %v12233_v17  ;;  %1967 = vmatpush.bf16.msra.mxu1 %v12241_v18  ;;  %v2138_v17 = vpack.c.b16 %v2129_v9, %v2129_v9  ;;  %v2139_v18 = vpack.c.b16 %v2130_v11, %v2130_v11  ;;  %v12275_v9 = vld [vmem:[%s16254_s2 + $0x580] sm:$0xff] }
  0xc9   :  { %v12283_v11 = vld [vmem:[%s16254_s2 + $0x5c0] sm:$0xff] }
  0xca   :  { %2589 = vmatpush.bf16.msra.mxu2 %v12249_v29  ;;  %2602 = vmatpush.bf16.msra.mxu3 %v12257_v32  ;;  %v12273_v29 = vld [vmem:[%s16254_s2 + $0x570] sm:$0xff] }
  0xcb   :  { %v12281_v32 = vld [vmem:[%s16254_s2 + $0x5b0] sm:$0xff] }
  0xcc   :  { %1955 = vmatpush.bf16.msra.mxu0 %v12232_v35  ;;  %1968 = vmatpush.bf16.msra.mxu1 %v12240_v39  ;;  %v12289_v35 = vld [vmem:[%s16254_s2 + $0x5f0] sm:$0xff]  ;;  %v12264_v39 = vld [vmem:[%s16254_s2 + $0x528] sm:$0xff] }
  0xce   :  { %2590 = vmatpush.bf16.msra.mxu2 %v12248_v40  ;;  %2603 = vmatpush.bf16.msra.mxu3 %v12256_v41  ;;  %v12272_v40 = vld [vmem:[%s16254_s2 + $0x568] sm:$0xff] }
  0xcf   :  { %v12280_v41 = vld [vmem:[%s16254_s2 + $0x5a8] sm:$0xff] }
  0xd0   :  { %1956 = vmatpush.bf16.msra.mxu0 %v12231_v44  ;;  %1969 = vmatpush.bf16.msra.mxu1 %v12239_v45  ;;  %v12288_v44 = vld [vmem:[%s16254_s2 + $0x5e8] sm:$0xff]  ;;  %v12263_v45 = vld [vmem:[%s16254_s2 + $0x520] sm:$0xff] }
  0xd2   :  { %2591 = vmatpush.bf16.msra.mxu2 %v12247_v46  ;;  %2604 = vmatpush.bf16.msra.mxu3 %v12255_v47  ;;  %v12271_v46 = vld [vmem:[%s16254_s2 + $0x560] sm:$0xff] }
  0xd3   :  { %v12279_v47 = vld [vmem:[%s16254_s2 + $0x5a0] sm:$0xff] }
  0xd4   :  { %1957 = vmatpush.bf16.msra.mxu0 %v12230_v49  ;;  %1970 = vmatpush.bf16.msra.mxu1 %v12238_v50  ;;  %v12287_v49 = vld [vmem:[%s16254_s2 + $0x5e0] sm:$0xff]  ;;  %v12262_v50 = vld [vmem:[%s16254_s2 + $0x518] sm:$0xff] }
  0xd6   :  { %2592 = vmatpush.bf16.msra.mxu2 %v12246_v51  ;;  %2605 = vmatpush.bf16.msra.mxu3 %v12254_v52  ;;  %v12270_v51 = vld [vmem:[%s16254_s2 + $0x558] sm:$0xff] }
  0xd7   :  { %v12278_v52 = vld [vmem:[%s16254_s2 + $0x598] sm:$0xff] }
  0xd8   :  { %1958 = vmatpush.bf16.msra.mxu0 %v12229_v53  ;;  %1971 = vmatpush.bf16.msra.mxu1 %v12237_v54  ;;  %v12286_v53 = vld [vmem:[%s16254_s2 + $0x5d8] sm:$0xff]  ;;  %v12261_v54 = vld [vmem:[%s16254_s2 + $0x510] sm:$0xff] }
  0xda   :  { %2593 = vmatpush.bf16.msra.mxu2 %v12245_v55  ;;  %2606 = vmatpush.bf16.msra.mxu3 %v12253_v10  ;;  %v12269_v55 = vld [vmem:[%s16254_s2 + $0x550] sm:$0xff] }
  0xdb   :  { %v12277_v10 = vld [vmem:[%s16254_s2 + $0x590] sm:$0xff] }
  0xdc   :  { %1959 = vmatpush.bf16.msra.mxu0 %v12228_v59  ;;  %1972 = vmatpush.bf16.msra.mxu1 %v12236_v60  ;;  %v12260_v59 = vld [vmem:[%s16254_s2 + $0x508] sm:$0xff] }
  0xdd   :  { %v12268_v60 = vld [vmem:[%s16254_s2 + $0x548] sm:$0xff] }
  0xde   :  { %2594 = vmatpush.bf16.msra.mxu2 %v12244_v62  ;;  %2607 = vmatpush.bf16.msra.mxu3 %v12252_v63  ;;  %v8632_v62 = vsel %vm294_vm6, 1.0, %v12858_v31  ;;  %v8633_v63 = vsel %vm295_vm7, 1.0, %v12858_v31 }
  0xe0   :  { %1960 = vmatpush.bf16.msra.mxu0 %v12227_v3  ;;  %1973 = vmatpush.bf16.msra.mxu1 %v12235_v4  ;;  %v499_v3 = vpack.c.bf16 %v8631_v58, %v8630_v57  ;;  %v500_v4 = vpack.c.bf16 %v8633_v63, %v8632_v62  ;;  %v13776_v57 = vpop.permute.xlu1 %85  ;;  %v22_v58 = vld [vmem:[%s16253_s0 + $0x28] sm:$0xff]  ;;  %v12294_v62 = vld [vmem:[%s16254_s2 + $0x618] sm:$0xff] }
  0xe1   :  { %v12302_v63 = vld [vmem:[%s16254_s2 + $0x658] sm:$0xff]  ;;  %vm135_vm15 = vcmp.ge.f32.partialorder %v13110_v21, %v13776_v57  ;;  %vm227_vm0 = vcmp.lt.f32.partialorder %v13114_v23, %v13776_v57  ;;  %vm136_vm2 = vcmp.ge.f32.partialorder %v13112_v22, %v13776_v57  ;;  %vm228_vm3 = vcmp.lt.f32.partialorder %v13116_v24, %v13776_v57 }
  0xe2   :  { %2595 = vmatpush.bf16.msra.mxu2 %v12243_v6  ;;  %2608 = vmatpush.bf16.msra.mxu3 %v12251_v7  ;;  %v12259_v6 = vld [vmem:[%s16254_s2 + $0x500] sm:$0xff]  ;;  %v2131_v14 = vunpack.c.l.b16 %v499_v3  ;;  %v2132_v15 = vunpack.c.h.b16 %v499_v3  ;;  %v12310_v3 = vld [vmem:[%s16254_s2 + $0x698] sm:$0xff]  ;;  %vm13845_vm5 = vmand %vm135_vm15, %vm227_vm0  ;;  %vm137_vm7 = vcmp.ge.f32.partialorder %v13118_v25, %v13776_v57  ;;  %vm229_vm8 = vcmp.lt.f32.partialorder %v13122_v27, %v13776_v57 }
  0xe3   :  { %1961 = vmatmul.bf16.vlgmr.msra.gmra.mxu0 %v1419_v19  ;;  %1974 = vmatmul.bf16.vlgmr.msra.gmra.mxu1 %v1420_v20  ;;  %v12267_v7 = vld [vmem:[%s16254_s2 + $0x540] sm:$0xff]  ;;  %vm300_vm6 = vmand %vm136_vm2, %vm228_vm3  ;;  %vm138_vm9 = vcmp.ge.f32.partialorder %v13120_v26, %v13776_v57  ;;  %vm230_vm10 = vcmp.lt.f32.partialorder %v13124_v28, %v13776_v57  ;;  %vm139_vm11 = vcmp.ge.f32.partialorder %v13128_v30, %v13776_v57 }
  0xe4   :  { %2614 = vmatpush.bf16.msrb.mxu0 %v12266_v12  ;;  %2627 = vmatpush.bf16.msrb.mxu1 %v12274_v13  ;;  %v12298_v12 = vld [vmem:[%s16254_s2 + $0x638] sm:$0xff]  ;;  %v21_v19 = vld [vmem:[%s16253_s0 + $0x20] sm:$0xff]  ;;  %v2140_v20 = vpack.c.b16 %v2131_v14, %v2131_v14  ;;  %vm231_vm12 = vcmp.lt.f32.partialorder %v13149_v34, %v13776_v57  ;;  %vm13975_vm13 = vmand %vm137_vm7, %vm229_vm8  ;;  %vm140_vm14 = vcmp.ge.f32.partialorder %v13147_v33, %v13776_v57 }
  0xe5   :  { %2596 = vmatmul.bf16.vlgmr.msra.gmra.mxu2 %v2138_v17  ;;  %2609 = vmatmul.bf16.vlgmr.msra.gmra.mxu3 %v2139_v18  ;;  %v12306_v13 = vld [vmem:[%s16254_s2 + $0x678] sm:$0xff]  ;;  %v2133_v17 = vunpack.c.l.b16 %v500_v4  ;;  %v2134_v18 = vunpack.c.h.b16 %v500_v4  ;;  %vm232_vm15 = vcmp.lt.f32.partialorder %v13152_v36, %v13776_v57  ;;  %vm302_vm0 = vmand %vm138_vm9, %vm230_vm10  ;;  %vm141_vm3 = vcmp.ge.f32.partialorder %v13154_v37, %v13776_v57 }
  0xe6   :  { %2640 = vmatpush.bf16.msrb.mxu2 %v12282_v16  ;;  %2653 = vmatpush.bf16.msrb.mxu3 %v12290_v61  ;;  %v12314_v16 = vld [vmem:[%s16254_s2 + $0x6b8] sm:$0xff]  ;;  %vm304_vm2 = vmand %vm140_vm14, %vm232_vm15 }
  0xe7   :  { %v12322_v61 = vld [vmem:[%s16254_s2 + $0x6f8] sm:$0xff] }
  0xe8   :  { %2615 = vmatpush.bf16.msrb.mxu0 %v12265_v0  ;;  %2628 = vmatpush.bf16.msrb.mxu1 %v12273_v29  ;;  %v2141_v0 = vpack.c.b16 %v2132_v15, %v2132_v15  ;;  %v12297_v29 = vld [vmem:[%s16254_s2 + $0x630] sm:$0xff]  ;;  %v12318_v4 = vld [vmem:[%s16254_s2 + $0x6d8] sm:$0xff] }
  0xe9   :  { %v12293_v15 = vld [vmem:[%s16254_s2 + $0x610] sm:$0xff] }
  0xea   :  { %2641 = vmatpush.bf16.msrb.mxu2 %v12281_v32  ;;  %2654 = vmatpush.bf16.msrb.mxu3 %v12289_v35  ;;  %v12305_v32 = vld [vmem:[%s16254_s2 + $0x670] sm:$0xff]  ;;  %v29_v35 = vmax.f32 %v21_v19, -1.0 }
  0xec   :  { %2616 = vmatpush.bf16.msrb.mxu0 %v12264_v39  ;;  %2629 = vmatpush.bf16.msrb.mxu1 %v12272_v40  ;;  %v2142_v39 = vpack.c.b16 %v2133_v17, %v2133_v17  ;;  %v2143_v40 = vpack.c.b16 %v2134_v18, %v2134_v18  ;;  %v8635_v17 = vsel %vm13821_vm1, 1.0, %v12858_v31  ;;  %vm303_vm1 = vmand %vm139_vm11, %vm231_vm12 }
  0xee   :  { %2642 = vmatpush.bf16.msrb.mxu2 %v12280_v41  ;;  %2655 = vmatpush.bf16.msrb.mxu3 %v12288_v44  ;;  %v12313_v41 = vld [vmem:[%s16254_s2 + $0x6b0] sm:$0xff] }
  0xef   :  { %v12321_v44 = vld [vmem:[%s16254_s2 + $0x6f0] sm:$0xff] }
  0xf0   :  { %2617 = vmatpush.bf16.msrb.mxu0 %v12263_v45  ;;  %2630 = vmatpush.bf16.msrb.mxu1 %v12271_v46  ;;  %v37_v45 = vmin.f32 %v29_v35, 300.0  ;;  %v12296_v46 = vld [vmem:[%s16254_s2 + $0x628] sm:$0xff]  ;;  %v8638_v35 = vsel %vm300_vm6, 1.0, %v12858_v31  ;;  %vm234_vm6 = vcmp.lt.f32.partialorder %v13164_v43, %v13776_v57 }
  0xf2   :  { %2643 = vmatpush.bf16.msrb.mxu2 %v12279_v47  ;;  %2656 = vmatpush.bf16.msrb.mxu3 %v12287_v49  ;;  %v12304_v47 = vld [vmem:[%s16254_s2 + $0x668] sm:$0xff] }
  0xf3   :  { %90 = vperm.xlu2 %12693, %v37_v45  }
  0xf4   :  { %2618 = vmatpush.bf16.msrb.mxu0 %v12262_v50  ;;  %2631 = vmatpush.bf16.msrb.mxu1 %v12270_v51  ;;  %v12312_v51 = vld [vmem:[%s16254_s2 + $0x6a8] sm:$0xff] }
  0xf6   :  { %2644 = vmatpush.bf16.msrb.mxu2 %v12278_v52  ;;  %2657 = vmatpush.bf16.msrb.mxu3 %v12286_v53  ;;  %v12320_v52 = vld [vmem:[%s16254_s2 + $0x6e8] sm:$0xff] }
  0xf8   :  { %2619 = vmatpush.bf16.msrb.mxu0 %v12261_v54  ;;  %2632 = vmatpush.bf16.msrb.mxu1 %v12269_v55  ;;  %v12295_v54 = vld [vmem:[%s16254_s2 + $0x620] sm:$0xff] }
  0xf9   :  { %v12303_v55 = vld [vmem:[%s16254_s2 + $0x660] sm:$0xff] }
  0xfa   :  { %2645 = vmatpush.bf16.msrb.mxu2 %v12277_v10  ;;  %2658 = vmatpush.bf16.msrb.mxu3 %v12285_v56  ;;  %v12311_v10 = vld [vmem:[%s16254_s2 + $0x6a0] sm:$0xff] }
  0xfb   :  { %v12319_v56 = vld [vmem:[%s16254_s2 + $0x6e0] sm:$0xff] }
  0xfc   :  { %2620 = vmatpush.bf16.msrb.mxu0 %v12260_v59  ;;  %2633 = vmatpush.bf16.msrb.mxu1 %v12268_v60 }
  0xfe   :  { %2646 = vmatpush.bf16.msrb.mxu2 %v12276_v1  ;;  %2659 = vmatpush.bf16.msrb.mxu3 %v12284_v2  ;;  %v30_v1 = vmax.f32 %v22_v58, -1.0 }
 0x100   :  { %2621 = vmatpush.bf16.msrb.mxu0 %v12259_v6  ;;  %2634 = vmatpush.bf16.msrb.mxu1 %v12267_v7  ;;  %v1145_v49 = vpop.f32.mrf.mxu0  ;;  %v1158_v50 = vpop.f32.mrf.mxu1 }
 0x101   :  { %v1159_v53 = vadd.f32 %v1158_v50, %v1145_v49 }
 0x102   :  { %2647 = vmatpush.bf16.msrb.mxu2 %v12275_v9  ;;  %2660 = vmatpush.bf16.msrb.mxu3 %v12283_v11  ;;  %v12329_v11 = vld [vmem:[%s16254_s2 + $0x730] sm:$0xff] }
 0x103   :  { %2622 = vmatmul.bf16.vlgmr.msrb.gmra.mxu0 %v2140_v20  ;;  %2635 = vmatmul.bf16.vlgmr.msrb.gmra.mxu1 %v2141_v0  ;;  %v12292_v20 = vld [vmem:[%s16254_s2 + $0x608] sm:$0xff] }
 0x104   :  { %2666 = vmatpush.bf16.msra.mxu0 %v12298_v12  ;;  %2679 = vmatpush.bf16.msra.mxu1 %v12306_v13  ;;  %v38_v12 = vmin.f32 %v30_v1, 300.0  ;;  %v12300_v0 = vld [vmem:[%s16254_s2 + $0x648] sm:$0xff] }
 0x105   :  { %2648 = vmatmul.bf16.vlgmr.msrb.gmra.mxu2 %v2142_v39  ;;  %2661 = vmatmul.bf16.vlgmr.msrb.gmra.mxu3 %v2143_v40  ;;  %v12308_v39 = vld [vmem:[%s16254_s2 + $0x688] sm:$0xff] }
 0x106   :  { %2692 = vmatpush.bf16.msra.mxu2 %v12314_v16  ;;  %3314 = vmatpush.bf16.msra.mxu3 %v12322_v61  ;;  %v12301_v16 = vld [vmem:[%s16254_s2 + $0x650] sm:$0xff]  ;;  %v12316_v40 = vld [vmem:[%s16254_s2 + $0x6c8] sm:$0xff] }
 0x107   :  { %95 = vperm.xlu2 %12693, %v38_v12   ;;  %v12337_v12 = vld [vmem:[%s16254_s2 + $0x770] sm:$0xff] }
 0x108   :  { %2667 = vmatpush.bf16.msra.mxu0 %v12297_v29  ;;  %2680 = vmatpush.bf16.msra.mxu1 %v12305_v32  ;;  %v1171_v59 = vpop.f32.mrf.mxu2  ;;  %v1184_v60 = vpop.f32.mrf.mxu3  ;;  %v8636_v29 = vsel %vm13835_vm4, 1.0, %v12858_v31  ;;  %v8637_v32 = vsel %vm13845_vm5, 1.0, %v12858_v31  ;;  %v12353_v61 = vld [vmem:[%s16254_s2 + $0x7f0] sm:$0xff]  ;;  %vm233_vm4 = vcmp.lt.f32.partialorder %v13156_v38, %v13776_v57  ;;  %vm142_vm5 = vcmp.ge.f32.partialorder %v13162_v42, %v13776_v57 }
 0x109   :  { %v1172_v2 = vadd.f32 %v1171_v59, %v1159_v53  ;;  %v1147_v6 = vpop.f32.mrf.mxu0  ;;  %v1160_v7 = vpop.f32.mrf.mxu1  ;;  %v13880_v49 = vpack.c.bf16 %v8638_v35, %v8637_v32  ;;  %v12307_v53 = vld [vmem:[%s16254_s2 + $0x680] sm:$0xff]  ;;  %v12346_v59 = vld [vmem:[%s16254_s2 + $0x7b8] sm:$0xff]  ;;  %vm305_vm9 = vmand %vm141_vm3, %vm233_vm4 }
 0x10a   :  { %2693 = vmatpush.bf16.msra.mxu2 %v12313_v41  ;;  %3315 = vmatpush.bf16.msra.mxu3 %v12321_v44  ;;  %v12327_v32 = vld [vmem:[%s16254_s2 + $0x720] sm:$0xff]  ;;  %vm306_vm10 = vmand %vm142_vm5, %vm234_vm6 }
 0x10b   :  { %v1185_v13 = vadd.f32 %v1184_v60, %v1172_v2  ;;  %v12354_v60 = vld [vmem:[%s16254_s2 + $0x7f8] sm:$0xff]  ;;  %v12335_v35 = vld [vmem:[%s16254_s2 + $0x760] sm:$0xff] }
 0x10c   :  { %2668 = vmatpush.bf16.msra.mxu0 %v12296_v46  ;;  %2681 = vmatpush.bf16.msra.mxu1 %v12304_v47  ;;  %v501_v46 = vpack.c.bf16 %v8635_v17, %v8634_v48  ;;  %v502_v47 = vpack.c.bf16 %v8636_v29, %v8636_v29  ;;  %v12344_v48 = vld [vmem:[%s16254_s2 + $0x7a8] sm:$0xff] }
 0x10d   :  { %v12352_v17 = vld [vmem:[%s16254_s2 + $0x7e8] sm:$0xff] }
 0x10e   :  { %2694 = vmatpush.bf16.msra.mxu2 %v12312_v51  ;;  %3316 = vmatpush.bf16.msra.mxu3 %v12320_v52  ;;  %v12291_v51 = vld [vmem:[%s16254_s2 + $0x600] sm:$0xff]  ;;  %v2136_v58 = vunpack.c.h.b16 %v501_v46 }
 0x10f   :  { %v12299_v52 = vld [vmem:[%s16254_s2 + $0x640] sm:$0xff] }
 0x110   :  { %2669 = vmatpush.bf16.msra.mxu0 %v12295_v54  ;;  %2682 = vmatpush.bf16.msra.mxu1 %v12303_v55  ;;  %v1173_v18 = vpop.f32.mrf.mxu2  ;;  %v1186_v19 = vpop.f32.mrf.mxu3  ;;  %v12315_v54 = vld [vmem:[%s16254_s2 + $0x6c0] sm:$0xff]  ;;  %v12330_v55 = vld [vmem:[%s16254_s2 + $0x738] sm:$0xff]  ;;  %v2145_v9 = vpack.c.b16 %v2136_v58, %v2136_v58  ;;  %v12341_v58 = vld [vmem:[%s16254_s2 + $0x790] sm:$0xff] }
 0x111   :  { %v1197_v41 = vpop.f32.mrf.mxu0  ;;  %v1210_v44 = vpop.f32.mrf.mxu1 }
 0x112   :  { %2695 = vmatpush.bf16.msra.mxu2 %v12311_v10  ;;  %3317 = vmatpush.bf16.msra.mxu3 %v12319_v56  ;;  %v1198_v45 = vadd.f32 %v1197_v41, %v1185_v13  ;;  %v12338_v10 = vld [vmem:[%s16254_s2 + $0x778] sm:$0xff]  ;;  %v2135_v56 = vunpack.c.l.b16 %v501_v46 }
 0x113   :  { %v12326_v41 = vld [vmem:[%s16254_s2 + $0x718] sm:$0xff] }
 0x114   :  { %2670 = vmatpush.bf16.msra.mxu0 %v12294_v62  ;;  %2683 = vmatpush.bf16.msra.mxu1 %v12302_v63  ;;  %v1211_v50 = vadd.f32 %v1210_v44, %v1198_v45  ;;  %v2137_v62 = vunpack.c.l.b16 %v502_v47  ;;  %v2855_v63 = vunpack.c.l.b16 %v13880_v49  ;;  %v2144_v7 = vpack.c.b16 %v2135_v56, %v2135_v56  ;;  %v12334_v44 = vld [vmem:[%s16254_s2 + $0x758] sm:$0xff] }
 0x115   :  { %v12342_v45 = vld [vmem:[%s16254_s2 + $0x798] sm:$0xff] }
 0x116   :  { %2696 = vmatpush.bf16.msra.mxu2 %v12310_v3  ;;  %3318 = vmatpush.bf16.msra.mxu3 %v12318_v4  ;;  %v2146_v14 = vpack.c.b16 %v2137_v62, %v2137_v62  ;;  %v12350_v46 = vld [vmem:[%s16254_s2 + $0x7d8] sm:$0xff]  ;;  %v8640_v62 = vsel %vm302_vm0, 1.0, %v12858_v31 }
 0x118   :  { %2671 = vmatpush.bf16.msra.mxu0 %v12293_v15  ;;  %2684 = vmatpush.bf16.msra.mxu1 %v12301_v16  ;;  %v1223_v1 = vpop.f32.mrf.mxu2  ;;  %v1236_v2 = vpop.f32.mrf.mxu3  ;;  %v2864_v15 = vpack.c.b16 %v2855_v63, %v2855_v63  ;;  %v12345_v16 = vld [vmem:[%s16254_s2 + $0x7b0] sm:$0xff]  ;;  %v12324_v63 = vld [vmem:[%s16254_s2 + $0x708] sm:$0xff] }
 0x119   :  { %v1224_v3 = vadd.f32 %v1223_v1, %v1211_v50  ;;  %v1199_v4 = vpop.f32.mrf.mxu0  ;;  %v1212_v6 = vpop.f32.mrf.mxu1  ;;  %v12332_v1 = vld [vmem:[%s16254_s2 + $0x748] sm:$0xff] }
 0x11a   :  { %2697 = vmatpush.bf16.msra.mxu2 %v12309_v5  ;;  %3319 = vmatpush.bf16.msra.mxu3 %v12317_v8  ;;  %v12328_v5 = vld [vmem:[%s16254_s2 + $0x728] sm:$0xff] }
 0x11b   :  { %v1237_v13 = vadd.f32 %v1236_v2, %v1224_v3  ;;  %v12336_v8 = vld [vmem:[%s16254_s2 + $0x768] sm:$0xff]  ;;  %v8641_v2 = vsel %vm303_vm1, 1.0, %v12858_v31  ;;  %v8642_v3 = vsel %vm304_vm2, 1.0, %v12858_v31 }
 0x11c   :  { %2672 = vmatpush.bf16.msra.mxu0 %v12292_v20  ;;  %2685 = vmatpush.bf16.msra.mxu1 %v12300_v0  ;;  %v12340_v4 = vld [vmem:[%s16254_s2 + $0x788] sm:$0xff] }
 0x11d   :  { %v12348_v6 = vld [vmem:[%s16254_s2 + $0x7c8] sm:$0xff] }
 0x11e   :  { %2698 = vmatpush.bf16.msra.mxu2 %v12308_v39  ;;  %3320 = vmatpush.bf16.msra.mxu3 %v12316_v40  ;;  %v12343_v39 = vld [vmem:[%s16254_s2 + $0x7a0] sm:$0xff] }
 0x11f   :  { %v12351_v40 = vld [vmem:[%s16254_s2 + $0x7e0] sm:$0xff] }
 0x120   :  { %2673 = vmatpush.bf16.msra.mxu0 %v12291_v51  ;;  %2686 = vmatpush.bf16.msra.mxu1 %v12299_v52  ;;  %v1225_v18 = vpop.f32.mrf.mxu2  ;;  %v1238_v19 = vpop.f32.mrf.mxu3 }
 0x121   :  { %v1249_v20 = vpop.f32.mrf.mxu0  ;;  %v1871_v0 = vpop.f32.mrf.mxu1  ;;  %v12386_v18 = vld [vmem:[%s16254_s2 + $0x8f8] sm:$0xff] }
 0x122   :  { %2699 = vmatpush.bf16.msra.mxu2 %v12307_v53  ;;  %3321 = vmatpush.bf16.msra.mxu3 %v12315_v54  ;;  %v13931_v29 = vadd.f32 %v1249_v20, %v1237_v13  ;;  %v12323_v13 = vld [vmem:[%s16254_s2 + $0x700] sm:$0xff] }
 0x123   :  { %2674 = vmatmul.bf16.vlgmr.msra.gmra.mxu0 %v2144_v7  ;;  %2687 = vmatmul.bf16.vlgmr.msra.gmra.mxu1 %v2145_v9 }
 0x124   :  { %3327 = vmatpush.bf16.msrb.mxu0 %v12330_v55  ;;  %3340 = vmatpush.bf16.msrb.mxu1 %v12338_v10  ;;  %v12325_v55 = vld [vmem:[%s16254_s2 + $0x710] sm:$0xff] }
 0x125   :  { %2700 = vmatmul.bf16.vlgmr.msra.gmra.mxu2 %v2146_v14  ;;  %3322 = vmatmul.bf16.vlgmr.msra.gmra.mxu3 %v2864_v15  ;;  %v12333_v10 = vld [vmem:[%s16254_s2 + $0x750] sm:$0xff]  ;;  %v12331_v14 = vld [vmem:[%s16254_s2 + $0x740] sm:$0xff] }
 0x126   :  { %3353 = vmatpush.bf16.msrb.mxu2 %v12346_v59  ;;  %3366 = vmatpush.bf16.msrb.mxu3 %v12354_v60  ;;  %v12349_v59 = vld [vmem:[%s16254_s2 + $0x7d0] sm:$0xff]  ;;  %v8639_v60 = vsel %vm13975_vm13, 1.0, %v12858_v31  ;;  %v12339_v15 = vld [vmem:[%s16254_s2 + $0x780] sm:$0xff] }
 0x128   :  { %3328 = vmatpush.bf16.msrb.mxu0 %v12329_v11  ;;  %3341 = vmatpush.bf16.msrb.mxu1 %v12337_v12  ;;  %v1884_v47 = vpop.f32.mrf.mxu2  ;;  %v1897_v50 = vpop.f32.mrf.mxu3  ;;  %v504_v11 = vpack.c.bf16 %v8640_v62, %v8639_v60  ;;  %v14030_v12 = vpack.c.bf16 %v8642_v3, %v8641_v2  ;;  %v12366_v60 = vld [vmem:[%s16254_s2 + $0x858] sm:$0xff]  ;;  %v14118_v3 = vld [vmem:[%s16255_s1 + $0x10] ss:$0 sm:$0xff] }
 0x129   :  { %v1885_v52 = vadd.f32 %v1884_v47, %v1871_v0  ;;  %v1251_v53 = vpop.f32.mrf.mxu0  ;;  %v1873_v54 = vpop.f32.mrf.mxu1  ;;  %v12376_v47 = vld [vmem:[%s16254_s2 + $0x8a8] sm:$0xff]  ;;  %v12374_v62 = vld [vmem:[%s16254_s2 + $0x898] sm:$0xff]  ;;  %vm143_vm7 = vcmp.ge.f32.partialorder %v14118_v3, %v13776_v57 }
 0x12a   :  { %3354 = vmatpush.bf16.msrb.mxu2 %v12345_v16  ;;  %3367 = vmatpush.bf16.msrb.mxu3 %v12353_v61  ;;  %v12347_v16 = vld [vmem:[%s16254_s2 + $0x7c0] sm:$0xff]  ;;  %v12362_v61 = vld [vmem:[%s16254_s2 + $0x838] sm:$0xff]  ;;  %v2858_v19 = vunpack.c.h.b16 %v504_v11  ;;  %v2859_v20 = vunpack.c.l.b16 %v14030_v12 }
 0x12b   :  { %v13998_v56 = vadd.f32 %v1897_v50, %v1885_v52  ;;  %v12384_v50 = vld [vmem:[%s16254_s2 + $0x8e8] sm:$0xff]  ;;  %v12359_v54 = vld [vmem:[%s16254_s2 + $0x820] sm:$0xff] }
 0x12c   :  { %3329 = vmatpush.bf16.msrb.mxu0 %v12328_v5  ;;  %3342 = vmatpush.bf16.msrb.mxu1 %v12336_v8  ;;  %v12370_v5 = vld [vmem:[%s16254_s2 + $0x878] sm:$0xff]  ;;  %v2856_v8 = vunpack.c.h.b16 %v13880_v49 }
 0x12e   :  { %3355 = vmatpush.bf16.msrb.mxu2 %v12344_v48  ;;  %3368 = vmatpush.bf16.msrb.mxu3 %v12352_v17  ;;  %v2857_v48 = vunpack.c.l.b16 %v504_v11  ;;  %v12378_v17 = vld [vmem:[%s16254_s2 + $0x8b8] sm:$0xff]  ;;  %v2865_v0 = vpack.c.b16 %v2856_v8, %v2856_v8  ;;  %v12357_v11 = vld [vmem:[%s16254_s2 + $0x810] sm:$0xff]  ;;  %v12356_v8 = vld [vmem:[%s16254_s2 + $0x808] sm:$0xff] }
 0x130   :  { %3330 = vmatpush.bf16.msrb.mxu0 %v12327_v32  ;;  %3343 = vmatpush.bf16.msrb.mxu1 %v12335_v35  ;;  %v1886_v7 = vpop.f32.mrf.mxu2  ;;  %v1899_v9 = vpop.f32.mrf.mxu3  ;;  %v2866_v49 = vpack.c.b16 %v2857_v48, %v2857_v48  ;;  %v12361_v32 = vld [vmem:[%s16254_s2 + $0x830] sm:$0xff]  ;;  %v12364_v48 = vld [vmem:[%s16254_s2 + $0x848] sm:$0xff] }
 0x131   :  { %v12369_v35 = vld [vmem:[%s16254_s2 + $0x870] sm:$0xff] }
 0x132   :  { %3356 = vmatpush.bf16.msrb.mxu2 %v12343_v39  ;;  %3369 = vmatpush.bf16.msrb.mxu3 %v12351_v40  ;;  %v2867_v39 = vpack.c.b16 %v2858_v19, %v2858_v19  ;;  %v2868_v40 = vpack.c.b16 %v2859_v20, %v2859_v20 }
 0x134   :  { %3331 = vmatpush.bf16.msrb.mxu0 %v12326_v41  ;;  %3344 = vmatpush.bf16.msrb.mxu1 %v12334_v44  ;;  %v12377_v41 = vld [vmem:[%s16254_s2 + $0x8b0] sm:$0xff] }
 0x135   :  { %v12385_v44 = vld [vmem:[%s16254_s2 + $0x8f0] sm:$0xff] }
 0x136   :  { %3357 = vmatpush.bf16.msrb.mxu2 %v12342_v45  ;;  %3370 = vmatpush.bf16.msrb.mxu3 %v12350_v46  ;;  %v12360_v45 = vld [vmem:[%s16254_s2 + $0x828] sm:$0xff] }
 0x137   :  { %v12368_v46 = vld [vmem:[%s16254_s2 + $0x868] sm:$0xff] }
 0x138   :  { %3332 = vmatpush.bf16.msrb.mxu0 %v12325_v55  ;;  %3345 = vmatpush.bf16.msrb.mxu1 %v12333_v10  ;;  %v12367_v55 = vld [vmem:[%s16254_s2 + $0x860] sm:$0xff] }
 0x139   :  { %v12375_v10 = vld [vmem:[%s16254_s2 + $0x8a0] sm:$0xff] }
 0x13a   :  { %3358 = vmatpush.bf16.msrb.mxu2 %v12341_v58  ;;  %3371 = vmatpush.bf16.msrb.mxu3 %v12349_v59  ;;  %v12383_v58 = vld [vmem:[%s16254_s2 + $0x8e0] sm:$0xff] }
 0x13c   :  { %3333 = vmatpush.bf16.msrb.mxu0 %v12324_v63  ;;  %3346 = vmatpush.bf16.msrb.mxu1 %v12332_v1  ;;  %v12382_v63 = vld [vmem:[%s16254_s2 + $0x8d8] sm:$0xff] }
 0x13e   :  { %3359 = vmatpush.bf16.msrb.mxu2 %v12340_v4  ;;  %3372 = vmatpush.bf16.msrb.mxu3 %v12348_v6  ;;  %v14125_v4 = vld [vmem:[%s16255_s1 + $0x11] ss:$0 sm:$0xff] }
 0x13f   :  { %vm235_vm8 = vcmp.lt.f32.partialorder %v14125_v4, %v13776_v57  ;;  %v12372_v57 = vld [vmem:[%s16254_s2 + $0x888] sm:$0xff] }
 0x140   :  { %3334 = vmatpush.bf16.msrb.mxu0 %v12323_v13  ;;  %3347 = vmatpush.bf16.msrb.mxu1 %v12331_v14  ;;  %v1910_v51 = vpop.f32.mrf.mxu0  ;;  %v1923_v52 = vpop.f32.mrf.mxu1  ;;  %v12365_v13 = vld [vmem:[%s16254_s2 + $0x850] sm:$0xff]  ;;  %vm307_vm11 = vmand %vm143_vm7, %vm235_vm8 }
 0x141   :  { %v1911_v53 = vadd.f32 %v1910_v51, %v13998_v56  ;;  %v12358_v56 = vld [vmem:[%s16254_s2 + $0x818] sm:$0xff] }
 0x142   :  { %3360 = vmatpush.bf16.msrb.mxu2 %v12339_v15  ;;  %3373 = vmatpush.bf16.msrb.mxu3 %v12347_v16  ;;  %v12373_v15 = vld [vmem:[%s16254_s2 + $0x890] sm:$0xff] }
 0x143   :  { %3335 = vmatmul.bf16.vlgmr.msrb.gmra.mxu0 %v2865_v0  ;;  %3348 = vmatmul.bf16.vlgmr.msrb.gmra.mxu1 %v2866_v49  ;;  %v1924_v59 = vadd.f32 %v1923_v52, %v1911_v53  ;;  %v12381_v16 = vld [vmem:[%s16254_s2 + $0x8d0] sm:$0xff] }
 0x144   :  { %3379 = vmatpush.bf16.msra.mxu0 %v12362_v61  ;;  %3392 = vmatpush.bf16.msra.mxu1 %v12370_v5  ;;  %v8643_v61 = vsel %vm305_vm9, 1.0, %v12858_v31  ;;  %v8644_v5 = vsel %vm306_vm10, 1.0, %v12858_v31 }
 0x145   :  { %3361 = vmatmul.bf16.vlgmr.msrb.gmra.mxu2 %v2867_v39  ;;  %3374 = vmatmul.bf16.vlgmr.msrb.gmra.mxu3 %v2868_v40  ;;  %v506_v0 = vpack.c.bf16 %v8644_v5, %v8643_v61  ;;  %v12371_v39 = vld [vmem:[%s16254_s2 + $0x880] sm:$0xff]  ;;  %v12390_v61 = vld [vmem:[%s16254_s2 + $0x918] sm:$0xff] }
 0x146   :  { %3405 = vmatpush.bf16.msra.mxu2 %v12378_v17  ;;  %3418 = vmatpush.bf16.msra.mxu3 %v12386_v18  ;;  %v8645_v17 = vsel %vm307_vm11, 1.0, %v12858_v31  ;;  %v12380_v18 = vld [vmem:[%s16254_s2 + $0x8c8] sm:$0xff]  ;;  %v12379_v40 = vld [vmem:[%s16254_s2 + $0x8c0] sm:$0xff]  ;;  %v12398_v5 = vld [vmem:[%s16254_s2 + $0x958] sm:$0xff] }
 0x147   :  { %v507_v49 = vpack.c.bf16 %v8645_v17, %v8645_v17  ;;  %v2862_v51 = vunpack.c.h.b16 %v506_v0  ;;  %v12414_v17 = vld [vmem:[%s16254_s2 + $0x9d8] sm:$0xff] }
 0x148   :  { %3380 = vmatpush.bf16.msra.mxu0 %v12361_v32  ;;  %3393 = vmatpush.bf16.msra.mxu1 %v12369_v35  ;;  %v1936_v1 = vpop.f32.mrf.mxu2  ;;  %v1949_v2 = vpop.f32.mrf.mxu3  ;;  %v12355_v32 = vld [vmem:[%s16254_s2 + $0x800] sm:$0xff] }
 0x149   :  { %v1937_v6 = vadd.f32 %v1936_v1, %v1924_v59  ;;  %v1912_v7 = vpop.f32.mrf.mxu0  ;;  %v1925_v9 = vpop.f32.mrf.mxu1  ;;  %v12363_v35 = vld [vmem:[%s16254_s2 + $0x840] sm:$0xff]  ;;  %v2863_v52 = vunpack.c.l.b16 %v507_v49  ;;  %v12409_v59 = vld [vmem:[%s16254_s2 + $0x9b0] sm:$0xff]  ;;  %v12416_v1 = vld [vmem:[%s16254_s2 + $0x9e8] sm:$0xff] }
 0x14a   :  { %3406 = vmatpush.bf16.msra.mxu2 %v12377_v41  ;;  %3419 = vmatpush.bf16.msra.mxu3 %v12385_v44  ;;  %v12394_v41 = vld [vmem:[%s16254_s2 + $0x938] sm:$0xff] }
 0x14b   :  { %v14147_v14 = vadd.f32 %v1949_v2, %v1937_v6  ;;  %v12402_v44 = vld [vmem:[%s16254_s2 + $0x978] sm:$0xff] }
 0x14c   :  { %3381 = vmatpush.bf16.msra.mxu0 %v12360_v45  ;;  %3394 = vmatpush.bf16.msra.mxu1 %v12368_v46  ;;  %v2860_v45 = vunpack.c.h.b16 %v14030_v12  ;;  %v2861_v46 = vunpack.c.l.b16 %v506_v0  ;;  %v12393_v12 = vld [vmem:[%s16254_s2 + $0x930] sm:$0xff] }
 0x14d   :  { %v14225_v2 = vpop.permute.xlu2 %90 }
 0x14e   :  { %3407 = vmatpush.bf16.msra.mxu2 %v12376_v47  ;;  %3420 = vmatpush.bf16.msra.mxu3 %v12384_v50  ;;  %v12410_v47 = vld [vmem:[%s16254_s2 + $0x9b8] sm:$0xff]  ;;  %v2869_v53 = vpack.c.b16 %v2860_v45, %v2860_v45  ;;  %vm144_vm12 = vcmp.ge.f32.partialorder %v13110_v21, %v14225_v2  ;;  %vm236_vm13 = vcmp.lt.f32.partialorder %v13114_v23, %v14225_v2 }
 0x14f   :  { %v12418_v50 = vld [vmem:[%s16254_s2 + $0x9f8] sm:$0xff]  ;;  %vm145_vm14 = vcmp.ge.f32.partialorder %v13112_v22, %v14225_v2  ;;  %vm237_vm15 = vcmp.lt.f32.partialorder %v13116_v24, %v14225_v2  ;;  %vm146_vm0 = vcmp.ge.f32.partialorder %v13118_v25, %v14225_v2  ;;  %vm238_vm1 = vcmp.lt.f32.partialorder %v13122_v27, %v14225_v2  ;;  %vm14260_vm2 = vmand %vm144_vm12, %vm236_vm13 }
 0x150   :  { %3382 = vmatpush.bf16.msra.mxu0 %v12359_v54  ;;  %3395 = vmatpush.bf16.msra.mxu1 %v12367_v55  ;;  %v1938_v19 = vpop.f32.mrf.mxu2  ;;  %v1951_v20 = vpop.f32.mrf.mxu3  ;;  %v2870_v54 = vpack.c.b16 %v2861_v46, %v2861_v46  ;;  %v12401_v55 = vld [vmem:[%s16254_s2 + $0x970] sm:$0xff]  ;;  %vm147_vm3 = vcmp.ge.f32.partialorder %v13120_v26, %v14225_v2  ;;  %vm239_vm4 = vcmp.lt.f32.partialorder %v13124_v28, %v14225_v2  ;;  %vm14277_vm5 = vmand %vm145_vm14, %vm237_vm15 }
 0x151   :  { %vm310_vm6 = vmand %vm146_vm0, %vm238_vm1  ;;  %vm148_vm8 = vcmp.ge.f32.partialorder %v13128_v30, %v14225_v2  ;;  %vm240_vm9 = vcmp.lt.f32.partialorder %v13149_v34, %v14225_v2  ;;  %vm149_vm10 = vcmp.ge.f32.partialorder %v13147_v33, %v14225_v2  ;;  %vm241_vm11 = vcmp.lt.f32.partialorder %v13152_v36, %v14225_v2 }
 0x152   :  { %3408 = vmatpush.bf16.msra.mxu2 %v12375_v10  ;;  %3421 = vmatpush.bf16.msra.mxu3 %v12383_v58  ;;  %v2871_v10 = vpack.c.b16 %v2862_v51, %v2862_v51  ;;  %v2872_v58 = vpack.c.b16 %v2863_v52, %v2863_v52  ;;  %vm311_vm7 = vmand %vm147_vm3, %vm239_vm4  ;;  %v8648_v45 = vsel %vm310_vm6, 1.0, %v12858_v31  ;;  %v12404_v52 = vld [vmem:[%s16254_s2 + $0x988] sm:$0xff]  ;;  %vm150_vm12 = vcmp.ge.f32.partialorder %v13154_v37, %v14225_v2 }
 0x153   :  { %v8649_v46 = vsel %vm311_vm7, 1.0, %v12858_v31  ;;  %vm242_vm13 = vcmp.lt.f32.partialorder %v13156_v38, %v14225_v2  ;;  %vm14412_vm14 = vmand %vm148_vm8, %vm240_vm9  ;;  %vm151_vm15 = vcmp.ge.f32.partialorder %v13162_v42, %v14225_v2  ;;  %vm243_vm0 = vcmp.lt.f32.partialorder %v13164_v43, %v14225_v2 }
 0x154   :  { %3383 = vmatpush.bf16.msra.mxu0 %v12358_v56  ;;  %3396 = vmatpush.bf16.msra.mxu1 %v12366_v60  ;;  %v12417_v56 = vld [vmem:[%s16254_s2 + $0x9f0] sm:$0xff]  ;;  %v12392_v60 = vld [vmem:[%s16254_s2 + $0x928] sm:$0xff]  ;;  %vm313_vm1 = vmand %vm149_vm10, %vm241_vm11  ;;  %vm152_vm4 = vcmp.ge.f32.partialorder %v14118_v3, %v14225_v2 }
 0x155   :  { %vm315_vm3 = vmand %vm151_vm15, %vm243_vm0  ;;  %v12470_v3 = vld [vmem:[%s16254_s2 + $0xb98] sm:$0xff] }
 0x156   :  { %3409 = vmatpush.bf16.msra.mxu2 %v12374_v62  ;;  %3422 = vmatpush.bf16.msra.mxu3 %v12382_v63  ;;  %v12400_v62 = vld [vmem:[%s16254_s2 + $0x968] sm:$0xff] }
 0x157   :  { %v12408_v63 = vld [vmem:[%s16254_s2 + $0x9a8] sm:$0xff] }
 0x158   :  { %3384 = vmatpush.bf16.msra.mxu0 %v12357_v11  ;;  %3397 = vmatpush.bf16.msra.mxu1 %v12365_v13  ;;  %v12391_v11 = vld [vmem:[%s16254_s2 + $0x920] sm:$0xff] }
 0x159   :  { %v12399_v13 = vld [vmem:[%s16254_s2 + $0x960] sm:$0xff] }
 0x15a   :  { %3410 = vmatpush.bf16.msra.mxu2 %v12373_v15  ;;  %3423 = vmatpush.bf16.msra.mxu3 %v12381_v16  ;;  %v12407_v15 = vld [vmem:[%s16254_s2 + $0x9a0] sm:$0xff] }
 0x15b   :  { %v12415_v16 = vld [vmem:[%s16254_s2 + $0x9e0] sm:$0xff] }
 0x15c   :  { %3385 = vmatpush.bf16.msra.mxu0 %v12356_v8  ;;  %3398 = vmatpush.bf16.msra.mxu1 %v12364_v48  ;;  %v12406_v48 = vld [vmem:[%s16254_s2 + $0x998] sm:$0xff]  ;;  %v12433_v8 = vld [vmem:[%s16254_s2 + $0xa70] sm:$0xff] }
 0x15e   :  { %3411 = vmatpush.bf16.msra.mxu2 %v12372_v57  ;;  %3424 = vmatpush.bf16.msra.mxu3 %v12380_v18  ;;  %v12424_v57 = vld [vmem:[%s16254_s2 + $0xa28] sm:$0xff] }
 0x160   :  { %3386 = vmatpush.bf16.msra.mxu0 %v12355_v32  ;;  %3399 = vmatpush.bf16.msra.mxu1 %v12363_v35  ;;  %v1962_v6 = vpop.f32.mrf.mxu0  ;;  %v1975_v7 = vpop.f32.mrf.mxu1  ;;  %v12389_v32 = vld [vmem:[%s16254_s2 + $0x910] sm:$0xff] }
 0x161   :  { %v1963_v9 = vadd.f32 %v1962_v6, %v14147_v14  ;;  %v12397_v35 = vld [vmem:[%s16254_s2 + $0x950] sm:$0xff]  ;;  %v12426_v6 = vld [vmem:[%s16254_s2 + $0xa38] sm:$0xff] }
 0x162   :  { %3412 = vmatpush.bf16.msra.mxu2 %v12371_v39  ;;  %3425 = vmatpush.bf16.msra.mxu3 %v12379_v40  ;;  %v12405_v39 = vld [vmem:[%s16254_s2 + $0x990] sm:$0xff] }
 0x163   :  { %3387 = vmatmul.bf16.vlgmr.msra.gmra.mxu0 %v2869_v53  ;;  %3400 = vmatmul.bf16.vlgmr.msra.gmra.mxu1 %v2870_v54  ;;  %v14244_v14 = vadd.f32 %v1975_v7, %v1963_v9  ;;  %v12413_v40 = vld [vmem:[%s16254_s2 + $0x9d0] sm:$0xff]  ;;  %v12412_v53 = vld [vmem:[%s16254_s2 + $0x9c8] sm:$0xff]  ;;  %v509_v54 = vpack.c.bf16 %v8649_v46, %v8648_v45  ;;  %v12434_v7 = vld [vmem:[%s16254_s2 + $0xa78] sm:$0xff] }
 0x164   :  { %4040 = vmatpush.bf16.msrb.mxu0 %v12394_v41  ;;  %4053 = vmatpush.bf16.msrb.mxu1 %v12402_v44  ;;  %v8646_v41 = vsel %vm14260_vm2, 1.0, %v12858_v31  ;;  %v8647_v44 = vsel %vm14277_vm5, 1.0, %v12858_v31  ;;  %v12442_v9 = vld [vmem:[%s16254_s2 + $0xab8] sm:$0xff]  ;;  %vm314_vm2 = vmand %vm150_vm12, %vm242_vm13  ;;  %vm244_vm5 = vcmp.lt.f32.partialorder %v14125_v4, %v14225_v2 }
 0x165   :  { %3413 = vmatmul.bf16.vlgmr.msra.gmra.mxu2 %v2871_v10  ;;  %3426 = vmatmul.bf16.vlgmr.msra.gmra.mxu3 %v2872_v58  ;;  %v508_v51 = vpack.c.bf16 %v8647_v44, %v8646_v41  ;;  %v12387_v10 = vld [vmem:[%s16254_s2 + $0x900] sm:$0xff]  ;;  %v12430_v46 = vld [vmem:[%s16254_s2 + $0xa58] sm:$0xff]  ;;  %vm14557_vm10 = vmand %vm152_vm4, %vm244_vm5 }
 0x166   :  { %4066 = vmatpush.bf16.msrb.mxu2 %v12410_v47  ;;  %4079 = vmatpush.bf16.msrb.mxu3 %v12418_v50  ;;  %v12388_v47 = vld [vmem:[%s16254_s2 + $0x908] sm:$0xff]  ;;  %v12395_v58 = vld [vmem:[%s16254_s2 + $0x940] sm:$0xff]  ;;  %v12478_v4 = vld [vmem:[%s16254_s2 + $0xbd8] sm:$0xff] }
 0x167   :  { %v12396_v50 = vld [vmem:[%s16254_s2 + $0x948] sm:$0xff]  ;;  %v12439_v41 = vld [vmem:[%s16254_s2 + $0xaa0] sm:$0xff] }
 0x168   :  { %4041 = vmatpush.bf16.msrb.mxu0 %v12393_v12  ;;  %4054 = vmatpush.bf16.msrb.mxu1 %v12401_v55  ;;  %v2597_v18 = vpop.f32.mrf.mxu2  ;;  %v2610_v19 = vpop.f32.mrf.mxu3  ;;  %v12447_v44 = vld [vmem:[%s16254_s2 + $0xae0] sm:$0xff] }
 0x169   :  { %v1964_v20 = vpop.f32.mrf.mxu0  ;;  %v1977_v0 = vpop.f32.mrf.mxu1  ;;  %v14287_v49 = vadd.f32 %v2610_v19, %v2597_v18  ;;  %v12432_v18 = vld [vmem:[%s16254_s2 + $0xa68] sm:$0xff] }
 0x16a   :  { %4067 = vmatpush.bf16.msrb.mxu2 %v12409_v59  ;;  %4080 = vmatpush.bf16.msrb.mxu3 %v12417_v56  ;;  %v3581_v59 = vunpack.c.l.b16 %v508_v51  ;;  %v3582_v56 = vunpack.c.h.b16 %v508_v51  ;;  %v12440_v19 = vld [vmem:[%s16254_s2 + $0xaa8] sm:$0xff] }
 0x16b   :  { %v12448_v20 = vld [vmem:[%s16254_s2 + $0xae8] sm:$0xff] }
 0x16c   :  { %4042 = vmatpush.bf16.msrb.mxu0 %v12392_v60  ;;  %4055 = vmatpush.bf16.msrb.mxu1 %v12400_v62  ;;  %v12403_v60 = vld [vmem:[%s16254_s2 + $0x980] sm:$0xff] }
 0x16d   :  { %v12411_v62 = vld [vmem:[%s16254_s2 + $0x9c0] sm:$0xff] }
 0x16e   :  { %4068 = vmatpush.bf16.msrb.mxu2 %v12408_v63  ;;  %4081 = vmatpush.bf16.msrb.mxu3 %v12416_v1  ;;  %v3583_v63 = vunpack.c.l.b16 %v509_v54  ;;  %v3584_v1 = vunpack.c.h.b16 %v509_v54 }
 0x170   :  { %4043 = vmatpush.bf16.msrb.mxu0 %v12391_v11  ;;  %4056 = vmatpush.bf16.msrb.mxu1 %v12399_v13  ;;  %v2599_v12 = vpop.f32.mrf.mxu2  ;;  %v2612_v55 = vpop.f32.mrf.mxu3  ;;  %v12450_v11 = vld [vmem:[%s16254_s2 + $0xaf8] sm:$0xff]  ;;  %v3590_v13 = vpack.c.b16 %v3581_v59, %v3581_v59 }
 0x172   :  { %4069 = vmatpush.bf16.msrb.mxu2 %v12407_v15  ;;  %4082 = vmatpush.bf16.msrb.mxu3 %v12415_v16  ;;  %v3591_v15 = vpack.c.b16 %v3582_v56, %v3582_v56  ;;  %v3592_v16 = vpack.c.b16 %v3583_v63, %v3583_v63  ;;  %v12437_v56 = vld [vmem:[%s16254_s2 + $0xa90] sm:$0xff]  ;;  %v8651_v63 = vsel %vm313_vm1, 1.0, %v12858_v31 }
 0x174   :  { %4044 = vmatpush.bf16.msrb.mxu0 %v12390_v61  ;;  %4057 = vmatpush.bf16.msrb.mxu1 %v12398_v5  ;;  %v3593_v61 = vpack.c.b16 %v3584_v1, %v3584_v1  ;;  %v12425_v5 = vld [vmem:[%s16254_s2 + $0xa30] sm:$0xff]  ;;  %v12420_v1 = vld [vmem:[%s16254_s2 + $0xa08] sm:$0xff] }
 0x176   :  { %4070 = vmatpush.bf16.msrb.mxu2 %v12406_v48  ;;  %4083 = vmatpush.bf16.msrb.mxu3 %v12414_v17  ;;  %v12441_v48 = vld [vmem:[%s16254_s2 + $0xab0] sm:$0xff] }
 0x177   :  { %v12449_v17 = vld [vmem:[%s16254_s2 + $0xaf0] sm:$0xff] }
 0x178   :  { %4045 = vmatpush.bf16.msrb.mxu0 %v12389_v32  ;;  %4058 = vmatpush.bf16.msrb.mxu1 %v12397_v35 }
 0x17a   :  { %4071 = vmatpush.bf16.msrb.mxu2 %v12405_v39  ;;  %4084 = vmatpush.bf16.msrb.mxu3 %v12413_v40  ;;  %v12423_v39 = vld [vmem:[%s16254_s2 + $0xa20] sm:$0xff] }
 0x17b   :  { %v12431_v40 = vld [vmem:[%s16254_s2 + $0xa60] sm:$0xff] }
 0x17c   :  { %4046 = vmatpush.bf16.msrb.mxu0 %v12388_v47  ;;  %4059 = vmatpush.bf16.msrb.mxu1 %v12396_v50  ;;  %v12438_v47 = vld [vmem:[%s16254_s2 + $0xa98] sm:$0xff] }
 0x17d   :  { %v12446_v50 = vld [vmem:[%s16254_s2 + $0xad8] sm:$0xff] }
 0x17e   :  { %4072 = vmatpush.bf16.msrb.mxu2 %v12404_v52  ;;  %4085 = vmatpush.bf16.msrb.mxu3 %v12412_v53  ;;  %v12464_v53 = vld [vmem:[%s16254_s2 + $0xb68] sm:$0xff] }
 0x180   :  { %4047 = vmatpush.bf16.msrb.mxu0 %v12387_v10  ;;  %4060 = vmatpush.bf16.msrb.mxu1 %v12395_v58  ;;  %v2623_v0 = vpop.f32.mrf.mxu0  ;;  %v2636_v32 = vpop.f32.mrf.mxu1  ;;  %v12421_v10 = vld [vmem:[%s16254_s2 + $0xa10] sm:$0xff] }
 0x181   :  { %v2624_v35 = vadd.f32 %v2623_v0, %v14287_v49  ;;  %v12422_v49 = vld [vmem:[%s16254_s2 + $0xa18] sm:$0xff]  ;;  %v12429_v58 = vld [vmem:[%s16254_s2 + $0xa50] sm:$0xff] }
 0x182   :  { %4073 = vmatpush.bf16.msrb.mxu2 %v12403_v60  ;;  %4086 = vmatpush.bf16.msrb.mxu3 %v12411_v62  ;;  %v12445_v60 = vld [vmem:[%s16254_s2 + $0xad0] sm:$0xff]  ;;  %v8650_v62 = vsel %vm14412_vm14, 1.0, %v12858_v31 }
 0x183   :  { %4048 = vmatmul.bf16.vlgmr.msrb.gmra.mxu0 %v3590_v13  ;;  %4061 = vmatmul.bf16.vlgmr.msrb.gmra.mxu1 %v3591_v15  ;;  %v2637_v45 = vadd.f32 %v2636_v32, %v2624_v35  ;;  %v12444_v13 = vld [vmem:[%s16254_s2 + $0xac8] sm:$0xff]  ;;  %v12474_v32 = vld [vmem:[%s16254_s2 + $0xbb8] sm:$0xff] }
 0x184   :  { %4092 = vmatpush.bf16.msra.mxu0 %v12426_v6  ;;  %4105 = vmatpush.bf16.msra.mxu1 %v12434_v7  ;;  %v12428_v6 = vld [vmem:[%s16254_s2 + $0xa48] sm:$0xff]  ;;  %v8652_v7 = vsel %vm314_vm2, 1.0, %v12858_v31  ;;  %v12482_v35 = vld [vmem:[%s16254_s2 + $0xbf8] sm:$0xff] }
 0x185   :  { %4074 = vmatmul.bf16.vlgmr.msrb.gmra.mxu2 %v3592_v16  ;;  %4087 = vmatmul.bf16.vlgmr.msrb.gmra.mxu3 %v3593_v61  ;;  %v510_v61 = vpack.c.bf16 %v8651_v63, %v8650_v62  ;;  %v12471_v62 = vld [vmem:[%s16254_s2 + $0xba0] sm:$0xff] }
 0x186   :  { %4118 = vmatpush.bf16.msra.mxu2 %v12442_v9  ;;  %4131 = vmatpush.bf16.msra.mxu3 %v12450_v11  ;;  %v8653_v9 = vsel %vm315_vm3, 1.0, %v12858_v31  ;;  %v12436_v11 = vld [vmem:[%s16254_s2 + $0xa88] sm:$0xff]  ;;  %v12479_v63 = vld [vmem:[%s16254_s2 + $0xbe0] sm:$0xff] }
 0x187   :  { %v3586_v0 = vunpack.c.h.b16 %v510_v61 }
 0x188   :  { %4093 = vmatpush.bf16.msra.mxu0 %v12425_v5  ;;  %4106 = vmatpush.bf16.msra.mxu1 %v12433_v8  ;;  %v2649_v51 = vpop.f32.mrf.mxu2  ;;  %v2662_v52 = vpop.f32.mrf.mxu3  ;;  %v511_v5 = vpack.c.bf16 %v8653_v9, %v8652_v7  ;;  %v12419_v8 = vld [vmem:[%s16254_s2 + $0xa00] sm:$0xff] }
 0x189   :  { %v2650_v54 = vadd.f32 %v2649_v51, %v2637_v45  ;;  %v2625_v12 = vpop.f32.mrf.mxu0  ;;  %v2638_v55 = vpop.f32.mrf.mxu1  ;;  %v12457_v45 = vld [vmem:[%s16254_s2 + $0xb30] sm:$0xff] }
 0x18a   :  { %4119 = vmatpush.bf16.msra.mxu2 %v12441_v48  ;;  %4132 = vmatpush.bf16.msra.mxu3 %v12449_v17  ;;  %v12427_v48 = vld [vmem:[%s16254_s2 + $0xa40] sm:$0xff]  ;;  %v12481_v51 = vld [vmem:[%s16254_s2 + $0xbf0] sm:$0xff]  ;;  %v12480_v12 = vld [vmem:[%s16254_s2 + $0xbe8] sm:$0xff] }
 0x18b   :  { %v14435_v59 = vadd.f32 %v2662_v52, %v2650_v54  ;;  %v12435_v17 = vld [vmem:[%s16254_s2 + $0xa80] sm:$0xff]  ;;  %v12456_v52 = vld [vmem:[%s16254_s2 + $0xb28] sm:$0xff] }
 0x18c   :  { %4094 = vmatpush.bf16.msra.mxu0 %v12424_v57  ;;  %4107 = vmatpush.bf16.msra.mxu1 %v12432_v18  ;;  %v12443_v57 = vld [vmem:[%s16254_s2 + $0xac0] sm:$0xff]  ;;  %v12458_v18 = vld [vmem:[%s16254_s2 + $0xb38] sm:$0xff]  ;;  %v12472_v54 = vld [vmem:[%s16254_s2 + $0xba8] sm:$0xff] }
 0x18e   :  { %4120 = vmatpush.bf16.msra.mxu2 %v12440_v19  ;;  %4133 = vmatpush.bf16.msra.mxu3 %v12448_v20  ;;  %v12466_v19 = vld [vmem:[%s16254_s2 + $0xb78] sm:$0xff]  ;;  %v3585_v20 = vunpack.c.l.b16 %v510_v61  ;;  %v12461_v61 = vld [vmem:[%s16254_s2 + $0xb50] sm:$0xff] }
 0x190   :  { %4095 = vmatpush.bf16.msra.mxu0 %v12423_v39  ;;  %4108 = vmatpush.bf16.msra.mxu1 %v12431_v40  ;;  %v2651_v15 = vpop.f32.mrf.mxu2  ;;  %v2664_v16 = vpop.f32.mrf.mxu3  ;;  %v3587_v39 = vunpack.c.l.b16 %v511_v5  ;;  %v3588_v40 = vunpack.c.h.b16 %v511_v5  ;;  %v12469_v5 = vld [vmem:[%s16254_s2 + $0xb90] sm:$0xff] }
 0x191   :  { %v12453_v16 = vld [vmem:[%s16254_s2 + $0xb10] sm:$0xff] }
 0x192   :  { %4121 = vmatpush.bf16.msra.mxu2 %v12439_v41  ;;  %4134 = vmatpush.bf16.msra.mxu3 %v12447_v44  ;;  %v3594_v41 = vpack.c.b16 %v3585_v20, %v3585_v20  ;;  %v3595_v44 = vpack.c.b16 %v3586_v0, %v3586_v0 }
 0x194   :  { %4096 = vmatpush.bf16.msra.mxu0 %v12422_v49  ;;  %4109 = vmatpush.bf16.msra.mxu1 %v12430_v46  ;;  %v12465_v49 = vld [vmem:[%s16254_s2 + $0xb70] sm:$0xff]  ;;  %v3596_v46 = vpack.c.b16 %v3587_v39, %v3587_v39 }
 0x196   :  { %4122 = vmatpush.bf16.msra.mxu2 %v12438_v47  ;;  %4135 = vmatpush.bf16.msra.mxu3 %v12446_v50  ;;  %v3597_v47 = vpack.c.b16 %v3588_v40, %v3588_v40  ;;  %v12473_v50 = vld [vmem:[%s16254_s2 + $0xbb0] sm:$0xff] }
 0x198   :  { %4097 = vmatpush.bf16.msra.mxu0 %v12421_v10  ;;  %4110 = vmatpush.bf16.msra.mxu1 %v12429_v58  ;;  %v14519_v58 = vpop.permute.xlu2 %95 }
 0x199   :  { %vm153_vm6 = vcmp.ge.f32.partialorder %v13110_v21, %v14519_v58  ;;  %vm245_vm7 = vcmp.lt.f32.partialorder %v13114_v23, %v14519_v58  ;;  %vm154_vm8 = vcmp.ge.f32.partialorder %v13112_v22, %v14519_v58  ;;  %vm246_vm9 = vcmp.lt.f32.partialorder %v13116_v24, %v14519_v58 }
 0x19a   :  { %4123 = vmatpush.bf16.msra.mxu2 %v12437_v56  ;;  %4136 = vmatpush.bf16.msra.mxu3 %v12445_v60  ;;  %v12455_v56 = vld [vmem:[%s16254_s2 + $0xb20] sm:$0xff]  ;;  %vm155_vm11 = vcmp.ge.f32.partialorder %v13118_v25, %v14519_v58  ;;  %vm247_vm12 = vcmp.lt.f32.partialorder %v13122_v27, %v14519_v58  ;;  %vm14575_vm13 = vmand %vm153_vm6, %vm245_vm7  ;;  %vm156_vm14 = vcmp.ge.f32.partialorder %v13120_v26, %v14519_v58 }
 0x19b   :  { %v12463_v60 = vld [vmem:[%s16254_s2 + $0xb60] sm:$0xff]  ;;  %vm248_vm15 = vcmp.lt.f32.partialorder %v13124_v28, %v14519_v58  ;;  %vm318_vm0 = vmand %vm154_vm8, %vm246_vm9  ;;  %vm157_vm3 = vcmp.ge.f32.partialorder %v13128_v30, %v14519_v58  ;;  %vm249_vm4 = vcmp.lt.f32.partialorder %v13149_v34, %v14519_v58  ;;  %vm158_vm5 = vcmp.ge.f32.partialorder %v13147_v33, %v14519_v58 }
 0x19c   :  { %4098 = vmatpush.bf16.msra.mxu0 %v12420_v1  ;;  %4111 = vmatpush.bf16.msra.mxu1 %v12428_v6  ;;  %v12454_v1 = vld [vmem:[%s16254_s2 + $0xb18] sm:$0xff]  ;;  %vm319_vm1 = vmand %vm155_vm11, %vm247_vm12  ;;  %vm250_vm6 = vcmp.lt.f32.partialorder %v13152_v36, %v14519_v58  ;;  %vm159_vm7 = vcmp.ge.f32.partialorder %v13154_v37, %v14519_v58  ;;  %vm251_vm8 = vcmp.lt.f32.partialorder %v13156_v38, %v14519_v58 }
 0x19d   :  { %v12462_v6 = vld [vmem:[%s16254_s2 + $0xb58] sm:$0xff]  ;;  %vm320_vm2 = vmand %vm156_vm14, %vm248_vm15  ;;  %v8657_v20 = vsel %vm319_vm1, 1.0, %v12858_v31  ;;  %vm252_vm11 = vcmp.lt.f32.partialorder %v13164_v43, %v14519_v58 }
 0x19e   :  { %4124 = vmatpush.bf16.msra.mxu2 %v12436_v11  ;;  %4137 = vmatpush.bf16.msra.mxu3 %v12444_v13  ;;  %v8658_v0 = vsel %vm320_vm2, 1.0, %v12858_v31  ;;  %v12505_v11 = vld [vmem:[%s16254_s2 + $0xcb0] sm:$0xff]  ;;  %vm14723_vm9 = vmand %vm157_vm3, %vm249_vm4 }
 0x19f   :  { %vm322_vm12 = vmand %vm158_vm5, %vm250_vm6 }
 0x1a0   :  { %4099 = vmatpush.bf16.msra.mxu0 %v12419_v8  ;;  %4112 = vmatpush.bf16.msra.mxu1 %v12427_v48  ;;  %v14515_v55 = vpop.f32.mrf.mxu0  ;;  %v14517_v10 = vpop.f32.mrf.mxu1  ;;  %v12477_v8 = vld [vmem:[%s16254_s2 + $0xbd0] sm:$0xff]  ;;  %v8654_v48 = vsel %vm14557_vm10, 1.0, %v12858_v31  ;;  %vm160_vm10 = vcmp.ge.f32.partialorder %v13162_v42, %v14519_v58 }
 0x1a1   :  { %vm324_vm14 = vmand %vm160_vm10, %vm252_vm11 }
 0x1a2   :  { %4125 = vmatpush.bf16.msra.mxu2 %v12435_v17  ;;  %4138 = vmatpush.bf16.msra.mxu3 %v12443_v57  ;;  %v8655_v17 = vsel %vm14575_vm13, 1.0, %v12858_v31  ;;  %v8656_v57 = vsel %vm318_vm0, 1.0, %v12858_v31  ;;  %vm323_vm13 = vmand %vm159_vm7, %vm251_vm8 }
 0x1a3   :  { %4100 = vmatmul.bf16.vlgmr.msra.gmra.mxu0 %v3594_v41  ;;  %4113 = vmatmul.bf16.vlgmr.msra.gmra.mxu1 %v3595_v44  ;;  %v512_v41 = vpack.c.bf16 %v8654_v48, %v8654_v48  ;;  %v513_v44 = vpack.c.bf16 %v8656_v57, %v8655_v17  ;;  %v12487_v17 = vld [vmem:[%s16254_s2 + $0xc20] sm:$0xff] }
 0x1a4   :  { %4144 = vmatpush.bf16.msrb.mxu0 %v12458_v18  ;;  %4766 = vmatpush.bf16.msrb.mxu1 %v12466_v19  ;;  %v12452_v18 = vld [vmem:[%s16254_s2 + $0xb08] sm:$0xff]  ;;  %v12495_v57 = vld [vmem:[%s16254_s2 + $0xc60] sm:$0xff] }
 0x1a5   :  { %4126 = vmatmul.bf16.vlgmr.msra.gmra.mxu2 %v3596_v46  ;;  %4139 = vmatmul.bf16.vlgmr.msra.gmra.mxu3 %v3597_v47  ;;  %v12460_v19 = vld [vmem:[%s16254_s2 + $0xb48] sm:$0xff]  ;;  %v12459_v46 = vld [vmem:[%s16254_s2 + $0xb40] sm:$0xff] }
 0x1a6   :  { %4779 = vmatpush.bf16.msrb.mxu2 %v12474_v32  ;;  %4792 = vmatpush.bf16.msrb.mxu3 %v12482_v35  ;;  %v12468_v32 = vld [vmem:[%s16254_s2 + $0xb88] sm:$0xff]  ;;  %v12467_v47 = vld [vmem:[%s16254_s2 + $0xb80] sm:$0xff] }
 0x1a7   :  { %v12476_v35 = vld [vmem:[%s16254_s2 + $0xbc8] sm:$0xff] }
 0x1a8   :  { %4145 = vmatpush.bf16.msrb.mxu0 %v12457_v45  ;;  %4767 = vmatpush.bf16.msrb.mxu1 %v12465_v49  ;;  %v14565_v7 = vpop.f32.mrf.mxu2  ;;  %v14567_v9 = vpop.f32.mrf.mxu3  ;;  %v14622_v45 = vpack.c.bf16 %v8658_v0, %v8657_v20  ;;  %v12451_v49 = vld [vmem:[%s16254_s2 + $0xb00] sm:$0xff]  ;;  %v12486_v20 = vld [vmem:[%s16254_s2 + $0xc18] sm:$0xff] }
 0x1a9   :  { %v2677_v13 = vpop.f32.mrf.mxu0  ;;  %v2690_v15 = vpop.f32.mrf.mxu1  ;;  %v12494_v0 = vld [vmem:[%s16254_s2 + $0xc58] sm:$0xff] }
 0x1aa   :  { %4780 = vmatpush.bf16.msrb.mxu2 %v12473_v50  ;;  %4793 = vmatpush.bf16.msrb.mxu3 %v12481_v51  ;;  %v12475_v50 = vld [vmem:[%s16254_s2 + $0xbc0] sm:$0xff]  ;;  %v12490_v51 = vld [vmem:[%s16254_s2 + $0xc38] sm:$0xff]  ;;  %v12513_v13 = vld [vmem:[%s16254_s2 + $0xcf0] sm:$0xff] }
 0x1ab   :  { %v12488_v15 = vld [vmem:[%s16254_s2 + $0xc28] sm:$0xff] }
 0x1ac   :  { %4146 = vmatpush.bf16.msrb.mxu0 %v12456_v52  ;;  %4768 = vmatpush.bf16.msrb.mxu1 %v12464_v53  ;;  %v12498_v52 = vld [vmem:[%s16254_s2 + $0xc78] sm:$0xff]  ;;  %v3589_v53 = vunpack.c.l.b16 %v512_v41 }
 0x1ae   :  { %4781 = vmatpush.bf16.msrb.mxu2 %v12472_v54  ;;  %4794 = vmatpush.bf16.msrb.mxu3 %v12480_v12  ;;  %v4307_v54 = vunpack.c.l.b16 %v513_v44  ;;  %v12506_v12 = vld [vmem:[%s16254_s2 + $0xcb8] sm:$0xff] }
 0x1b0   :  { %4147 = vmatpush.bf16.msrb.mxu0 %v12455_v56  ;;  %4769 = vmatpush.bf16.msrb.mxu1 %v12463_v60  ;;  %v2703_v39 = vpop.f32.mrf.mxu2  ;;  %v3325_v40 = vpop.f32.mrf.mxu3  ;;  %v12514_v56 = vld [vmem:[%s16254_s2 + $0xcf8] sm:$0xff]  ;;  %v4308_v60 = vunpack.c.h.b16 %v513_v44 }
 0x1b2   :  { %4782 = vmatpush.bf16.msrb.mxu2 %v12471_v62  ;;  %4795 = vmatpush.bf16.msrb.mxu3 %v12479_v63  ;;  %v4309_v62 = vunpack.c.l.b16 %v14622_v45  ;;  %v3598_v63 = vpack.c.b16 %v3589_v53, %v3589_v53  ;;  %v8660_v53 = vsel %vm322_vm12, 1.0, %v12858_v31 }
 0x1b4   :  { %4148 = vmatpush.bf16.msrb.mxu0 %v12454_v1  ;;  %4770 = vmatpush.bf16.msrb.mxu1 %v12462_v6  ;;  %v4316_v1 = vpack.c.b16 %v4307_v54, %v4307_v54  ;;  %v12489_v6 = vld [vmem:[%s16254_s2 + $0xc30] sm:$0xff]  ;;  %v4318_v2 = vpack.c.b16 %v4309_v62, %v4309_v62  ;;  %v12484_v54 = vld [vmem:[%s16254_s2 + $0xc08] sm:$0xff] }
 0x1b5   :  { %v12500_v62 = vld [vmem:[%s16254_s2 + $0xc88] sm:$0xff] }
 0x1b6   :  { %4783 = vmatpush.bf16.msrb.mxu2 %v12470_v3  ;;  %4796 = vmatpush.bf16.msrb.mxu3 %v12478_v4  ;;  %v12497_v3 = vld [vmem:[%s16254_s2 + $0xc70] sm:$0xff]  ;;  %v4317_v4 = vpack.c.b16 %v4308_v60, %v4308_v60  ;;  %v8662_v60 = vsel %vm324_vm14, 1.0, %v12858_v31 }
 0x1b8   :  { %4149 = vmatpush.bf16.msrb.mxu0 %v12453_v16  ;;  %4771 = vmatpush.bf16.msrb.mxu1 %v12461_v61  ;;  %v12496_v16 = vld [vmem:[%s16254_s2 + $0xc68] sm:$0xff] }
 0x1b9   :  { %v12504_v61 = vld [vmem:[%s16254_s2 + $0xca8] sm:$0xff] }
 0x1ba   :  { %4784 = vmatpush.bf16.msrb.mxu2 %v12469_v5  ;;  %4797 = vmatpush.bf16.msrb.mxu3 %v12477_v8  ;;  %v12512_v5 = vld [vmem:[%s16254_s2 + $0xce8] sm:$0xff] }
 0x1bc   :  { %4150 = vmatpush.bf16.msrb.mxu0 %v12452_v18  ;;  %4772 = vmatpush.bf16.msrb.mxu1 %v12460_v19  ;;  %v12503_v18 = vld [vmem:[%s16254_s2 + $0xca0] sm:$0xff] }
 0x1bd   :  { %v12511_v19 = vld [vmem:[%s16254_s2 + $0xce0] sm:$0xff] }
 0x1be   :  { %4785 = vmatpush.bf16.msrb.mxu2 %v12468_v32  ;;  %4798 = vmatpush.bf16.msrb.mxu3 %v12476_v35  ;;  %v12502_v32 = vld [vmem:[%s16254_s2 + $0xc98] sm:$0xff] }
 0x1bf   :  { %v12510_v35 = vld [vmem:[%s16254_s2 + $0xcd8] sm:$0xff] }
 0x1c0   :  { %4151 = vmatpush.bf16.msrb.mxu0 %v12451_v49  ;;  %4773 = vmatpush.bf16.msrb.mxu1 %v12459_v46  ;;  %v14673_v8 = vpop.f32.mrf.mxu0  ;;  %v14675_v48 = vpop.f32.mrf.mxu1  ;;  %v12485_v46 = vld [vmem:[%s16254_s2 + $0xc10] sm:$0xff] }
 0x1c2   :  { %4786 = vmatpush.bf16.msrb.mxu2 %v12467_v47  ;;  %4799 = vmatpush.bf16.msrb.mxu3 %v12475_v50  ;;  %v12493_v47 = vld [vmem:[%s16254_s2 + $0xc50] sm:$0xff] }
 0x1c3   :  { %4152 = vmatmul.bf16.vlgmr.msrb.gmra.mxu0 %v3598_v63  ;;  %4774 = vmatmul.bf16.vlgmr.msrb.gmra.mxu1 %v4316_v1  ;;  %v12501_v50 = vld [vmem:[%s16254_s2 + $0xc90] sm:$0xff]  ;;  %v12508_v63 = vld [vmem:[%s16254_s2 + $0xcc8] sm:$0xff] }
 0x1c4   :  { %4805 = vmatpush.bf16.msra.mxu0 %v12490_v51  ;;  %4818 = vmatpush.bf16.msra.mxu1 %v12498_v52  ;;  %v12509_v51 = vld [vmem:[%s16254_s2 + $0xcd0] sm:$0xff]  ;;  %v8659_v52 = vsel %vm14723_vm9, 1.0, %v12858_v31 }
 0x1c5   :  { %4787 = vmatmul.bf16.vlgmr.msrb.gmra.mxu2 %v4317_v4  ;;  %4800 = vmatmul.bf16.vlgmr.msrb.gmra.mxu3 %v4318_v2  ;;  %v12483_v2 = vld [vmem:[%s16254_s2 + $0xc00] sm:$0xff] }
 0x1c6   :  { %4831 = vmatpush.bf16.msra.mxu2 %v12506_v12  ;;  %4844 = vmatpush.bf16.msra.mxu3 %v12514_v56  ;;  %v12492_v12 = vld [vmem:[%s16254_s2 + $0xc48] sm:$0xff]  ;;  %v8661_v56 = vsel %vm323_vm13, 1.0, %v12858_v31 }
 0x1c7   :  { %v14764_v4 = vpack.c.bf16 %v8662_v60, %v8661_v56  ;;  %v12527_v56 = vld [vmem:[%s16254_s2 + $0xd60] sm:$0xff]  ;;  %v14826_v60 = vpop.permute.xlu0 %100 }
 0x1c8   :  { %4806 = vmatpush.bf16.msra.mxu0 %v12489_v6  ;;  %4819 = vmatpush.bf16.msra.mxu1 %v12497_v3  ;;  %v14713_v39 = vpop.f32.mrf.mxu2  ;;  %v14715_v40 = vpop.f32.mrf.mxu3  ;;  %v515_v3 = vpack.c.bf16 %v8660_v53, %v8659_v52  ;;  %v12544_v52 = vld [vmem:[%s16254_s2 + $0xde8] sm:$0xff]  ;;  %vm162_vm15 = vcmp.ge.f32.partialorder %v13110_v21, %v14826_v60  ;;  %vm254_vm0 = vcmp.lt.f32.partialorder %v13114_v23, %v14826_v60 }
 0x1c9   :  { %v3338_v44 = vpop.f32.mrf.mxu0  ;;  %v3351_v49 = vpop.f32.mrf.mxu1  ;;  %vm163_vm3 = vcmp.ge.f32.partialorder %v13112_v22, %v14826_v60  ;;  %vm255_vm4 = vcmp.lt.f32.partialorder %v13116_v24, %v14826_v60  ;;  %vm14878_vm5 = vmand %vm162_vm15, %vm254_vm0  ;;  %vm164_vm8 = vcmp.ge.f32.partialorder %v13118_v25, %v14826_v60  ;;  %vm256_vm9 = vcmp.lt.f32.partialorder %v13122_v27, %v14826_v60 }
 0x1ca   :  { %4832 = vmatpush.bf16.msra.mxu2 %v12505_v11  ;;  %4845 = vmatpush.bf16.msra.mxu3 %v12513_v13  ;;  %v12491_v11 = vld [vmem:[%s16254_s2 + $0xc40] sm:$0xff]  ;;  %v12537_v49 = vld [vmem:[%s16254_s2 + $0xdb0] sm:$0xff]  ;;  %vm327_vm7 = vmand %vm163_vm3, %vm255_vm4  ;;  %vm165_vm10 = vcmp.ge.f32.partialorder %v13120_v26, %v14826_v60  ;;  %vm257_vm11 = vcmp.lt.f32.partialorder %v13124_v28, %v14826_v60  ;;  %vm166_vm12 = vcmp.ge.f32.partialorder %v13128_v30, %v14826_v60 }
 0x1cb   :  { %v12499_v13 = vld [vmem:[%s16254_s2 + $0xc80] sm:$0xff]  ;;  %vm258_vm13 = vcmp.lt.f32.partialorder %v13149_v34, %v14826_v60  ;;  %vm15010_vm14 = vmand %vm164_vm8, %vm256_vm9  ;;  %vm167_vm15 = vcmp.ge.f32.partialorder %v13147_v33, %v14826_v60  ;;  %vm259_vm0 = vcmp.lt.f32.partialorder %v13152_v36, %v14826_v60  ;;  %vm168_vm4 = vcmp.ge.f32.partialorder %v13154_v37, %v14826_v60 }
 0x1cc   :  { %4807 = vmatpush.bf16.msra.mxu0 %v12488_v15  ;;  %4820 = vmatpush.bf16.msra.mxu1 %v12496_v16  ;;  %v12507_v15 = vld [vmem:[%s16254_s2 + $0xcc0] sm:$0xff]  ;;  %v4310_v16 = vunpack.c.h.b16 %v14622_v45  ;;  %v4313_v45 = vunpack.c.l.b16 %v14764_v4  ;;  %vm331_vm3 = vmand %vm167_vm15, %vm259_vm0 }
 0x1ce   :  { %4833 = vmatpush.bf16.msra.mxu2 %v12504_v61  ;;  %4846 = vmatpush.bf16.msra.mxu3 %v12512_v5  ;;  %v12522_v61 = vld [vmem:[%s16254_s2 + $0xd38] sm:$0xff]  ;;  %v4322_v44 = vpack.c.b16 %v4313_v45, %v4313_v45 }
 0x1cf   :  { %v12530_v5 = vld [vmem:[%s16254_s2 + $0xd78] sm:$0xff] }
 0x1d0   :  { %4808 = vmatpush.bf16.msra.mxu0 %v12487_v17  ;;  %4821 = vmatpush.bf16.msra.mxu1 %v12495_v57  ;;  %v3364_v1 = vpop.f32.mrf.mxu2  ;;  %v3377_v6 = vpop.f32.mrf.mxu3  ;;  %v4311_v17 = vunpack.c.l.b16 %v515_v3  ;;  %v12538_v57 = vld [vmem:[%s16254_s2 + $0xdb8] sm:$0xff] }
 0x1d1   :  { %v12518_v1 = vld [vmem:[%s16254_s2 + $0xd18] sm:$0xff] }
 0x1d2   :  { %4834 = vmatpush.bf16.msra.mxu2 %v12503_v18  ;;  %4847 = vmatpush.bf16.msra.mxu3 %v12511_v19  ;;  %v12546_v18 = vld [vmem:[%s16254_s2 + $0xdf8] sm:$0xff]  ;;  %v4312_v19 = vunpack.c.h.b16 %v515_v3 }
 0x1d3   :  { %v12526_v6 = vld [vmem:[%s16254_s2 + $0xd58] sm:$0xff] }
 0x1d4   :  { %4809 = vmatpush.bf16.msra.mxu0 %v12486_v20  ;;  %4822 = vmatpush.bf16.msra.mxu1 %v12494_v0  ;;  %v4319_v20 = vpack.c.b16 %v4310_v16, %v4310_v16  ;;  %v4320_v0 = vpack.c.b16 %v4311_v17, %v4311_v17  ;;  %v4321_v41 = vpack.c.b16 %v4312_v19, %v4312_v19  ;;  %v12534_v3 = vld [vmem:[%s16254_s2 + $0xd98] sm:$0xff]  ;;  %v12517_v17 = vld [vmem:[%s16254_s2 + $0xd10] sm:$0xff] }
 0x1d5   :  { %v12541_v19 = vld [vmem:[%s16254_s2 + $0xdd0] sm:$0xff] }
 0x1d6   :  { %4835 = vmatpush.bf16.msra.mxu2 %v12502_v32  ;;  %4848 = vmatpush.bf16.msra.mxu3 %v12510_v35  ;;  %v12521_v32 = vld [vmem:[%s16254_s2 + $0xd30] sm:$0xff] }
 0x1d7   :  { %v12529_v35 = vld [vmem:[%s16254_s2 + $0xd70] sm:$0xff] }
 0x1d8   :  { %4810 = vmatpush.bf16.msra.mxu0 %v12485_v46  ;;  %4823 = vmatpush.bf16.msra.mxu1 %v12493_v47  ;;  %v12545_v46 = vld [vmem:[%s16254_s2 + $0xdf0] sm:$0xff]  ;;  %v12520_v47 = vld [vmem:[%s16254_s2 + $0xd28] sm:$0xff] }
 0x1da   :  { %4836 = vmatpush.bf16.msra.mxu2 %v12501_v50  ;;  %4849 = vmatpush.bf16.msra.mxu3 %v12509_v51  ;;  %v12528_v50 = vld [vmem:[%s16254_s2 + $0xd68] sm:$0xff] }
 0x1db   :  { %v12536_v51 = vld [vmem:[%s16254_s2 + $0xda8] sm:$0xff] }
 0x1dc   :  { %4811 = vmatpush.bf16.msra.mxu0 %v12484_v54  ;;  %4824 = vmatpush.bf16.msra.mxu1 %v12492_v12  ;;  %v12519_v12 = vld [vmem:[%s16254_s2 + $0xd20] sm:$0xff] }
 0x1de   :  { %4837 = vmatpush.bf16.msra.mxu2 %v12500_v62  ;;  %4850 = vmatpush.bf16.msra.mxu3 %v12508_v63  ;;  %v12535_v62 = vld [vmem:[%s16254_s2 + $0xda0] sm:$0xff] }
 0x1df   :  { %v12543_v63 = vld [vmem:[%s16254_s2 + $0xde0] sm:$0xff] }
 0x1e0   :  { %4812 = vmatpush.bf16.msra.mxu0 %v12483_v2  ;;  %4825 = vmatpush.bf16.msra.mxu1 %v12491_v11  ;;  %v14816_v53 = vpop.f32.mrf.mxu0  ;;  %v14818_v54 = vpop.f32.mrf.mxu1  ;;  %v12542_v2 = vld [vmem:[%s16254_s2 + $0xdd8] sm:$0xff]  ;;  %v14853_v11 = vld [vmem:[%s16255_s1 + $0x10] ss:$0 sm:$0xff] }
 0x1e1   :  { %vm161_vm1 = vcmp.ge.f32.partialorder %v14853_v11, %v14519_v58  ;;  %vm170_vm8 = vcmp.ge.f32.partialorder %v14853_v11, %v14826_v60 }
 0x1e2   :  { %4838 = vmatpush.bf16.msra.mxu2 %v12499_v13  ;;  %4851 = vmatpush.bf16.msra.mxu3 %v12507_v15  ;;  %v14860_v13 = vld [vmem:[%s16255_s1 + $0x11] ss:$0 sm:$0xff] }
 0x1e3   :  { %4813 = vmatmul.bf16.vlgmr.msra.gmra.mxu0 %v4319_v20  ;;  %4826 = vmatmul.bf16.vlgmr.msra.gmra.mxu1 %v4320_v0  ;;  %vm253_vm2 = vcmp.lt.f32.partialorder %v14860_v13, %v14519_v58  ;;  %v12516_v20 = vld [vmem:[%s16254_s2 + $0xd08] sm:$0xff]  ;;  %vm262_vm9 = vcmp.lt.f32.partialorder %v14860_v13, %v14826_v60 }
 0x1e4   :  { %4857 = vmatpush.bf16.msrb.mxu0 %v12522_v61  ;;  %4870 = vmatpush.bf16.msrb.mxu1 %v12530_v5  ;;  %vm325_vm6 = vmand %vm161_vm1, %vm253_vm2  ;;  %v12524_v0 = vld [vmem:[%s16254_s2 + $0xd48] sm:$0xff] }
 0x1e5   :  { %4839 = vmatmul.bf16.vlgmr.msra.gmra.mxu2 %v4321_v41  ;;  %4852 = vmatmul.bf16.vlgmr.msra.gmra.mxu3 %v4322_v44  ;;  %v8663_v45 = vsel %vm325_vm6, 1.0, %v12858_v31  ;;  %v12532_v41 = vld [vmem:[%s16254_s2 + $0xd88] sm:$0xff]  ;;  %vm329_vm1 = vmand %vm165_vm10, %vm257_vm11  ;;  %vm169_vm6 = vcmp.ge.f32.partialorder %v13162_v42, %v14826_v60 }
 0x1e6   :  { %5492 = vmatpush.bf16.msrb.mxu2 %v12538_v57  ;;  %5505 = vmatpush.bf16.msrb.mxu3 %v12546_v18  ;;  %v12525_v57 = vld [vmem:[%s16254_s2 + $0xd50] sm:$0xff]  ;;  %v12540_v44 = vld [vmem:[%s16254_s2 + $0xdc8] sm:$0xff]  ;;  %vm330_vm2 = vmand %vm166_vm12, %vm258_vm13 }
 0x1e7   :  { %v12533_v18 = vld [vmem:[%s16254_s2 + $0xd90] sm:$0xff]  ;;  %vm15170_vm0 = vmand %vm170_vm8, %vm262_vm9 }
 0x1e8   :  { %4858 = vmatpush.bf16.msrb.mxu0 %v12521_v32  ;;  %4871 = vmatpush.bf16.msrb.mxu1 %v12529_v35  ;;  %v14864_v15 = vpop.f32.mrf.mxu2  ;;  %v14866_v16 = vpop.f32.mrf.mxu3  ;;  %v8664_v32 = vsel %vm14878_vm5, 1.0, %v12858_v31  ;;  %v8665_v35 = vsel %vm327_vm7, 1.0, %v12858_v31  ;;  %vm260_vm5 = vcmp.lt.f32.partialorder %v13156_v38, %v14826_v60  ;;  %vm261_vm7 = vcmp.lt.f32.partialorder %v13164_v43, %v14826_v60  ;;  %v12597_v60 = vld [vmem:[%s16254_s2 + $0xf90] sm:$0xff] }
 0x1e9   :  { %v3390_v61 = vpop.f32.mrf.mxu0  ;;  %v3403_v5 = vpop.f32.mrf.mxu1  ;;  %vm15138_vm10 = vmand %vm168_vm4, %vm260_vm5 }
 0x1ea   :  { %5493 = vmatpush.bf16.msrb.mxu2 %v12537_v49  ;;  %5506 = vmatpush.bf16.msrb.mxu3 %v12545_v46  ;;  %vm15156_vm13 = vmand %vm169_vm6, %vm261_vm7 }
 0x1ec   :  { %4859 = vmatpush.bf16.msrb.mxu0 %v12520_v47  ;;  %4872 = vmatpush.bf16.msrb.mxu1 %v12528_v50  ;;  %v517_v47 = vpack.c.bf16 %v8663_v45, %v8663_v45  ;;  %v518_v50 = vpack.c.bf16 %v8665_v35, %v8664_v32  ;;  %v12569_v45 = vld [vmem:[%s16254_s2 + $0xeb0] sm:$0xff]  ;;  %v12560_v32 = vld [vmem:[%s16254_s2 + $0xe68] sm:$0xff] }
 0x1ed   :  { %v12568_v35 = vld [vmem:[%s16254_s2 + $0xea8] sm:$0xff] }
 0x1ee   :  { %5494 = vmatpush.bf16.msrb.mxu2 %v12536_v51  ;;  %5507 = vmatpush.bf16.msrb.mxu3 %v12544_v52  ;;  %v12515_v51 = vld [vmem:[%s16254_s2 + $0xd00] sm:$0xff]  ;;  %v5033_v61 = vunpack.c.l.b16 %v518_v50  ;;  %v5034_v5 = vunpack.c.h.b16 %v518_v50 }
 0x1ef   :  { %v12523_v52 = vld [vmem:[%s16254_s2 + $0xd40] sm:$0xff] }
 0x1f0   :  { %4860 = vmatpush.bf16.msrb.mxu0 %v12519_v12  ;;  %4873 = vmatpush.bf16.msrb.mxu1 %v12527_v56  ;;  %v3416_v49 = vpop.f32.mrf.mxu2  ;;  %v3429_v46 = vpop.f32.mrf.mxu3  ;;  %v12531_v12 = vld [vmem:[%s16254_s2 + $0xd80] sm:$0xff] }
 0x1f1   :  { %v12539_v56 = vld [vmem:[%s16254_s2 + $0xdc0] sm:$0xff] }
 0x1f2   :  { %5495 = vmatpush.bf16.msrb.mxu2 %v12535_v62  ;;  %5508 = vmatpush.bf16.msrb.mxu3 %v12543_v63  ;;  %v12554_v62 = vld [vmem:[%s16254_s2 + $0xe38] sm:$0xff]  ;;  %v12551_v46 = vld [vmem:[%s16254_s2 + $0xe20] sm:$0xff] }
 0x1f3   :  { %v12562_v63 = vld [vmem:[%s16254_s2 + $0xe78] sm:$0xff]  ;;  %v12567_v50 = vld [vmem:[%s16254_s2 + $0xea0] sm:$0xff] }
 0x1f4   :  { %4861 = vmatpush.bf16.msrb.mxu0 %v12518_v1  ;;  %4874 = vmatpush.bf16.msrb.mxu1 %v12526_v6  ;;  %v4314_v1 = vunpack.c.h.b16 %v14764_v4  ;;  %v4315_v6 = vunpack.c.l.b16 %v517_v47  ;;  %v12553_v4 = vld [vmem:[%s16254_s2 + $0xe30] sm:$0xff]  ;;  %v12559_v47 = vld [vmem:[%s16254_s2 + $0xe60] sm:$0xff] }
 0x1f6   :  { %5496 = vmatpush.bf16.msrb.mxu2 %v12534_v3  ;;  %5509 = vmatpush.bf16.msrb.mxu3 %v12542_v2  ;;  %v12570_v3 = vld [vmem:[%s16254_s2 + $0xeb8] sm:$0xff]  ;;  %v4323_v58 = vpack.c.b16 %v4314_v1, %v4314_v1 }
 0x1f7   :  { %v12578_v2 = vld [vmem:[%s16254_s2 + $0xef8] sm:$0xff] }
 0x1f8   :  { %4862 = vmatpush.bf16.msrb.mxu0 %v12517_v17  ;;  %4875 = vmatpush.bf16.msrb.mxu1 %v12525_v57  ;;  %v4324_v17 = vpack.c.b16 %v4315_v6, %v4315_v6  ;;  %v12561_v57 = vld [vmem:[%s16254_s2 + $0xe70] sm:$0xff] }
 0x1fa   :  { %5497 = vmatpush.bf16.msrb.mxu2 %v12533_v18  ;;  %5510 = vmatpush.bf16.msrb.mxu3 %v12541_v19  ;;  %v5042_v18 = vpack.c.b16 %v5033_v61, %v5033_v61  ;;  %v5043_v19 = vpack.c.b16 %v5034_v5, %v5034_v5  ;;  %v12549_v61 = vld [vmem:[%s16254_s2 + $0xe10] sm:$0xff] }
 0x1fb   :  { %v12557_v5 = vld [vmem:[%s16254_s2 + $0xe50] sm:$0xff] }
 0x1fc   :  { %4863 = vmatpush.bf16.msrb.mxu0 %v12516_v20  ;;  %4876 = vmatpush.bf16.msrb.mxu1 %v12524_v0  ;;  %v12577_v20 = vld [vmem:[%s16254_s2 + $0xef0] sm:$0xff]  ;;  %v12552_v0 = vld [vmem:[%s16254_s2 + $0xe28] sm:$0xff] }
 0x1fe   :  { %5498 = vmatpush.bf16.msrb.mxu2 %v12532_v41  ;;  %5511 = vmatpush.bf16.msrb.mxu3 %v12540_v44  ;;  %v12576_v41 = vld [vmem:[%s16254_s2 + $0xee8] sm:$0xff] }
 0x200   :  { %4864 = vmatpush.bf16.msrb.mxu0 %v12515_v51  ;;  %4877 = vmatpush.bf16.msrb.mxu1 %v12523_v52  ;;  %v14960_v44 = vpop.f32.mrf.mxu0  ;;  %v14962_v49 = vpop.f32.mrf.mxu1  ;;  %v12575_v51 = vld [vmem:[%s16254_s2 + $0xee0] sm:$0xff]  ;;  %v12550_v52 = vld [vmem:[%s16254_s2 + $0xe18] sm:$0xff] }
 0x202   :  { %5499 = vmatpush.bf16.msrb.mxu2 %v12531_v12  ;;  %5512 = vmatpush.bf16.msrb.mxu3 %v12539_v56  ;;  %v12558_v12 = vld [vmem:[%s16254_s2 + $0xe58] sm:$0xff] }
 0x203   :  { %4865 = vmatmul.bf16.vlgmr.msrb.gmra.mxu0 %v4323_v58  ;;  %4878 = vmatmul.bf16.vlgmr.msrb.gmra.mxu1 %v4324_v17  ;;  %v12566_v56 = vld [vmem:[%s16254_s2 + $0xe98] sm:$0xff]  ;;  %v12565_v58 = vld [vmem:[%s16254_s2 + $0xe90] sm:$0xff] }
 0x204   :  { %5518 = vmatpush.bf16.msra.mxu0 %v12554_v62  ;;  %5531 = vmatpush.bf16.msra.mxu1 %v12562_v63  ;;  %v12574_v62 = vld [vmem:[%s16254_s2 + $0xed8] sm:$0xff]  ;;  %v12573_v17 = vld [vmem:[%s16254_s2 + $0xed0] sm:$0xff] }
 0x205   :  { %5500 = vmatmul.bf16.vlgmr.msrb.gmra.mxu2 %v5042_v18  ;;  %5513 = vmatmul.bf16.vlgmr.msrb.gmra.mxu3 %v5043_v19  ;;  %v12548_v18 = vld [vmem:[%s16254_s2 + $0xe08] sm:$0xff] }
 0x206   :  { %5544 = vmatpush.bf16.msra.mxu2 %v12570_v3  ;;  %5557 = vmatpush.bf16.msra.mxu3 %v12578_v2  ;;  %v12556_v19 = vld [vmem:[%s16254_s2 + $0xe48] sm:$0xff] }
 0x208   :  { %5519 = vmatpush.bf16.msra.mxu0 %v12553_v4  ;;  %5532 = vmatpush.bf16.msra.mxu1 %v12561_v57  ;;  %v15000_v63 = vpop.f32.mrf.mxu2  ;;  %v15002_v1 = vpop.f32.mrf.mxu3  ;;  %v8666_v4 = vsel %vm15010_vm14, 1.0, %v12858_v31  ;;  %v8667_v57 = vsel %vm329_vm1, 1.0, %v12858_v31 }
 0x209   :  { %v4051_v3 = vpop.f32.mrf.mxu0  ;;  %v4064_v2 = vpop.f32.mrf.mxu1 }
 0x20a   :  { %5545 = vmatpush.bf16.msra.mxu2 %v12569_v45  ;;  %5558 = vmatpush.bf16.msra.mxu3 %v12577_v20  ;;  %v8668_v45 = vsel %vm330_vm2, 1.0, %v12858_v31  ;;  %v8669_v20 = vsel %vm331_vm3, 1.0, %v12858_v31  ;;  %v12602_v2 = vld [vmem:[%s16254_s2 + $0xfb8] sm:$0xff] }
 0x20c   :  { %5520 = vmatpush.bf16.msra.mxu0 %v12552_v0  ;;  %5533 = vmatpush.bf16.msra.mxu1 %v12560_v32  ;;  %v12564_v0 = vld [vmem:[%s16254_s2 + $0xe88] sm:$0xff] }
 0x20d   :  { %v12572_v32 = vld [vmem:[%s16254_s2 + $0xec8] sm:$0xff] }
 0x20e   :  { %5546 = vmatpush.bf16.msra.mxu2 %v12568_v35  ;;  %5559 = vmatpush.bf16.msra.mxu3 %v12576_v41  ;;  %v519_v35 = vpack.c.bf16 %v8667_v57, %v8666_v4  ;;  %v12585_v57 = vld [vmem:[%s16254_s2 + $0xf30] sm:$0xff] }
 0x210   :  { %5521 = vmatpush.bf16.msra.mxu0 %v12551_v46  ;;  %5534 = vmatpush.bf16.msra.mxu1 %v12559_v47  ;;  %v4077_v41 = vpop.f32.mrf.mxu2  ;;  %v4090_v46 = vpop.f32.mrf.mxu3  ;;  %v520_v47 = vpack.c.bf16 %v8669_v20, %v8668_v45  ;;  %v5035_v6 = vunpack.c.l.b16 %v519_v35  ;;  %v5036_v3 = vunpack.c.h.b16 %v519_v35  ;;  %v12601_v20 = vld [vmem:[%s16254_s2 + $0xfb0] sm:$0xff]  ;;  %v12592_v35 = vld [vmem:[%s16254_s2 + $0xf68] sm:$0xff] }
 0x211   :  { %v12600_v41 = vld [vmem:[%s16254_s2 + $0xfa8] sm:$0xff] }
 0x212   :  { %5547 = vmatpush.bf16.msra.mxu2 %v12567_v50  ;;  %5560 = vmatpush.bf16.msra.mxu3 %v12575_v51  ;;  %v12547_v50 = vld [vmem:[%s16254_s2 + $0xe00] sm:$0xff]  ;;  %v5045_v4 = vpack.c.b16 %v5036_v3, %v5036_v3  ;;  %v12608_v46 = vld [vmem:[%s16254_s2 + $0xfe8] sm:$0xff]  ;;  %v12590_v3 = vld [vmem:[%s16254_s2 + $0xf58] sm:$0xff] }
 0x213   :  { %v12555_v51 = vld [vmem:[%s16254_s2 + $0xe40] sm:$0xff] }
 0x214   :  { %5522 = vmatpush.bf16.msra.mxu0 %v12550_v52  ;;  %5535 = vmatpush.bf16.msra.mxu1 %v12558_v12  ;;  %v12563_v52 = vld [vmem:[%s16254_s2 + $0xe80] sm:$0xff] }
 0x215   :  { %v12571_v12 = vld [vmem:[%s16254_s2 + $0xec0] sm:$0xff] }
 0x216   :  { %5548 = vmatpush.bf16.msra.mxu2 %v12566_v56  ;;  %5561 = vmatpush.bf16.msra.mxu3 %v12574_v62  ;;  %v12586_v56 = vld [vmem:[%s16254_s2 + $0xf38] sm:$0xff] }
 0x217   :  { %v12594_v62 = vld [vmem:[%s16254_s2 + $0xf78] sm:$0xff] }
 0x218   :  { %5523 = vmatpush.bf16.msra.mxu0 %v12549_v61  ;;  %5536 = vmatpush.bf16.msra.mxu1 %v12557_v5  ;;  %v12610_v61 = vld [vmem:[%s16254_s2 + $0xff8] sm:$0xff]  ;;  %v5037_v5 = vunpack.c.l.b16 %v520_v47 }
 0x21a   :  { %5549 = vmatpush.bf16.msra.mxu2 %v12565_v58  ;;  %5562 = vmatpush.bf16.msra.mxu3 %v12573_v17  ;;  %v5038_v58 = vunpack.c.h.b16 %v520_v47  ;;  %v5044_v17 = vpack.c.b16 %v5035_v6, %v5035_v6  ;;  %v12582_v6 = vld [vmem:[%s16254_s2 + $0xf18] sm:$0xff] }
 0x21c   :  { %5524 = vmatpush.bf16.msra.mxu0 %v12548_v18  ;;  %5537 = vmatpush.bf16.msra.mxu1 %v12556_v19  ;;  %v12593_v18 = vld [vmem:[%s16254_s2 + $0xf70] sm:$0xff]  ;;  %v5046_v19 = vpack.c.b16 %v5037_v5, %v5037_v5  ;;  %v5047_v45 = vpack.c.b16 %v5038_v58, %v5038_v58  ;;  %v12595_v5 = vld [vmem:[%s16254_s2 + $0xf80] sm:$0xff] }
 0x21e   :  { %5550 = vmatpush.bf16.msra.mxu2 %v12564_v0  ;;  %5563 = vmatpush.bf16.msra.mxu3 %v12572_v32  ;;  %v12609_v0 = vld [vmem:[%s16254_s2 + $0xff0] sm:$0xff]  ;;  %v12584_v32 = vld [vmem:[%s16254_s2 + $0xf28] sm:$0xff] }
 0x220   :  { %5525 = vmatpush.bf16.msra.mxu0 %v12547_v50  ;;  %5538 = vmatpush.bf16.msra.mxu1 %v12555_v51  ;;  %v15096_v47 = vpop.f32.mrf.mxu0  ;;  %v15098_v50 = vpop.f32.mrf.mxu1  ;;  %v12583_v51 = vld [vmem:[%s16254_s2 + $0xf20] sm:$0xff] }
 0x222   :  { %5551 = vmatpush.bf16.msra.mxu2 %v12563_v52  ;;  %5564 = vmatpush.bf16.msra.mxu3 %v12571_v12  ;;  %v12591_v52 = vld [vmem:[%s16254_s2 + $0xf60] sm:$0xff] }
 0x223   :  { %5526 = vmatmul.bf16.vlgmr.msra.gmra.mxu0 %v5044_v17  ;;  %5539 = vmatmul.bf16.vlgmr.msra.gmra.mxu1 %v5045_v4  ;;  %v12599_v12 = vld [vmem:[%s16254_s2 + $0xfa0] sm:$0xff] }
 0x224   :  { %5570 = vmatpush.bf16.msrb.mxu0 %v12586_v56  ;;  %5583 = vmatpush.bf16.msrb.mxu1 %v12594_v62  ;;  %v12607_v56 = vld [vmem:[%s16254_s2 + $0xfe0] sm:$0xff]  ;;  %v15112_v62 = vpop.permute.xlu1 %105 }
 0x225   :  { %5552 = vmatmul.bf16.vlgmr.msra.gmra.mxu2 %v5046_v19  ;;  %5565 = vmatmul.bf16.vlgmr.msra.gmra.mxu3 %v5047_v45  ;;  %vm171_vm11 = vcmp.ge.f32.partialorder %v13110_v21, %v15112_v62  ;;  %vm263_vm12 = vcmp.lt.f32.partialorder %v13114_v23, %v15112_v62  ;;  %vm172_vm14 = vcmp.ge.f32.partialorder %v13112_v22, %v15112_v62  ;;  %v12581_v22 = vld [vmem:[%s16254_s2 + $0xf10] sm:$0xff]  ;;  %v8670_v19 = vsel %vm15138_vm10, 1.0, %v12858_v31  ;;  %v12603_v4 = vld [vmem:[%s16254_s2 + $0xfc0] sm:$0xff] }
 0x226   :  { %5596 = vmatpush.bf16.msrb.mxu2 %v12602_v2  ;;  %6218 = vmatpush.bf16.msrb.mxu3 %v12610_v61  ;;  %v12598_v2 = vld [vmem:[%s16254_s2 + $0xf98] sm:$0xff]  ;;  %vm264_vm15 = vcmp.lt.f32.partialorder %v13116_v24, %v15112_v62  ;;  %v12589_v24 = vld [vmem:[%s16254_s2 + $0xf50] sm:$0xff]  ;;  %vm335_vm1 = vmand %vm171_vm11, %vm263_vm12  ;;  %v8671_v45 = vsel %vm15156_vm13, 1.0, %v12858_v31  ;;  %vm173_vm3 = vcmp.ge.f32.partialorder %v13118_v25, %v15112_v62  ;;  %vm265_vm4 = vcmp.lt.f32.partialorder %v13122_v27, %v15112_v62 }
 0x227   :  { %v12606_v61 = vld [vmem:[%s16254_s2 + $0xfd8] sm:$0xff]  ;;  %vm336_vm2 = vmand %vm172_vm14, %vm264_vm15  ;;  %vm174_vm5 = vcmp.ge.f32.partialorder %v13120_v26, %v15112_v62  ;;  %vm266_vm6 = vcmp.lt.f32.partialorder %v13124_v28, %v15112_v62  ;;  %vm175_vm7 = vcmp.ge.f32.partialorder %v13128_v30, %v15112_v62  ;;  %vm267_vm8 = vcmp.lt.f32.partialorder %v13149_v34, %v15112_v62  ;;  %v12613_v25 = vld [vmem:[%s16254_s2 + $0x1010] sm:$0xff] }
 0x228   :  { %5571 = vmatpush.bf16.msrb.mxu0 %v12585_v57  ;;  %5584 = vmatpush.bf16.msrb.mxu1 %v12593_v18  ;;  %v15146_v58 = vpop.f32.mrf.mxu2  ;;  %v15148_v17 = vpop.f32.mrf.mxu3  ;;  %v12605_v18 = vld [vmem:[%s16254_s2 + $0xfd0] sm:$0xff]  ;;  %vm15310_vm9 = vmand %vm173_vm3, %vm265_vm4  ;;  %vm176_vm10 = vcmp.ge.f32.partialorder %v13147_v33, %v15112_v62  ;;  %vm268_vm11 = vcmp.lt.f32.partialorder %v13152_v36, %v15112_v62  ;;  %v12674_v28 = vld [vmem:[%s16254_s2 + $0x11f8] sm:$0xff]  ;;  %vm177_vm15 = vcmp.ge.f32.partialorder %v13154_v37, %v15112_v62 }
 0x229   :  { %v4103_v21 = vpop.f32.mrf.mxu0  ;;  %v4116_v23 = vpop.f32.mrf.mxu1  ;;  %vm338_vm12 = vmand %vm174_vm5, %vm266_vm6  ;;  %v12621_v27 = vld [vmem:[%s16254_s2 + $0x1050] sm:$0xff]  ;;  %v8675_v36 = vsel %vm15310_vm9, 1.0, %v12858_v31  ;;  %vm179_vm3 = vcmp.ge.f32.partialorder %v14853_v11, %v15112_v62  ;;  %vm271_vm4 = vcmp.lt.f32.partialorder %v14860_v13, %v15112_v62  ;;  %vm6423_vm9 = vcmask 31744  }
 0x22a   :  { %5597 = vmatpush.bf16.msrb.mxu2 %v12601_v20  ;;  %6219 = vmatpush.bf16.msrb.mxu3 %v12609_v0  ;;  %v12580_v20 = vld [vmem:[%s16254_s2 + $0xf08] sm:$0xff]  ;;  %v12618_v21 = vld [vmem:[%s16254_s2 + $0x1038] sm:$0xff]  ;;  %vm339_vm13 = vmand %vm175_vm7, %vm267_vm8  ;;  %vm6343_vm8 = vcmask 130048  }
 0x22b   :  { %v12588_v0 = vld [vmem:[%s16254_s2 + $0xf48] sm:$0xff]  ;;  %v12626_v23 = vld [vmem:[%s16254_s2 + $0x1078] sm:$0xff]  ;;  %v12629_v33 = vld [vmem:[%s16254_s2 + $0x1090] sm:$0xff] }
 0x22c   :  { %5572 = vmatpush.bf16.msrb.mxu0 %v12584_v32  ;;  %5585 = vmatpush.bf16.msrb.mxu1 %v12592_v35  ;;  %v8672_v32 = vsel %vm15170_vm0, 1.0, %v12858_v31  ;;  %v8673_v35 = vsel %vm335_vm1, 1.0, %v12858_v31  ;;  %v12637_v26 = vld [vmem:[%s16254_s2 + $0x10d0] sm:$0xff]  ;;  %vm340_vm14 = vmand %vm176_vm10, %vm268_vm11  ;;  %vm269_vm0 = vcmp.lt.f32.partialorder %v13156_v38, %v15112_v62  ;;  %vm178_vm1 = vcmp.ge.f32.partialorder %v13162_v42, %v15112_v62 }
 0x22d   :  { %vm341_vm5 = vmand %vm177_vm15, %vm269_vm0  ;;  %v12645_v11 = vld [vmem:[%s16254_s2 + $0x1110] sm:$0xff]  ;;  %vm6655_vm11 = vcmask 64512  }
 0x22e   :  { %5598 = vmatpush.bf16.msrb.mxu2 %v12600_v41  ;;  %6220 = vmatpush.bf16.msrb.mxu3 %v12608_v46  ;;  %v8674_v41 = vsel %vm336_vm2, 1.0, %v12858_v31  ;;  %v12596_v46 = vld [vmem:[%s16254_s2 + $0xf88] sm:$0xff]  ;;  %vm270_vm2 = vcmp.lt.f32.partialorder %v13164_v43, %v15112_v62  ;;  %v12653_v13 = vld [vmem:[%s16254_s2 + $0x1150] sm:$0xff]  ;;  %vm343_vm7 = vmand %vm179_vm3, %vm271_vm4  ;;  %v8679_v62 = vsel %vm341_vm5, 1.0, %v12858_v31 }
 0x22f   :  { %vm342_vm6 = vmand %vm178_vm1, %vm270_vm2  ;;  %v12661_v37 = vld [vmem:[%s16254_s2 + $0x1190] sm:$0xff] }
 0x230   :  { %5573 = vmatpush.bf16.msrb.mxu0 %v12583_v51  ;;  %5586 = vmatpush.bf16.msrb.mxu1 %v12591_v52  ;;  %v12604_v51 = vld [vmem:[%s16254_s2 + $0xfc8] sm:$0xff]  ;;  %v4129_v52 = vpop.f32.mrf.mxu2  ;;  %v12669_v38 = vld [vmem:[%s16254_s2 + $0x11d0] sm:$0xff] }
 0x231   :  { %v12616_v52 = vld [vmem:[%s16254_s2 + $0x1028] sm:$0xff] }
 0x232   :  { %5599 = vmatpush.bf16.msrb.mxu2 %v12599_v12  ;;  %6221 = vmatpush.bf16.msrb.mxu3 %v12607_v56  ;;  %v4142_v12 = vpop.f32.mrf.mxu3  ;;  %v521_v56 = vpack.c.bf16 %v8671_v45, %v8670_v19 }
 0x233   :  { %v12624_v12 = vld [vmem:[%s16254_s2 + $0x1068] sm:$0xff] }
 0x234   :  { %5574 = vmatpush.bf16.msrb.mxu0 %v12582_v6  ;;  %5587 = vmatpush.bf16.msrb.mxu1 %v12590_v3  ;;  %v522_v6 = vpack.c.bf16 %v8672_v32, %v8672_v32  ;;  %v15209_v3 = vpack.c.bf16 %v8674_v41, %v8673_v35  ;;  %v5039_v57 = vunpack.c.l.b16 %v521_v56  ;;  %v12625_v32 = vld [vmem:[%s16254_s2 + $0x1070] sm:$0xff] }
 0x236   :  { %5600 = vmatpush.bf16.msrb.mxu2 %v12598_v2  ;;  %6222 = vmatpush.bf16.msrb.mxu3 %v12606_v61  ;;  %v12579_v2 = vld [vmem:[%s16254_s2 + $0xf00] sm:$0xff]  ;;  %v5759_v19 = vunpack.c.l.b16 %v15209_v3  ;;  %v5048_v45 = vpack.c.b16 %v5039_v57, %v5039_v57  ;;  %v12614_v57 = vld [vmem:[%s16254_s2 + $0x1018] sm:$0xff] }
 0x237   :  { %v12587_v61 = vld [vmem:[%s16254_s2 + $0xf40] sm:$0xff] }
 0x238   :  { %5575 = vmatpush.bf16.msrb.mxu0 %v12581_v22  ;;  %5588 = vmatpush.bf16.msrb.mxu1 %v12589_v24  ;;  %v5040_v22 = vunpack.c.h.b16 %v521_v56  ;;  %v12634_v24 = vld [vmem:[%s16254_s2 + $0x10b8] sm:$0xff]  ;;  %v5768_v41 = vpack.c.b16 %v5759_v19, %v5759_v19  ;;  %v12632_v56 = vld [vmem:[%s16254_s2 + $0x10a8] sm:$0xff] }
 0x23a   :  { %5601 = vmatpush.bf16.msrb.mxu2 %v12597_v60  ;;  %6223 = vmatpush.bf16.msrb.mxu3 %v12605_v18  ;;  %v12642_v60 = vld [vmem:[%s16254_s2 + $0x10f8] sm:$0xff]  ;;  %v5041_v18 = vunpack.c.l.b16 %v522_v6  ;;  %v12640_v6 = vld [vmem:[%s16254_s2 + $0x10e8] sm:$0xff] }
 0x23c   :  { %5576 = vmatpush.bf16.msrb.mxu0 %v12580_v20  ;;  %5589 = vmatpush.bf16.msrb.mxu1 %v12588_v0  ;;  %v5049_v20 = vpack.c.b16 %v5040_v22, %v5040_v22  ;;  %v12617_v0 = vld [vmem:[%s16254_s2 + $0x1030] sm:$0xff]  ;;  %v5050_v35 = vpack.c.b16 %v5041_v18, %v5041_v18  ;;  %v12622_v22 = vld [vmem:[%s16254_s2 + $0x1058] sm:$0xff] }
 0x23e   :  { %5602 = vmatpush.bf16.msrb.mxu2 %v12596_v46  ;;  %6224 = vmatpush.bf16.msrb.mxu3 %v12604_v51  ;;  %v12633_v46 = vld [vmem:[%s16254_s2 + $0x10b0] sm:$0xff] }
 0x23f   :  { %v12641_v51 = vld [vmem:[%s16254_s2 + $0x10f0] sm:$0xff] }
 0x240   :  { %5577 = vmatpush.bf16.msrb.mxu0 %v12579_v2  ;;  %5590 = vmatpush.bf16.msrb.mxu1 %v12587_v61  ;;  %v15260_v2 = vpop.f32.mrf.mxu0  ;;  %v15262_v61 = vpop.f32.mrf.mxu1 }
 0x242   :  { %5603 = vmatpush.bf16.msrb.mxu2 %v12595_v5  ;;  %6225 = vmatpush.bf16.msrb.mxu3 %v12603_v4  ;;  %v12615_v5 = vld [vmem:[%s16254_s2 + $0x1020] sm:$0xff] }
 0x243   :  { %5578 = vmatmul.bf16.vlgmr.msrb.gmra.mxu0 %v5048_v45  ;;  %5591 = vmatmul.bf16.vlgmr.msrb.gmra.mxu1 %v5049_v20  ;;  %v12623_v4 = vld [vmem:[%s16254_s2 + $0x1060] sm:$0xff]  ;;  %v8676_v45 = vsel %vm338_vm12, 1.0, %v12858_v31  ;;  %v12612_v20 = vld [vmem:[%s16254_s2 + $0x1008] sm:$0xff] }
 0x244   :  { %6231 = vmatpush.bf16.msra.mxu0 %v12618_v21  ;;  %6244 = vmatpush.bf16.msra.mxu1 %v12626_v23  ;;  %v12631_v21 = vld [vmem:[%s16254_s2 + $0x10a0] sm:$0xff] }
 0x245   :  { %5604 = vmatmul.bf16.vlgmr.msrb.gmra.mxu2 %v5050_v35  ;;  %6226 = vmatmul.bf16.vlgmr.msrb.gmra.mxu3 %v5768_v41  ;;  %v12639_v23 = vld [vmem:[%s16254_s2 + $0x10e0] sm:$0xff]  ;;  %v8678_v35 = vsel %vm340_vm14, 1.0, %v12858_v31  ;;  %v12628_v41 = vld [vmem:[%s16254_s2 + $0x1088] sm:$0xff] }
 0x246   :  { %6257 = vmatpush.bf16.msra.mxu2 %v12634_v24  ;;  %6270 = vmatpush.bf16.msra.mxu3 %v12642_v60  ;;  %v12630_v24 = vld [vmem:[%s16254_s2 + $0x1098] sm:$0xff] }
 0x247   :  { %v12638_v60 = vld [vmem:[%s16254_s2 + $0x10d8] sm:$0xff] }
 0x248   :  { %6232 = vmatpush.bf16.msra.mxu0 %v12617_v0  ;;  %6245 = vmatpush.bf16.msra.mxu1 %v12625_v32  ;;  %v15300_v18 = vpop.f32.mrf.mxu2  ;;  %v15302_v19 = vpop.f32.mrf.mxu3  ;;  %v12620_v0 = vld [vmem:[%s16254_s2 + $0x1048] sm:$0xff]  ;;  %v8677_v32 = vsel %vm339_vm13, 1.0, %v12858_v31 }
 0x249   :  { %v4155_v30 = vpop.f32.mrf.mxu0  ;;  %v4777_v34 = vpop.f32.mrf.mxu1 }
 0x24a   :  { %6258 = vmatpush.bf16.msra.mxu2 %v12633_v46  ;;  %6271 = vmatpush.bf16.msra.mxu3 %v12641_v51  ;;  %v12636_v46 = vld [vmem:[%s16254_s2 + $0x10c8] sm:$0xff] }
 0x24c   :  { %6233 = vmatpush.bf16.msra.mxu0 %v12616_v52  ;;  %6246 = vmatpush.bf16.msra.mxu1 %v12624_v12  ;;  %v524_v12 = vpack.c.bf16 %v8676_v45, %v8675_v36  ;;  %v12665_v45 = vld [vmem:[%s16254_s2 + $0x11b0] sm:$0xff] }
 0x24e   :  { %6259 = vmatpush.bf16.msra.mxu2 %v12632_v56  ;;  %6272 = vmatpush.bf16.msra.mxu3 %v12640_v6  ;;  %v15351_v56 = vpack.c.bf16 %v8678_v35, %v8677_v32  ;;  %v12611_v6 = vld [vmem:[%s16254_s2 + $0x1000] sm:$0xff]  ;;  %v5762_v30 = vunpack.c.h.b16 %v524_v12  ;;  %v12656_v32 = vld [vmem:[%s16254_s2 + $0x1168] sm:$0xff] }
 0x24f   :  { %v12664_v35 = vld [vmem:[%s16254_s2 + $0x11a8] sm:$0xff] }
 0x250   :  { %6234 = vmatpush.bf16.msra.mxu0 %v12615_v5  ;;  %6247 = vmatpush.bf16.msra.mxu1 %v12623_v4  ;;  %v4790_v51 = vpop.f32.mrf.mxu2  ;;  %v4803_v52 = vpop.f32.mrf.mxu3  ;;  %v12619_v5 = vld [vmem:[%s16254_s2 + $0x1040] sm:$0xff]  ;;  %v5763_v34 = vunpack.c.l.b16 %v15351_v56 }
 0x251   :  { %v12627_v4 = vld [vmem:[%s16254_s2 + $0x1080] sm:$0xff] }
 0x252   :  { %6260 = vmatpush.bf16.msra.mxu2 %v12631_v21  ;;  %6273 = vmatpush.bf16.msra.mxu3 %v12639_v23  ;;  %v12635_v21 = vld [vmem:[%s16254_s2 + $0x10c0] sm:$0xff]  ;;  %v12650_v23 = vld [vmem:[%s16254_s2 + $0x1138] sm:$0xff]  ;;  %v5772_v36 = vpack.c.b16 %v5763_v34, %v5763_v34  ;;  %v12652_v34 = vld [vmem:[%s16254_s2 + $0x1148] sm:$0xff] }
 0x253   :  { %v12647_v52 = vld [vmem:[%s16254_s2 + $0x1120] sm:$0xff] }
 0x254   :  { %6235 = vmatpush.bf16.msra.mxu0 %v12614_v57  ;;  %6248 = vmatpush.bf16.msra.mxu1 %v12622_v22  ;;  %v12658_v57 = vld [vmem:[%s16254_s2 + $0x1178] sm:$0xff]  ;;  %v5760_v22 = vunpack.c.h.b16 %v15209_v3 }
 0x256   :  { %6261 = vmatpush.bf16.msra.mxu2 %v12630_v24  ;;  %6274 = vmatpush.bf16.msra.mxu3 %v12638_v60  ;;  %v5761_v24 = vunpack.c.l.b16 %v524_v12  ;;  %v12666_v60 = vld [vmem:[%s16254_s2 + $0x11b8] sm:$0xff]  ;;  %v12655_v12 = vld [vmem:[%s16254_s2 + $0x1160] sm:$0xff] }
 0x258   :  { %6236 = vmatpush.bf16.msra.mxu0 %v12613_v25  ;;  %6249 = vmatpush.bf16.msra.mxu1 %v12621_v27  ;;  %v5769_v25 = vpack.c.b16 %v5760_v22, %v5760_v22  ;;  %v5770_v3 = vpack.c.b16 %v5761_v24, %v5761_v24  ;;  %v12649_v27 = vld [vmem:[%s16254_s2 + $0x1130] sm:$0xff] }
 0x25a   :  { %6262 = vmatpush.bf16.msra.mxu2 %v12629_v33  ;;  %6275 = vmatpush.bf16.msra.mxu3 %v12637_v26  ;;  %v12657_v33 = vld [vmem:[%s16254_s2 + $0x1170] sm:$0xff]  ;;  %v5771_v26 = vpack.c.b16 %v5762_v30, %v5762_v30  ;;  %v12644_v30 = vld [vmem:[%s16254_s2 + $0x1108] sm:$0xff] }
 0x25c   :  { %6237 = vmatpush.bf16.msra.mxu0 %v12612_v20  ;;  %6250 = vmatpush.bf16.msra.mxu1 %v12620_v0  ;;  %v12673_v20 = vld [vmem:[%s16254_s2 + $0x11f0] sm:$0xff]  ;;  %v12648_v0 = vld [vmem:[%s16254_s2 + $0x1128] sm:$0xff] }
 0x25e   :  { %6263 = vmatpush.bf16.msra.mxu2 %v12628_v41  ;;  %6276 = vmatpush.bf16.msra.mxu3 %v12636_v46  ;;  %v12672_v41 = vld [vmem:[%s16254_s2 + $0x11e8] sm:$0xff] }
 0x260   :  { %6238 = vmatpush.bf16.msra.mxu0 %v12611_v6  ;;  %6251 = vmatpush.bf16.msra.mxu1 %v12619_v5  ;;  %v15403_v46 = vpop.f32.mrf.mxu0  ;;  %v15405_v51 = vpop.f32.mrf.mxu1  ;;  %v12663_v6 = vld [vmem:[%s16254_s2 + $0x11a0] sm:$0xff] }
 0x261   :  { %v12671_v5 = vld [vmem:[%s16254_s2 + $0x11e0] sm:$0xff] }
 0x262   :  { %6264 = vmatpush.bf16.msra.mxu2 %v12627_v4  ;;  %6277 = vmatpush.bf16.msra.mxu3 %v12635_v21  ;;  %v12646_v4 = vld [vmem:[%s16254_s2 + $0x1118] sm:$0xff] }
 0x263   :  { %6239 = vmatmul.bf16.vlgmr.msra.gmra.mxu0 %v5769_v25  ;;  %6252 = vmatmul.bf16.vlgmr.msra.gmra.mxu1 %v5770_v3  ;;  %v12654_v21 = vld [vmem:[%s16254_s2 + $0x1158] sm:$0xff]  ;;  %v12660_v25 = vld [vmem:[%s16254_s2 + $0x1188] sm:$0xff] }
 0x264   :  { %6283 = vmatpush.bf16.msrb.mxu0 %v12650_v23  ;;  %6296 = vmatpush.bf16.msrb.mxu1 %v12658_v57  ;;  %v12662_v23 = vld [vmem:[%s16254_s2 + $0x1198] sm:$0xff] }
 0x265   :  { %6265 = vmatmul.bf16.vlgmr.msra.gmra.mxu2 %v5771_v26  ;;  %6278 = vmatmul.bf16.vlgmr.msra.gmra.mxu3 %v5772_v36  ;;  %v12670_v57 = vld [vmem:[%s16254_s2 + $0x11d8] sm:$0xff]  ;;  %v12643_v36 = vld [vmem:[%s16254_s2 + $0x1100] sm:$0xff] }
 0x266   :  { %6309 = vmatpush.bf16.msrb.mxu2 %v12666_v60  ;;  %6322 = vmatpush.bf16.msrb.mxu3 %v12674_v28  ;;  %v8680_v60 = vsel %vm342_vm6, 1.0, %v12858_v31  ;;  %v8681_v28 = vsel %vm343_vm7, 1.0, %v12858_v31  ;;  %v12668_v31 = vld [vmem:[%s16254_s2 + $0x11c8] sm:$0xff] }
 0x267   :  { %v526_v3 = vpack.c.bf16 %v8680_v60, %v8679_v62  ;;  %v527_v26 = vpack.c.bf16 %v8681_v28, %v8681_v28 }
 0x268   :  { %6284 = vmatpush.bf16.msrb.mxu0 %v12649_v27  ;;  %6297 = vmatpush.bf16.msrb.mxu1 %v12657_v33  ;;  %v15443_v42 = vpop.f32.mrf.mxu2  ;;  %v15445_v22 = vpop.f32.mrf.mxu3 }
 0x269   :  { %v4816_v43 = vpop.f32.mrf.mxu0  ;;  %v4829_v24 = vpop.f32.mrf.mxu1 }
 0x26a   :  { %6310 = vmatpush.bf16.msrb.mxu2 %v12665_v45  ;;  %6323 = vmatpush.bf16.msrb.mxu3 %v12673_v20  ;;  %v12651_v45 = vld [vmem:[%s16254_s2 + $0x1140] sm:$0xff] }
 0x26b   :  { %v12659_v20 = vld [vmem:[%s16254_s2 + $0x1180] sm:$0xff] }
 0x26c   :  { %6285 = vmatpush.bf16.msrb.mxu0 %v12648_v0  ;;  %6298 = vmatpush.bf16.msrb.mxu1 %v12656_v32  ;;  %v12667_v0 = vld [vmem:[%s16254_s2 + $0x11c0] sm:$0xff]  ;;  %v5764_v32 = vunpack.c.h.b16 %v15351_v56 }
 0x26d   :  { %v6335_v56 = vld [vmem:[%s16256_s3] sm:$0xff] }
 0x26e   :  { %6311 = vmatpush.bf16.msrb.mxu2 %v12664_v35  ;;  %6324 = vmatpush.bf16.msrb.mxu3 %v12672_v41  ;;  %v5765_v35 = vunpack.c.l.b16 %v526_v3  ;;  %v5766_v41 = vunpack.c.h.b16 %v526_v3 }
 0x270   :  { %6286 = vmatpush.bf16.msrb.mxu0 %v12647_v52  ;;  %6299 = vmatpush.bf16.msrb.mxu1 %v12655_v12  ;;  %v4842_v27 = vpop.f32.mrf.mxu2  ;;  %v4855_v33 = vpop.f32.mrf.mxu3  ;;  %v5767_v52 = vunpack.c.l.b16 %v527_v26  ;;  %v6336_v12 = vld [vmem:[%s16256_s3 + $0x10] sm:$0xff] }
 0x272   :  { %6312 = vmatpush.bf16.msrb.mxu2 %v12663_v6  ;;  %6325 = vmatpush.bf16.msrb.mxu3 %v12671_v5  ;;  %v5773_v6 = vpack.c.b16 %v5764_v32, %v5764_v32  ;;  %v5774_v5 = vpack.c.b16 %v5765_v35, %v5765_v35 }
 0x274   :  { %6287 = vmatpush.bf16.msrb.mxu0 %v12646_v4  ;;  %6300 = vmatpush.bf16.msrb.mxu1 %v12654_v21  ;;  %v5775_v4 = vpack.c.b16 %v5766_v41, %v5766_v41  ;;  %v5776_v21 = vpack.c.b16 %v5767_v52, %v5767_v52 }
 0x276   :  { %6313 = vmatpush.bf16.msrb.mxu2 %v12662_v23  ;;  %6326 = vmatpush.bf16.msrb.mxu3 %v12670_v57 }
 0x278   :  { %6288 = vmatpush.bf16.msrb.mxu0 %v12645_v11  ;;  %6301 = vmatpush.bf16.msrb.mxu1 %v12653_v13 }
 0x27a   :  { %6314 = vmatpush.bf16.msrb.mxu2 %v12661_v37  ;;  %6327 = vmatpush.bf16.msrb.mxu3 %v12669_v38  ;;  %v3337_v37 = vadd.f32 %v14673_v8, %v14567_v9 }
 0x27c   :  { %6289 = vmatpush.bf16.msrb.mxu0 %v12644_v30  ;;  %6302 = vmatpush.bf16.msrb.mxu1 %v12652_v34  ;;  %v3350_v38 = vadd.f32 %v14675_v48, %v3337_v37  ;;  %v4063_v30 = vadd.f32 %v14962_v49, %v14960_v44  ;;  %v2676_v34 = vadd.f32 %v14515_v55, %v14435_v59 }
 0x27d   :  { %v4789_v59 = vadd.f32 %v15300_v18, %v15262_v61 }
 0x27e   :  { %6315 = vmatpush.bf16.msrb.mxu2 %v12660_v25  ;;  %6328 = vmatpush.bf16.msrb.mxu3 %v12668_v31  ;;  %v3363_v28 = vadd.f32 %v14713_v39, %v3350_v38  ;;  %v4076_v8 = vadd.f32 %v15000_v63, %v4063_v30 }
 0x280   :  { %6290 = vmatpush.bf16.msrb.mxu0 %v12643_v36  ;;  %6303 = vmatpush.bf16.msrb.mxu1 %v12651_v45  ;;  %v4866_v23 = vpop.f32.mrf.mxu0  ;;  %v4879_v57 = vpop.f32.mrf.mxu1  ;;  %v3376_v9 = vadd.f32 %v14715_v40, %v3363_v28  ;;  %v4089_v39 = vadd.f32 %v15002_v1, %v4076_v8  ;;  %v4802_v40 = vadd.f32 %v15302_v19, %v4789_v59 }
 0x282   :  { %6316 = vmatpush.bf16.msrb.mxu2 %v12659_v20  ;;  %6329 = vmatpush.bf16.msrb.mxu3 %v12667_v0  ;;  %v3389_v48 = vadd.f32 %v14816_v53, %v3376_v9  ;;  %v4102_v55 = vadd.f32 %v15096_v47, %v4089_v39  ;;  %v4815_v63 = vadd.f32 %v15403_v46, %v4802_v40 }
 0x283   :  { %6291 = vmatmul.bf16.vlgmr.msrb.gmra.mxu0 %v5773_v6  ;;  %6304 = vmatmul.bf16.vlgmr.msrb.gmra.mxu1 %v5774_v5 }
 0x284   :  { %6382 = vmatpush.msra.mxu0 %v6336_v12  ;;  %v3402_v44 = vadd.f32 %v14818_v54, %v3389_v48  ;;  %v4828_v1 = vadd.f32 %v15405_v51, %v4815_v63 }
 0x285   :  { %6317 = vmatmul.bf16.vlgmr.msrb.gmra.mxu2 %v5775_v4  ;;  %6330 = vmatmul.bf16.vlgmr.msrb.gmra.mxu3 %v5776_v21 }
 0x286   :  { %12675 = vmatpush.msra.mxu2 %v6336_v12  ;;  %6383 = vmatpush.msra.mxu0 %v6335_v56  ;;  %v4841_v18 = vadd.f32 %v15443_v42, %v4828_v1 }
 0x287   :  { %12676 = vmatpush.msra.mxu3 %v6336_v12 }
 0x288   :  { %12677 = vmatpush.msra.mxu2 %v6335_v56  ;;  %v5501_v43 = vpop.f32.mrf.mxu2  ;;  %v5514_v24 = vpop.f32.mrf.mxu3 }
 0x289   :  { %12678 = vmatpush.msra.mxu3 %v6335_v56  ;;  %v4868_v11 = vpop.f32.mrf.mxu0  ;;  %v4881_v13 = vpop.f32.mrf.mxu1  ;;  %v5515_v33 = vadd.f32 %v5514_v24, %v5501_v43 }
 0x290   :  { %v5503_v62 = vpop.f32.mrf.mxu2  ;;  %v5516_v60 = vpop.f32.mrf.mxu3 }
 0x293   :  { %11995 = vmatmul.msk.f32.vlgmr.msra.gmra.mxu0 %vm6343_vm8, %v13931_v29  ;;  %v2689_v29 = vadd.f32 %v14517_v10, %v2676_v34 }
 0x295   :  { %v2702_v25 = vadd.f32 %v14565_v7, %v2689_v29  ;;  %v4115_v7 = vadd.f32 %v15098_v50, %v4102_v55  ;;  %v4854_v50 = vadd.f32 %v15445_v22, %v4841_v18 }
 0x297   :  { %v4128_v54 = vadd.f32 %v15146_v58, %v4115_v7  ;;  %v4867_v46 = vadd.f32 %v4866_v23, %v4854_v50 }
 0x299   :  { %v4141_v47 = vadd.f32 %v15148_v17, %v4128_v54  ;;  %v4880_v27 = vadd.f32 %v4879_v57, %v4867_v46 }
 0x29b   :  { %11996 = vmatmul.msk.f32.gmra.mxu0 %vm6343_vm8, %v14244_v14  ;;  %v3415_v14 = vadd.f32 %v14864_v15, %v3402_v44 }
 0x29d   :  { %v3428_v53 = vadd.f32 %v14866_v16, %v3415_v14  ;;  %v4154_v16 = vadd.f32 %v15260_v2, %v4141_v47 }
 0x2a0   :  { %v5527_v10 = vpop.f32.mrf.mxu0  ;;  %v5540_v49 = vpop.f32.mrf.mxu1 }
 0x2a1   :  { %v5528_v51 = vadd.f32 %v5527_v10, %v5515_v33 }
 0x2a3   :  { %11997 = vmatmul.msk.f32.gmra.mxu0 %vm6343_vm8, %v2702_v25  ;;  %v5541_v26 = vadd.f32 %v5540_v49, %v5528_v51  ;;  %v6339_v25 = vld [vmem:[%s16256_s3 + $0x140] ss:$0 sm:$0xff] }
 0x2a8   :  { %v5553_v61 = vpop.f32.mrf.mxu2  ;;  %v5566_v15 = vpop.f32.mrf.mxu3 }
 0x2a9   :  { %v5529_v19 = vpop.f32.mrf.mxu0  ;;  %v5542_v31 = vpop.f32.mrf.mxu1  ;;  %v5554_v17 = vadd.f32 %v5553_v61, %v5541_v26 }
 0x2ab   :  { %11998 = vmatmul.msk.f32.gmra.mxu0 %vm6343_vm8, %v3428_v53  ;;  %v5567_v36 = vadd.f32 %v5566_v15, %v5554_v17 }
 0x2b0   :  { %v5555_v58 = vpop.f32.mrf.mxu2  ;;  %v5568_v3 = vpop.f32.mrf.mxu3 }
 0x2b3   :  { %11999 = vmatmul.msk.f32.gmra.mxu0 %vm6343_vm8, %v4154_v16 }
 0x2bb   :  { %12000 = vmatmul.msk.f32.gmra.mxu0 %vm6343_vm8, %v4880_v27 }
 0x2c0   :  { %v5579_v42 = vpop.f32.mrf.mxu0  ;;  %v5592_v45 = vpop.f32.mrf.mxu1 }
 0x2c1   :  { %v5580_v20 = vadd.f32 %v5579_v42, %v5567_v36 }
 0x2c3   :  { %v5593_v0 = vadd.f32 %v5592_v45, %v5580_v20 }
 0x2c8   :  { %v5605_v2 = vpop.f32.mrf.mxu2  ;;  %v6227_v32 = vpop.f32.mrf.mxu3 }
 0x2c9   :  { %v5606_v22 = vadd.f32 %v5605_v2, %v5593_v0  ;;  %v5581_v35 = vpop.f32.mrf.mxu0  ;;  %v5594_v41 = vpop.f32.mrf.mxu1 }
 0x2cb   :  { %12001 = vmatmul.msk.f32.vlgmr.msra.gmra.mxu2 %vm6343_vm8, %v5606_v22 }
 0x2d0   :  { %v5607_v52 = vpop.f32.mrf.mxu2  ;;  %v6229_v12 = vpop.f32.mrf.mxu3 }
 0x2e0   :  { %v6240_v6 = vpop.f32.mrf.mxu0  ;;  %v6253_v5 = vpop.f32.mrf.mxu1 }
 0x2e1   :  { %v6241_v24 = vadd.f32 %v6240_v6, %v6227_v32 }
 0x2e3   :  { %v6254_v11 = vadd.f32 %v6253_v5, %v6241_v24 }
 0x2e8   :  { %v6266_v4 = vpop.f32.mrf.mxu2  ;;  %v6279_v21 = vpop.f32.mrf.mxu3 }
 0x2e9   :  { %v6242_v56 = vpop.f32.mrf.mxu0  ;;  %v6255_v23 = vpop.f32.mrf.mxu1  ;;  %v6267_v13 = vadd.f32 %v6266_v4, %v6254_v11 }
 0x2ea   :  { %v6409_v56 = vlaneseq }
 0x2eb   :  { %v6280_v37 = vadd.f32 %v6279_v21, %v6267_v13 }
 0x2ec   :  { %v15631_v23 = vand.u32 127, %v6409_v56 }
 0x2ee   :  { %vm6411_vm10 = vcmp.lt.s32.totalorder %v15631_v23, 4  ;;  %vm8565_vm12 = vcmp.lt.s32.totalorder %v15631_v23, 6 }
 0x2f0   :  { %v6268_v57 = vpop.f32.mrf.mxu2  ;;  %v6281_v43 = vpop.f32.mrf.mxu3 }
 0x300   :  { %v6292_v38 = vpop.f32.mrf.mxu0  ;;  %v6305_v62 = vpop.f32.mrf.mxu1 }
 0x301   :  { %v6293_v60 = vadd.f32 %v6292_v38, %v6280_v37 }
 0x303   :  { %v6306_v28 = vadd.f32 %v6305_v62, %v6293_v60 }
 0x308   :  { %v6318_v30 = vpop.f32.mrf.mxu2  ;;  %v6331_v34 = vpop.f32.mrf.mxu3 }
 0x309   :  { %v6319_v9 = vadd.f32 %v6318_v30, %v6306_v28  ;;  %v6294_v8 = vpop.f32.mrf.mxu0  ;;  %v6307_v29 = vpop.f32.mrf.mxu1 }
 0x30b   :  { %v6332_v48 = vadd.f32 %v6331_v34, %v6319_v9 }
 0x30d   :  { %12002 = vmatmul.msk.f32.vlgmr.msra.gmra.mxu3 %vm6343_vm8, %v6332_v48 }
 0x310   :  { %v6320_v39 = vpop.f32.mrf.mxu2  ;;  %v6333_v44 = vpop.f32.mrf.mxu3 }
 0x311   :  { %v6385_v59 = vpop.f32.mrf.mxu0 }
 0x312   :  { %v15541_v14 = vadd.f32 %v6385_v59, %v6339_v25 }
 0x314   :  { %6421 = vrot.lane.b32.xlu0 %v15541_v14, %s12859_s21  ;;  %v6412_v47 = vmul.f32 0.5, %v15541_v14 }
 0x319   :  { %v6388_v55 = vpop.f32.mrf.mxu0 }
 0x31a   :  { %v15545_v40 = vadd.f32 %v6388_v55, %v6339_v25 }
 0x31c   :  { %6450 = vrot.lane.b32.xlu1 %v15545_v40, %s12859_s21  ;;  %v6413_v18 = vmul.f32 0.5, %v15545_v40 }
 0x321   :  { %v6391_v10 = vpop.f32.mrf.mxu0 }
 0x322   :  { %v15549_v49 = vadd.f32 %v6391_v10, %v6339_v25 }
 0x324   :  { %6478 = vrot.lane.b32.xlu2 %v15549_v49, %s12859_s21  ;;  %v15578_v16 = vpack.i.bf16 %v15549_v49, %v15541_v14  ;;  %v15589_v58 = vmul.f32 0.5, %v15549_v49 }
 0x329   :  { %v6394_v53 = vpop.f32.mrf.mxu0 }
 0x32a   :  { %v15553_v7 = vadd.f32 %v6394_v53, %v6339_v25 }
 0x32c   :  { %6506 = vrot.lane.b32.xlu0 %v15553_v7, %s12859_s21  ;;  %v12699_v15 = vpack.i.bf16 %v15545_v40, %v15553_v7  ;;  %v6415_v45 = vmul.f32 0.5, %v15553_v7 }
 0x331   :  { %v6397_v63 = vpop.f32.mrf.mxu0 }
 0x332   :  { %v15557_v54 = vadd.f32 %v6397_v63, %v6339_v25 }
 0x334   :  { %6534 = vrot.lane.b32.xlu1 %v15557_v54, %s12859_s21  ;;  %v6416_v0 = vmul.f32 0.5, %v15557_v54 }
 0x339   :  { %v6400_v1 = vpop.f32.mrf.mxu0 }
 0x33a   :  { %v15561_v61 = vadd.f32 %v6400_v1, %v6339_v25 }
 0x33c   :  { %6562 = vrot.lane.b32.xlu2 %v15561_v61, %s12859_s21  ;;  %12700 = vrot.lane.b32.xlu1 %v12699_v15, %s12860_s22  ;;  %v15606_v36 = vmul.f32 0.5, %v15561_v61 }
 0x344   :  { %6952 = vrot.lane.b32.xlu1 %v6412_v47, %s12861_s23 }
 0x34c   :  { %6980 = vrot.lane.b32.xlu1 %v6413_v18, %s12861_s23 }
 0x34e   :  { %v6403_v19 = vpop.f32.mrf.mxu2 }
 0x34f   :  { %v15572_v31 = vadd.f32 %v6403_v19, %v6339_v25 }
 0x351   :  { %6590 = vrot.lane.b32.xlu2 %v15572_v31, %s12859_s21  ;;  %v12704_v50 = vpack.i.bf16 %v15572_v31, %v15561_v61  ;;  %v15620_v35 = vmul.f32 0.5, %v15572_v31 }
 0x359   :  { %12695 = vrot.lane.b32.xlu2 %v15578_v16, %s12860_s22 }
 0x361   :  { %12705 = vrot.lane.b32.xlu2 %v12704_v50, %s12860_s22 }
 0x369   :  { %6982 = vrot.lane.b32.xlu2 %v15545_v40, %s12862_s24 }
 0x37e   :  { %v6479_v46 = vpop.permute.xlu2 %6478 }
 0x37f   :  { %12007 = vmatpush.xpose.msk.msrb.mxu3 %vm6423_vm9, %v6479_v46 }
 0x382   :  { %12008 = vmatmul.msk.f32.vlgmr.msrb.gmra.mxu3 %vm6423_vm9, %v15589_v58 }
 0x386   :  { %v6422_v3 = vpop.permute.xlu0 %6421 }
 0x387   :  { %12003 = vmatpush.xpose.msk.msra.mxu1 %vm6423_vm9, %v6422_v3 }
 0x38a   :  { %12004 = vmatmul.msk.f32.vlgmr.msra.gmra.mxu1 %vm6423_vm9, %v6412_v47 }
 0x38e   :  { %v6451_v27 = vpop.permute.xlu1 %6450 }
 0x38f   :  { %12005 = vmatpush.xpose.msk.msrb.mxu2 %vm6423_vm9, %v6451_v27 }
 0x390   :  { %v6406_v33 = vpop.f32.mrf.mxu3 }
 0x391   :  { %v15596_v51 = vadd.f32 %v6406_v33, %v6339_v25 }
 0x392   :  { %12006 = vmatmul.msk.f32.vlgmr.msrb.gmra.mxu2 %vm6423_vm9, %v6413_v18 }
 0x393   :  { %6618 = vrot.lane.b32.xlu0 %v15596_v51, %s12859_s21  ;;  %v12709_v26 = vpack.i.bf16 %v15596_v51, %v15557_v54  ;;  %v15636_v11 = vmul.f32 0.5, %v15596_v51 }
 0x395   :  { %12710 = vrot.lane.b32.xlu2 %v12709_v26, %s12860_s22 }
 0x396   :  { %v6563_v17 = vpop.permute.xlu2 %6562 }
 0x397   :  { %12013 = vmatpush.xpose.msk.msra.mxu3 %vm6423_vm9, %v6563_v17 }
 0x39a   :  { %12014 = vmatmul.msk.f32.vlgmr.msra.gmra.mxu3 %vm6423_vm9, %v15606_v36 }
 0x39b   :  { %6954 = vrot.lane.b32.xlu0 %v15541_v14, %s12862_s24 }
 0x39e   :  { %v6507_v42 = vpop.permute.xlu0 %6506 }
 0x39f   :  { %12009 = vmatpush.xpose.msk.msrb.mxu1 %vm6423_vm9, %v6507_v42 }
 0x3a2   :  { %12010 = vmatmul.msk.f32.vlgmr.msrb.gmra.mxu1 %vm6423_vm9, %v6415_v45 }
 0x3a6   :  { %v6535_v20 = vpop.permute.xlu1 %6534 }
 0x3a7   :  { %12011 = vmatpush.xpose.msk.msra.mxu2 %vm6423_vm9, %v6535_v20 }
 0x3aa   :  { %12012 = vmatmul.msk.f32.vlgmr.msra.gmra.mxu2 %vm6423_vm9, %v6416_v0 }
 0x3ab   :  { %v6591_v22 = vpop.permute.xlu2 %6590 }
 0x3ac   :  { %12015 = vmatpush.xpose.msk.msra.mxu1 %vm6423_vm9, %v6591_v22 }
 0x3ae   :  { %v12701_v2 = vpop.permute.xlu1 %12700 }
 0x3af   :  { %v12703_v32 = vunpack.i.h.bf16 %v12701_v2  ;;  %12016 = vmatmul.msk.f32.vlgmr.msra.gmra.mxu1 %vm6423_vm9, %v15620_v35  ;;  %v12702_v12 = vunpack.i.l.bf16 %v12701_v2 }
 0x3b1   :  { %6791 = vmatpush.msrb.mxu1 %v12703_v32 }
 0x3b3   :  { %v12696_v41 = vpop.permute.xlu2 %12695 }
 0x3b4   :  { %v12697_v52 = vunpack.i.l.bf16 %v12696_v41  ;;  %v12698_v57 = vunpack.i.h.bf16 %v12696_v41 }
 0x3b6   :  { %6765 = vmatpush.msrb.mxu3 %v12697_v52  ;;  %v15678_v15 = vpop.permute.xlu1 %6952 }
 0x3b8   :  { %6843 = vmatpush.msra.mxu3 %v12702_v12 }
 0x3bb   :  { %v15624_v6 = vpop.permute.xlu2 %12705 }
 0x3bc   :  { %v12707_v13 = vunpack.i.l.bf16 %v15624_v6 }
 0x3be   :  { %v15680_v47 = vpop.permute.xlu1 %6980 }
 0x3c3   :  { %v15626_v5 = vpop.permute.xlu2 %6982 }
 0x3ef   :  { %v15628_v4 = vpop.permute.xlu2 %12710 }
 0x3f0   :  { %v12712_v21 = vunpack.i.l.bf16 %v15628_v4 }
 0x3f2   :  { %6869 = vmatpush.msra.mxu1 %v12712_v21 }
 0x405   :  { %v6619_v43 = vpop.permute.xlu0 %6618  ;;  %v6502_v62 = vpop.f32.mrf.mxu3 }
 0x406   :  { %12017 = vmatpush.xpose.msk.msrb.mxu2 %vm6423_vm9, %v6619_v43  ;;  %v6649_v34 = vsel %vm6411_vm10, %v6502_v62, -1e+30 }
 0x407   :  { %v6446_v24 = vpop.f32.mrf.mxu1  ;;  %v6662_v25 = vsel %vm6655_vm11, %v6649_v34, -inf }
 0x408   :  { %v6647_v37 = vsel %vm6411_vm10, %v6446_v24, -1e+30 }
 0x409   :  { %12018 = vmatmul.msk.f32.vlgmr.msrb.gmra.mxu2 %vm6423_vm9, %v15636_v11  ;;  %v6656_v38 = vsel %vm6655_vm11, %v6647_v37, -inf }
 0x40a   :  { %6817 = vmatpush.msra.mxu2 %v12698_v57  ;;  %6657 = vmax.xlane.f32.xlu1 %v6656_v38 }
 0x40c   :  { %6895 = vmatpush.msrb.mxu2 %v12707_v13 }
 0x40d   :  { %v15692_v20 = vpop.permute.xlu0 %6954 }
 0x415   :  { %v6474_v60 = vpop.f32.mrf.mxu2 }
 0x416   :  { %v6648_v28 = vsel %vm6411_vm10, %v6474_v60, -1e+30 }
 0x417   :  { %v6659_v30 = vsel %vm6655_vm11, %v6648_v28, -inf }
 0x418   :  { %6660 = vmax.xlane.f32.xlu2 %v6659_v30 }
 0x41d   :  { %v6586_v9 = vpop.f32.mrf.mxu3 }
 0x41e   :  { %v15651_v8 = vsel %vm6411_vm10, %v6586_v9, -1e+30 }
 0x41f   :  { %v6530_v29 = vpop.f32.mrf.mxu1  ;;  %v6671_v48 = vsel %vm6655_vm11, %v15651_v8, -inf }
 0x420   :  { %v15658_v39 = vsel %vm6411_vm10, %v6530_v29, -1e+30  ;;  %6672 = vmax.xlane.f32.xlu1 %v6671_v48  ;;  %6663 = vmax.xlane.f32.xlu2 %v6662_v25  ;;  %v12729_v29 = vpack.i.bf16 %v15596_v51, %v15561_v61 }
 0x421   :  { %v6665_v44 = vsel %vm6655_vm11, %v15658_v39, -inf }
 0x422   :  { %6666 = vmax.xlane.f32.xlu0 %v6665_v44 }
 0x42c   :  { %v6614_v53 = vpop.f32.mrf.mxu1 }
 0x42d   :  { %v6558_v59 = vpop.f32.mrf.mxu2  ;;  %v6653_v63 = vsel %vm6411_vm10, %v6614_v53, -1e+30 }
 0x42e   :  { %v6651_v55 = vsel %vm6411_vm10, %v6558_v59, -1e+30  ;;  %v6674_v1 = vsel %vm6655_vm11, %v6653_v63, -inf }
 0x42f   :  { %v6668_v10 = vsel %vm6655_vm11, %v6651_v55, -inf  ;;  %6675 = vmax.xlane.f32.xlu2 %v6674_v1 }
 0x430   :  { %6669 = vmax.xlane.f32.xlu0 %v6668_v10 }
 0x439   :  { %7036 = vrot.lane.b32.xlu1 %v6415_v45, %s12861_s23 }
 0x441   :  { %7064 = vrot.lane.b32.xlu1 %v6416_v0, %s12861_s23 }
 0x444   :  { %7066 = vrot.lane.b32.xlu0 %v15557_v54, %s12862_s24 }
 0x447   :  { %7038 = vrot.lane.b32.xlu2 %v15553_v7, %s12862_s24 }
 0x44c   :  { %7122 = vrot.lane.b32.xlu0 %v15572_v31, %s12862_s24 }
 0x454   :  { %7150 = vrot.lane.b32.xlu0 %v15596_v51, %s12862_s24 }
 0x47d   :  { %v6658_v18 = vpop.xlane.xlu1 %6657 }
 0x47e   :  { %v6680_v19 = vsub.f32 %v6647_v37, %v6658_v18 }
 0x480   :  { %v6688_v50 = vmul.f32 1.442695, %v6680_v19 }
 0x482   :  { %12751 = vpow2.f32 %v6688_v50 }
 0x488   :  { %v15682_v46 = vpop.eup %12751 }
 0x489   :  { %v6704_v3 = vsel %vm6655_vm11, %v15682_v46, 0.0 }
 0x48a   :  { %6705 = vadd.xlane.f32.xlu2 %v6704_v3 }
 0x48b   :  { %v6661_v27 = vpop.xlane.xlu2 %6660 }
 0x48c   :  { %v6642_v33 = vpop.f32.mrf.mxu2  ;;  %v6681_v26 = vsub.f32 %v6648_v28, %v6661_v27  ;;  %v12724_v28 = vpack.i.bf16 %v15572_v31, %v15553_v7 }
 0x48d   :  { %v15688_v17 = vsel %vm6411_vm10, %v6642_v33, -1e+30  ;;  %v12708_v33 = vunpack.i.h.bf16 %v15624_v6 }
 0x48e   :  { %v6690_v42 = vmul.f32 1.442695, %v6681_v26  ;;  %v6677_v45 = vsel %vm6655_vm11, %v15688_v17, -inf }
 0x48f   :  { %6678 = vmax.xlane.f32.xlu1 %v6677_v45 }
 0x490   :  { %12753 = vpow2.f32 %v6690_v42 }
 0x493   :  { %v6664_v0 = vpop.xlane.xlu2 %6663 }
 0x494   :  { %v6682_v2 = vsub.f32 %v6649_v34, %v6664_v0  ;;  %v6673_v34 = vpop.xlane.xlu1 %6672 }
 0x495   :  { %v6667_v52 = vpop.xlane.xlu0 %6666  ;;  %v6685_v9 = vsub.f32 %v15651_v8, %v6673_v34 }
 0x496   :  { %v15694_v32 = vpop.eup %12753  ;;  %v6692_v22 = vmul.f32 1.442695, %v6682_v2  ;;  %v12713_v2 = vunpack.i.h.bf16 %v15628_v4 }
 0x497   :  { %v6707_v41 = vsel %vm6655_vm11, %v15694_v32, 0.0  ;;  %v6698_v48 = vmul.f32 1.442695, %v6685_v9 }
 0x498   :  { %6708 = vadd.xlane.f32.xlu0 %v6707_v41  ;;  %12755 = vpow2.f32 %v6692_v22 }
 0x49e   :  { %v15698_v12 = vpop.eup %12755 }
 0x49f   :  { %v6710_v21 = vsel %vm6655_vm11, %v15698_v12, 0.0 }
 0x4a0   :  { %6711 = vadd.xlane.f32.xlu0 %v6710_v21 }
 0x4a2   :  { %7010 = vrot.lane.b32.xlu2 %v15549_v49, %s12862_s24  ;;  %v6676_v24 = vpop.xlane.xlu2 %6675 }
 0x4a3   :  { %v6670_v56 = vpop.xlane.xlu0 %6669  ;;  %v6686_v13 = vsub.f32 %v6653_v63, %v6676_v24 }
 0x4a4   :  { %v6684_v57 = vsub.f32 %v6651_v55, %v6670_v56 }
 0x4a5   :  { %v6700_v37 = vmul.f32 1.442695, %v6686_v13 }
 0x4a6   :  { %v6696_v43 = vmul.f32 1.442695, %v6684_v57 }
 0x4a8   :  { %12757 = vpow2.f32 %v6696_v43  ;;  %7120 = vrot.lane.b32.xlu1 %v15620_v35, %s12861_s23 }
 0x4a9   :  { %12759 = vpow2.f32 %v6700_v37 }
 0x4aa   :  { %7008 = vrot.lane.b32.xlu2 %v15589_v58, %s12861_s23  ;;  %v6683_v58 = vsub.f32 %v15658_v39, %v6667_v52  ;;  %v15744_v55 = vpop.permute.xlu2 %7038 }
 0x4ab   :  { %v15740_v59 = vpop.permute.xlu1 %7036 }
 0x4ac   :  { %v6694_v30 = vmul.f32 1.442695, %v6683_v58 }
 0x4ae   :  { %v15708_v38 = vpop.eup %12757  ;;  %12761 = vpow2.f32 %v6694_v30 }
 0x4af   :  { %v6716_v62 = vsel %vm6655_vm11, %v15708_v38, 0.0  ;;  %v15714_v60 = vpop.eup %12759  ;;  %12763 = vpow2.f32 %v6698_v48 }
 0x4b0   :  { %6717 = vadd.xlane.f32.xlu0 %v6716_v62  ;;  %v6722_v35 = vsel %vm6655_vm11, %v15714_v60, 0.0 }
 0x4b2   :  { %7094 = vrot.lane.b32.xlu2 %v15561_v61, %s12862_s24 }
 0x4b3   :  { %v15748_v53 = vpop.permute.xlu1 %7064 }
 0x4b4   :  { %v15728_v25 = vpop.eup %12761 }
 0x4b5   :  { %v15734_v39 = vpop.eup %12763 }
 0x4b6   :  { %v6719_v8 = vsel %vm6655_vm11, %v15734_v39, 0.0  ;;  %v15738_v44 = vpop.permute.xlu0 %7066 }
 0x4b8   :  { %6723 = vadd.xlane.f32.xlu0 %v6722_v35 }
 0x4ba   :  { %12715 = vrot.lane.b32.xlu2 %v15578_v16, %s12863_s25  ;;  %v6713_v16 = vsel %vm6655_vm11, %v15728_v25, 0.0 }
 0x4be   :  { %v15746_v10 = vpop.permute.xlu0 %7122 }
 0x4c2   :  { %12725 = vrot.lane.b32.xlu2 %v12724_v28, %s12863_s25 }
 0x4c6   :  { %v15752_v18 = vpop.permute.xlu0 %7150 }
 0x4ca   :  { %12730 = vrot.lane.b32.xlu2 %v12729_v29, %s12863_s25 }
 0x4d2   :  { %6714 = vadd.xlane.f32.xlu1 %v6713_v16  ;;  %7589 = vrot.lane.b32.xlu2 %v15549_v49, %s12864_s26 }
 0x4da   :  { %6720 = vadd.xlane.f32.xlu1 %v6719_v8 }
 0x4f3   :  { %7148 = vrot.lane.b32.xlu1 %v15636_v11, %s12861_s23 }
 0x4fb   :  { %7531 = vrot.lane.b32.xlu1 %v15541_v14, %s12864_s26 }
 0x4fd   :  { %v6706_v63 = vpop.xlane.xlu2 %6705 }
 0x4fe   :  { %12765 = vrcp.f32 %v6706_v63 }
 0x502   :  { %v6679_v1 = vpop.xlane.xlu1 %6678 }
 0x503   :  { %v6687_v19 = vsub.f32 %v15688_v17, %v6679_v1 }
 0x504   :  { %v12766_v50 = vpop.eup %12765 }
 0x505   :  { %v6736_v3 = vmul.f32 %v12766_v50, %v15682_v46  ;;  %v6702_v11 = vmul.f32 1.442695, %v6687_v19  ;;  %v7011_v27 = vpop.permute.xlu2 %7010 }
 0x507   :  { %12767 = vpow2.f32 %v6702_v11  ;;  %12019 = vmatmul.msk.f32.vlgmr.msrb.gmra.mxu3 %vm6655_vm11, %v6736_v3 }
 0x508   :  { %6921 = vmatpush.msrb.mxu3 %v12708_v33 }
 0x50b   :  { %v6709_v26 = vpop.xlane.xlu0 %6708 }
 0x50c   :  { %12769 = vrcp.f32 %v6709_v26 }
 0x50d   :  { %v15758_v42 = vpop.eup %12767  ;;  %v15760_v45 = vpop.permute.xlu2 %7008 }
 0x50e   :  { %v6725_v17 = vsel %vm6655_vm11, %v15758_v42, 0.0 }
 0x50f   :  { %6726 = vadd.xlane.f32.xlu0 %v6725_v17 }
 0x512   :  { %v12770_v0 = vpop.eup %12769 }
 0x513   :  { %v6737_v46 = vmul.f32 %v12770_v0, %v15694_v32  ;;  %v6712_v6 = vpop.xlane.xlu0 %6711  ;;  %v12719_v32 = vpack.i.bf16 %v15557_v54, %v15545_v40 }
 0x514   :  { %12771 = vrcp.f32 %v6712_v6 }
 0x515   :  { %12020 = vmatmul.msk.f32.vlgmr.msrb.gmra.mxu1 %vm6655_vm11, %v6737_v46  ;;  %v15767_v22 = vpop.permute.xlu2 %7094 }
 0x516   :  { %6947 = vmatpush.msrb.mxu1 %v12713_v2 }
 0x51a   :  { %v12772_v41 = vpop.eup %12771 }
 0x51b   :  { %v6738_v52 = vmul.f32 %v12772_v41, %v15698_v12 }
 0x51d   :  { %v12716_v21 = vpop.permute.xlu2 %12715  ;;  %12021 = vmatmul.msk.f32.vlgmr.msra.gmra.mxu2 %vm6655_vm11, %v6738_v52 }
 0x51e   :  { %v12717_v56 = vunpack.i.l.bf16 %v12716_v21  ;;  %12027 = vmatpush.xpose.msk.msra.mxu2 %vm6423_vm9, %v15692_v20  ;;  %v7520_v20 = vmul.f32 0.35355338, %v15541_v14 }
 0x520   :  { %7293 = vmatpush.msrb.mxu0 %v12717_v56 }
 0x523   :  { %7092 = vrot.lane.b32.xlu0 %v15606_v36, %s12861_s23  ;;  %v6718_v4 = vpop.xlane.xlu0 %6717  ;;  %v7121_v36 = vpop.permute.xlu1 %7120 }
 0x524   :  { %12773 = vrcp.f32 %v6718_v4 }
 0x52a   :  { %v12774_v57 = vpop.eup %12773 }
 0x52b   :  { %v6740_v43 = vmul.f32 %v12774_v57, %v15708_v38  ;;  %12720 = vrot.lane.b32.xlu0 %v12719_v32, %s12863_s25  ;;  %v6724_v24 = vpop.xlane.xlu0 %6723  ;;  %v7522_v32 = vmul.f32 0.35355338, %v15549_v49 }
 0x52d   :  { %12023 = vmatmul.msk.f32.vlgmr.msra.gmra.mxu1 %vm6655_vm11, %v6740_v43 }
 0x52e   :  { %12031 = vmatpush.xpose.msk.msra.mxu1 %vm6423_vm9, %v7011_v27 }
 0x533   :  { %7529 = vrot.lane.b32.xlu0 %v7520_v20, %s12865_s27 }
 0x545   :  { %v6715_v12 = vpop.xlane.xlu1 %6714 }
 0x546   :  { %12775 = vrcp.f32 %v6715_v12 }
 0x547   :  { %12777 = vrcp.f32 %v6724_v24 }
 0x54c   :  { %v12776_v13 = vpop.eup %12775 }
 0x54d   :  { %v6739_v37 = vmul.f32 %v12776_v13, %v15728_v25  ;;  %v6721_v38 = vpop.xlane.xlu1 %6720  ;;  %v12778_v62 = vpop.eup %12777 }
 0x54e   :  { %12779 = vrcp.f32 %v6721_v38  ;;  %v6742_v58 = vmul.f32 %v12778_v62, %v15714_v60  ;;  %v12718_v60 = vunpack.i.h.bf16 %v12716_v21 }
 0x54f   :  { %12022 = vmatmul.msk.f32.vlgmr.msra.gmra.mxu3 %vm6655_vm11, %v6739_v37 }
 0x550   :  { %12029 = vmatpush.xpose.msk.msra.mxu3 %vm6423_vm9, %v15626_v5  ;;  %v12726_v5 = vpop.permute.xlu2 %12725 }
 0x551   :  { %v12727_v30 = vunpack.i.l.bf16 %v12726_v5  ;;  %v12728_v34 = vunpack.i.h.bf16 %v12726_v5 }
 0x554   :  { %v12780_v35 = vpop.eup %12779 }
 0x555   :  { %v6741_v28 = vmul.f32 %v12780_v35, %v15734_v39 }
 0x557   :  { %12024 = vmatmul.msk.f32.vlgmr.msrb.gmra.mxu2 %vm6655_vm11, %v6741_v28  ;;  %12025 = vmatmul.msk.f32.vlgmr.msrb.gmra.mxu3 %vm6655_vm11, %v6742_v58 }
 0x558   :  { %12033 = vmatpush.xpose.msk.msrb.mxu2 %vm6423_vm9, %v15744_v55  ;;  %12035 = vmatpush.xpose.msk.msrb.mxu3 %vm6423_vm9, %v15738_v44 }
 0x55f   :  { %12028 = vmatmul.msk.f32.vlgmr.msra.gmra.mxu2 %vm6423_vm9, %v15678_v15  ;;  %12030 = vmatmul.msk.f32.vlgmr.msra.gmra.mxu3 %vm6423_vm9, %v15680_v47  ;;  %v12731_v15 = vpop.permute.xlu2 %12730 }
 0x560   :  { %12039 = vmatpush.xpose.msk.msra.mxu2 %vm6423_vm9, %v15746_v10  ;;  %12041 = vmatpush.xpose.msk.msra.mxu3 %vm6423_vm9, %v15752_v18  ;;  %v12733_v47 = vunpack.i.h.bf16 %v12731_v15 }
 0x565   :  { %v7149_v9 = vpop.permute.xlu1 %7148 }
 0x567   :  { %12034 = vmatmul.msk.f32.vlgmr.msrb.gmra.mxu2 %vm6423_vm9, %v15740_v59  ;;  %12036 = vmatmul.msk.f32.vlgmr.msrb.gmra.mxu3 %vm6423_vm9, %v15748_v53  ;;  %v12732_v59 = vunpack.i.l.bf16 %v12731_v15  ;;  %v15866_v13 = vpop.permute.xlu2 %7589 }
 0x568   :  { %7345 = vmatpush.msrb.mxu2 %v12718_v60  ;;  %7371 = vmatpush.msrb.mxu3 %v12727_v30 }
 0x56d   :  { %v15868_v37 = vpop.permute.xlu1 %7531 }
 0x56f   :  { %12040 = vmatmul.msk.f32.vlgmr.msra.gmra.mxu2 %vm6423_vm9, %v7121_v36  ;;  %12042 = vmatmul.msk.f32.vlgmr.msra.gmra.mxu3 %vm6423_vm9, %v7149_v9 }
 0x570   :  { %7449 = vmatpush.msra.mxu2 %v12728_v34  ;;  %7475 = vmatpush.msra.mxu3 %v12733_v47 }
 0x582   :  { %v6727_v29 = vpop.xlane.xlu0 %6726 }
 0x583   :  { %12781 = vrcp.f32 %v6727_v29 }
 0x589   :  { %v12782_v48 = vpop.eup %12781 }
 0x58a   :  { %v6743_v25 = vmul.f32 %v12782_v48, %v15758_v42  ;;  %v15816_v55 = vpop.f32.mrf.mxu3 }
 0x58c   :  { %12026 = vmatmul.msk.f32.vlgmr.msrb.gmra.mxu1 %vm6655_vm11, %v6743_v25 }
 0x58d   :  { %12037 = vmatpush.xpose.msk.msrb.mxu1 %vm6423_vm9, %v15767_v22 }
 0x592   :  { %v15844_v41 = vpop.f32.mrf.mxu1 }
 0x594   :  { %12032 = vmatmul.msk.f32.vlgmr.msra.gmra.mxu1 %vm6423_vm9, %v15760_v45 }
 0x595   :  { %v7093_v16 = vpop.permute.xlu0 %7092 }
 0x59c   :  { %12038 = vmatmul.msk.f32.vlgmr.msrb.gmra.mxu1 %vm6423_vm9, %v7093_v16 }
 0x59d   :  { %v12721_v39 = vpop.permute.xlu0 %12720 }
 0x59e   :  { %v12723_v8 = vunpack.i.h.bf16 %v12721_v39  ;;  %v12722_v44 = vunpack.i.l.bf16 %v12721_v39 }
 0x5a0   :  { %7319 = vmatpush.msra.mxu1 %v12722_v44  ;;  %7397 = vmatpush.msra.mxu0 %v12723_v8  ;;  %v15818_v10 = vpop.f32.mrf.mxu2 }
 0x5a2   :  { %7423 = vmatpush.msrb.mxu1 %v12732_v59 }
 0x5a5   :  { %v15870_v58 = vpop.permute.xlu0 %7529 }
 0x5aa   :  { %v15849_v56 = vpop.f32.mrf.mxu1 }
 0x5d2   :  { %v15820_v53 = vpop.f32.mrf.mxu3 }
 0x5da   :  { %v15822_v63 = vpop.f32.mrf.mxu2  ;;  %v15824_v1 = vpop.f32.mrf.mxu3 }
 0x5e2   :  { %v6977_v18 = vpop.f32.mrf.mxu2  ;;  %v7005_v19 = vpop.f32.mrf.mxu3 }
 0x5e3   :  { %v7176_v50 = vsel %vm6411_vm10, %v6977_v18, -1e+30  ;;  %v7177_v52 = vsel %vm6411_vm10, %v7005_v19, -1e+30 }
 0x5e4   :  { %v7184_v3 = vsel %vm6655_vm11, %v7176_v50, -inf  ;;  %v7187_v21 = vsel %vm6655_vm11, %v7177_v52, -inf }
 0x5e5   :  { %7185 = vmax.xlane.f32.xlu2 %v7184_v3 }
 0x5ea   :  { %v7061_v11 = vpop.f32.mrf.mxu2  ;;  %v7089_v27 = vpop.f32.mrf.mxu3 }
 0x5eb   :  { %v7179_v33 = vsel %vm6411_vm10, %v7061_v11, -1e+30  ;;  %v7180_v26 = vsel %vm6411_vm10, %v7089_v27, -1e+30 }
 0x5ec   :  { %v7193_v42 = vsel %vm6655_vm11, %v7179_v33, -inf  ;;  %v7196_v45 = vsel %vm6655_vm11, %v7180_v26, -inf }
 0x5ed   :  { %7194 = vmax.xlane.f32.xlu1 %v7193_v42  ;;  %7197 = vmax.xlane.f32.xlu2 %v7196_v45 }
 0x5f2   :  { %v7145_v17 = vpop.f32.mrf.mxu2  ;;  %v7173_v0 = vpop.f32.mrf.mxu3 }
 0x5f3   :  { %v7182_v46 = vsel %vm6411_vm10, %v7145_v17, -1e+30  ;;  %v15839_v2 = vsel %vm6411_vm10, %v7173_v0, -1e+30  ;;  %v7521_v17 = vmul.f32 0.35355338, %v15545_v40 }
 0x5f4   :  { %v7202_v6 = vsel %vm6655_vm11, %v7182_v46, -inf  ;;  %v7205_v22 = vsel %vm6655_vm11, %v15839_v2, -inf }
 0x5f5   :  { %7203 = vmax.xlane.f32.xlu0 %v7202_v6  ;;  %7206 = vmax.xlane.f32.xlu1 %v7205_v22  ;;  %v7526_v6 = vmul.f32 0.35355338, %v15572_v31  ;;  %v7523_v22 = vmul.f32 0.35355338, %v15553_v7 }
 0x5fd   :  { %7188 = vmax.xlane.f32.xlu0 %v7187_v21 }
 0x609   :  { %v15851_v4 = vpop.f32.mrf.mxu1 }
 0x611   :  { %7587 = vrot.lane.b32.xlu0 %v7522_v32, %s12865_s27  ;;  %v7033_v57 = vpop.f32.mrf.mxu1 }
 0x612   :  { %v7178_v43 = vsel %vm6411_vm10, %v7033_v57, -1e+30 }
 0x613   :  { %v7190_v20 = vsel %vm6655_vm11, %v7178_v43, -inf }
 0x614   :  { %7191 = vmax.xlane.f32.xlu1 %v7190_v20  ;;  %v7525_v20 = vmul.f32 0.35355338, %v15561_v61 }
 0x619   :  { %v7117_v36 = vpop.f32.mrf.mxu1 }
 0x61a   :  { %v15860_v12 = vsel %vm6411_vm10, %v7117_v36, -1e+30 }
 0x61b   :  { %v7199_v24 = vsel %vm6655_vm11, %v15860_v12, -inf }
 0x61c   :  { %7200 = vmax.xlane.f32.xlu2 %v7199_v24 }
 0x634   :  { %7560 = vrot.lane.b32.xlu2 %v15545_v40, %s12864_s26 }
 0x658   :  { %v7186_v38 = vpop.xlane.xlu2 %7185 }
 0x659   :  { %v7208_v62 = vsub.f32 %v7176_v50, %v7186_v38 }
 0x65b   :  { %v7216_v35 = vmul.f32 1.442695, %v7208_v62 }
 0x65d   :  { %12783 = vpow2.f32 %v7216_v35 }
 0x660   :  { %v7195_v28 = vpop.xlane.xlu1 %7194  ;;  %v7198_v34 = vpop.xlane.xlu2 %7197 }
 0x661   :  { %v7211_v5 = vsub.f32 %v7179_v33, %v7195_v28  ;;  %v7212_v48 = vsub.f32 %v7180_v26, %v7198_v34  ;;  %v7524_v28 = vmul.f32 0.35355338, %v15557_v54 }
 0x663   :  { %v15872_v60 = vpop.eup %12783  ;;  %v7222_v30 = vmul.f32 1.442695, %v7211_v5  ;;  %v7224_v39 = vmul.f32 1.442695, %v7212_v48 }
 0x664   :  { %v7232_v15 = vsel %vm6655_vm11, %v15872_v60, 0.0 }
 0x665   :  { %12785 = vpow2.f32 %v7222_v30  ;;  %7233 = vadd.xlane.f32.xlu0 %v7232_v15 }
 0x668   :  { %v7204_v47 = vpop.xlane.xlu0 %7203  ;;  %v7207_v33 = vpop.xlane.xlu1 %7206 }
 0x669   :  { %v7214_v9 = vsub.f32 %v7182_v46, %v7204_v47 }
 0x66b   :  { %v15876_v29 = vpop.eup %12785  ;;  %v7228_v25 = vmul.f32 1.442695, %v7214_v9 }
 0x66c   :  { %v7241_v16 = vsel %vm6655_vm11, %v15876_v29, 0.0 }
 0x66d   :  { %12787 = vpow2.f32 %v7228_v25  ;;  %7242 = vadd.xlane.f32.xlu1 %v7241_v16 }
 0x66e   :  { %12789 = vpow2.f32 %v7224_v39 }
 0x670   :  { %v7189_v8 = vpop.xlane.xlu0 %7188 }
 0x671   :  { %v7209_v44 = vsub.f32 %v7177_v52, %v7189_v8  ;;  %v7215_v52 = vsub.f32 %v15839_v2, %v7207_v33 }
 0x673   :  { %v15880_v59 = vpop.eup %12787  ;;  %v7218_v18 = vmul.f32 1.442695, %v7209_v44  ;;  %v7230_v21 = vmul.f32 1.442695, %v7215_v52 }
 0x674   :  { %v7250_v19 = vsel %vm6655_vm11, %v15880_v59, 0.0  ;;  %v15884_v50 = vpop.eup %12789 }
 0x675   :  { %12791 = vpow2.f32 %v7218_v18  ;;  %7251 = vadd.xlane.f32.xlu0 %v7250_v19  ;;  %v7244_v27 = vsel %vm6655_vm11, %v15884_v50, 0.0 }
 0x67b   :  { %v12792_v3 = vpop.eup %12791 }
 0x67c   :  { %v7235_v11 = vsel %vm6655_vm11, %v12792_v3, 0.0 }
 0x67d   :  { %7236 = vadd.xlane.f32.xlu1 %v7235_v11  ;;  %7245 = vadd.xlane.f32.xlu0 %v7244_v27 }
 0x683   :  { %v7588_v62 = vpop.permute.xlu0 %7587 }
 0x687   :  { %v7192_v26 = vpop.xlane.xlu1 %7191 }
 0x688   :  { %v7210_v42 = vsub.f32 %v7178_v43, %v7192_v26 }
 0x68a   :  { %v7220_v45 = vmul.f32 1.442695, %v7210_v42 }
 0x68c   :  { %12793 = vpow2.f32 %v7220_v45 }
 0x68d   :  { %12795 = vpow2.f32 %v7230_v21 }
 0x68f   :  { %v7201_v32 = vpop.xlane.xlu2 %7200 }
 0x690   :  { %v7213_v57 = vsub.f32 %v15860_v12, %v7201_v32 }
 0x691   :  { %7558 = vrot.lane.b32.xlu0 %v7521_v17, %s12865_s27 }
 0x692   :  { %v15891_v0 = vpop.eup %12793  ;;  %v7226_v43 = vmul.f32 1.442695, %v7213_v57 }
 0x693   :  { %v7238_v46 = vsel %vm6655_vm11, %v15891_v0, 0.0  ;;  %v15910_v36 = vpop.eup %12795 }
 0x694   :  { %7239 = vadd.xlane.f32.xlu2 %v7238_v46  ;;  %12797 = vpow2.f32 %v7226_v43  ;;  %v7253_v24 = vsel %vm6655_vm11, %v15910_v36, 0.0 }
 0x696   :  { %7618 = vrot.lane.b32.xlu1 %v15553_v7, %s12864_s26 }
 0x699   :  { %7647 = vrot.lane.b32.xlu0 %v15557_v54, %s12864_s26 }
 0x69a   :  { %v15915_v2 = vpop.eup %12797 }
 0x69b   :  { %v7247_v38 = vsel %vm6655_vm11, %v15915_v2, 0.0 }
 0x6a1   :  { %7703 = vrot.lane.b32.xlu0 %v7526_v6, %s12865_s27 }
 0x6a9   :  { %7734 = vrot.lane.b32.xlu0 %v15596_v51, %s12864_s26 }
 0x6ac   :  { %7616 = vrot.lane.b32.xlu2 %v7523_v22, %s12865_s27 }
 0x6b4   :  { %7705 = vrot.lane.b32.xlu2 %v15572_v31, %s12864_s26 }
 0x6bc   :  { %7674 = vrot.lane.b32.xlu2 %v7525_v20, %s12865_s27 }
 0x6c0   :  { %7254 = vadd.xlane.f32.xlu1 %v7253_v24 }
 0x6c8   :  { %7248 = vadd.xlane.f32.xlu1 %v7247_v38 }
 0x6d8   :  { %v7234_v12 = vpop.xlane.xlu0 %7233 }
 0x6d9   :  { %12799 = vrcp.f32 %v7234_v12 }
 0x6df   :  { %v12800_v35 = vpop.eup %12799 }
 0x6e0   :  { %v7264_v5 = vmul.f32 %v12800_v35, %v15872_v60  ;;  %v7243_v30 = vpop.xlane.xlu1 %7242  ;;  %v7527_v60 = vmul.f32 0.35355338, %v15596_v51 }
 0x6e1   :  { %12801 = vrcp.f32 %v7243_v30  ;;  %7645 = vrot.lane.b32.xlu1 %v7524_v28, %s12865_s27 }
 0x6e2   :  { %12043 = vmatmul.msk.f32.vlgmr.msrb.gmra.mxu0 %vm6655_vm11, %v7264_v5 }
 0x6e3   :  { %12051 = vmatpush.xpose.msk.msrb.mxu0 %vm6655_vm11, %v15868_v37 }
 0x6e7   :  { %v12802_v15 = vpop.eup %12801 }
 0x6e8   :  { %v7267_v34 = vmul.f32 %v12802_v15, %v15876_v29  ;;  %v7252_v47 = vpop.xlane.xlu0 %7251  ;;  %v7561_v29 = vpop.permute.xlu2 %7560 }
 0x6e9   :  { %7676 = vrot.lane.b32.xlu1 %v15561_v61, %s12864_s26 }
 0x6ea   :  { %12046 = vmatmul.msk.f32.vlgmr.msrb.gmra.mxu3 %vm6655_vm11, %v7267_v34 }
 0x6f0   :  { %v7237_v9 = vpop.xlane.xlu1 %7236  ;;  %v7246_v48 = vpop.xlane.xlu0 %7245 }
 0x6f1   :  { %12803 = vrcp.f32 %v7237_v9  ;;  %7732 = vrot.lane.b32.xlu1 %v7527_v60, %s12865_s27 }
 0x6f2   :  { %12805 = vrcp.f32 %v7246_v48 }
 0x6f7   :  { %v12804_v25 = vpop.eup %12803 }
 0x6f8   :  { %v12806_v16 = vpop.eup %12805  ;;  %v7265_v37 = vmul.f32 %v12804_v25, %v12792_v3 }
 0x6f9   :  { %v7268_v39 = vmul.f32 %v12806_v16, %v15884_v50 }
 0x6fa   :  { %12044 = vmatmul.msk.f32.vlgmr.msra.gmra.mxu1 %vm6655_vm11, %v7265_v37 }
 0x6fb   :  { %12047 = vmatmul.msk.f32.vlgmr.msra.gmra.mxu0 %vm6655_vm11, %v7268_v39  ;;  %12053 = vmatpush.xpose.msk.msra.mxu1 %vm6655_vm11, %v7561_v29 }
 0x703   :  { %12052 = vmatmul.msk.f32.vlgmr.msrb.gmra.mxu0 %vm6655_vm11, %v15870_v58  ;;  %v7559_v8 = vpop.permute.xlu0 %7558 }
 0x707   :  { %v7240_v44 = vpop.xlane.xlu2 %7239 }
 0x708   :  { %12807 = vrcp.f32 %v7240_v44  ;;  %v7619_v18 = vpop.permute.xlu1 %7618 }
 0x709   :  { %12057 = vmatpush.xpose.msk.msrb.mxu3 %vm6655_vm11, %v7619_v18  ;;  %12809 = vrcp.f32 %v7252_v47 }
 0x70b   :  { %v7648_v19 = vpop.permute.xlu0 %7647 }
 0x70c   :  { %12059 = vmatpush.xpose.msk.msra.mxu0 %vm6655_vm11, %v7648_v19 }
 0x70e   :  { %v12808_v50 = vpop.eup %12807 }
 0x70f   :  { %v7266_v3 = vmul.f32 %v12808_v50, %v15891_v0  ;;  %v7617_v11 = vpop.permute.xlu2 %7616  ;;  %v12810_v58 = vpop.eup %12809 }
 0x710   :  { %v7270_v27 = vmul.f32 %v12810_v58, %v15880_v59 }
 0x711   :  { %12045 = vmatmul.msk.f32.vlgmr.msrb.gmra.mxu2 %vm6655_vm11, %v7266_v3 }
 0x712   :  { %12055 = vmatpush.xpose.msk.msrb.mxu2 %vm6655_vm11, %v15866_v13 }
 0x713   :  { %v7704_v26 = vpop.permute.xlu0 %7703 }
 0x717   :  { %v7706_v33 = vpop.permute.xlu2 %7705 }
 0x719   :  { %12049 = vmatmul.msk.f32.vlgmr.msra.gmra.mxu2 %vm6655_vm11, %v7270_v27 }
 0x71a   :  { %12063 = vmatpush.xpose.msk.msra.mxu2 %vm6655_vm11, %v7706_v33 }
 0x71b   :  { %v7735_v13 = vpop.permute.xlu0 %7734 }
 0x71f   :  { %v7675_v52 = vpop.permute.xlu2 %7674 }
 0x721   :  { %12056 = vmatmul.msk.f32.vlgmr.msrb.gmra.mxu2 %vm6655_vm11, %v7588_v62 }
 0x729   :  { %12064 = vmatmul.msk.f32.vlgmr.msra.gmra.mxu2 %vm6655_vm11, %v7704_v26 }
 0x733   :  { %v7255_v42 = vpop.xlane.xlu1 %7254 }
 0x734   :  { %12811 = vrcp.f32 %v7255_v42 }
 0x73a   :  { %v12812_v45 = vpop.eup %12811 }
 0x73b   :  { %v7271_v17 = vmul.f32 %v12812_v45, %v15910_v36  ;;  %v7249_v0 = vpop.xlane.xlu1 %7248  ;;  %v12734_v45 = vpack.i.bf16 %v15545_v40, %v15541_v14 }
 0x73c   :  { %12813 = vrcp.f32 %v7249_v0 }
 0x73d   :  { %12050 = vmatmul.msk.f32.vlgmr.msra.gmra.mxu3 %vm6655_vm11, %v7271_v17  ;;  %v12739_v17 = vpack.i.bf16 %v15553_v7, %v15549_v49 }
 0x73e   :  { %12065 = vmatpush.xpose.msk.msra.mxu3 %vm6655_vm11, %v7735_v13 }
 0x742   :  { %v12814_v59 = vpop.eup %12813 }
 0x743   :  { %v7269_v46 = vmul.f32 %v12814_v59, %v15915_v2 }
 0x745   :  { %12048 = vmatmul.msk.f32.vlgmr.msrb.gmra.mxu1 %vm6655_vm11, %v7269_v46  ;;  %12058 = vmatmul.msk.f32.vlgmr.msrb.gmra.mxu3 %vm6655_vm11, %v7617_v11 }
 0x74d   :  { %12054 = vmatmul.msk.f32.vlgmr.msra.gmra.mxu1 %vm6655_vm11, %v7559_v8 }
 0x753   :  { %v7646_v6 = vpop.permute.xlu1 %7645 }
 0x754   :  { %12060 = vmatmul.msk.f32.vlgmr.msra.gmra.mxu0 %vm6655_vm11, %v7646_v6 }
 0x75b   :  { %v7677_v22 = vpop.permute.xlu1 %7676 }
 0x75c   :  { %12061 = vmatpush.xpose.msk.msrb.mxu1 %vm6655_vm11, %v7677_v22 }
 0x75f   :  { %12062 = vmatmul.msk.f32.vlgmr.msrb.gmra.mxu1 %vm6655_vm11, %v7675_v52  ;;  %v15959_v32 = vpop.f32.mrf.mxu0 }
 0x763   :  { %v7733_v21 = vpop.permute.xlu1 %7732 }
 0x764   :  { %12066 = vmatmul.msk.f32.vlgmr.msra.gmra.mxu3 %vm6655_vm11, %v7733_v21 }
 0x76d   :  { %v15973_v35 = vpop.f32.mrf.mxu3 }
 0x777   :  { %v15977_v5 = vpop.f32.mrf.mxu1 }
 0x778   :  { %v15961_v57 = vpop.f32.mrf.mxu0 }
 0x780   :  { %v7554_v43 = vpop.f32.mrf.mxu0 }
 0x781   :  { %v7760_v20 = vsel %vm6411_vm10, %v7554_v43, -1e+30 }
 0x782   :  { %v7768_v36 = vsel %vm6655_vm11, %v7760_v20, -inf }
 0x783   :  { %7769 = vmax.xlane.f32.xlu2 %v7768_v36 }
 0x794   :  { %v15966_v24 = vpop.f32.mrf.mxu2 }
 0x79c   :  { %v15968_v2 = vpop.f32.mrf.mxu2 }
 0x7a4   :  { %v7612_v38 = vpop.f32.mrf.mxu2 }
 0x7a5   :  { %v7762_v62 = vsel %vm6411_vm10, %v7612_v38, -1e+30 }
 0x7a6   :  { %v7774_v12 = vsel %vm6655_vm11, %v7762_v62, -inf }
 0x7a7   :  { %7775 = vmax.xlane.f32.xlu1 %v7774_v12 }
 0x7ac   :  { %v7728_v60 = vpop.f32.mrf.mxu2 }
 0x7ad   :  { %v7766_v9 = vsel %vm6411_vm10, %v7728_v60, -1e+30 }
 0x7ae   :  { %v7786_v16 = vsel %vm6655_vm11, %v7766_v9, -inf }
 0x7c0   :  { %v15975_v28 = vpop.f32.mrf.mxu3 }
 0x7c2   :  { %v15981_v34 = vpop.f32.mrf.mxu1 }
 0x7c8   :  { %v7641_v30 = vpop.f32.mrf.mxu3 }
 0x7c9   :  { %v7763_v15 = vsel %vm6411_vm10, %v7641_v30, -1e+30 }
 0x7ca   :  { %v7777_v47 = vsel %vm6655_vm11, %v7763_v15, -inf  ;;  %v7583_v39 = vpop.f32.mrf.mxu1 }
 0x7cb   :  { %7778 = vmax.xlane.f32.xlu2 %v7777_v47  ;;  %v7761_v3 = vsel %vm6411_vm10, %v7583_v39, -1e+30 }
 0x7cc   :  { %v7771_v11 = vsel %vm6655_vm11, %v7761_v3, -inf }
 0x7d1   :  { %v7670_v48 = vpop.f32.mrf.mxu0 }
 0x7d2   :  { %v7764_v25 = vsel %vm6411_vm10, %v7670_v48, -1e+30 }
 0x7d3   :  { %7787 = vmax.xlane.f32.xlu2 %v7786_v16  ;;  %v7780_v37 = vsel %vm6655_vm11, %v7764_v25, -inf }
 0x7d4   :  { %7781 = vmax.xlane.f32.xlu0 %v7780_v37 }
 0x7dc   :  { %v7699_v29 = vpop.f32.mrf.mxu1 }
 0x7dd   :  { %v7765_v8 = vsel %vm6411_vm10, %v7699_v29, -1e+30 }
 0x7de   :  { %v7783_v44 = vsel %vm6655_vm11, %v7765_v8, -inf }
 0x7df   :  { %7784 = vmax.xlane.f32.xlu1 %v7783_v44 }
 0x7e7   :  { %v7757_v18 = vpop.f32.mrf.mxu3 }
 0x7e8   :  { %v15995_v19 = vsel %vm6411_vm10, %v7757_v18, -1e+30 }
 0x7e9   :  { %v7789_v50 = vsel %vm6655_vm11, %v15995_v19, -inf }
 0x7ea   :  { %7790 = vmax.xlane.f32.xlu0 %v7789_v50 }
 0x7f2   :  { %7772 = vmax.xlane.f32.xlu0 %v7771_v11 }
 0x7f6   :  { %v7770_v58 = vpop.xlane.xlu2 %7769 }
 0x7f7   :  { %v7792_v27 = vsub.f32 %v7760_v20, %v7770_v58 }
 0x7f9   :  { %v7800_v33 = vmul.f32 1.442695, %v7792_v27 }
 0x7fb   :  { %12815 = vpow2.f32 %v7800_v33 }
 0x801   :  { %v16002_v26 = vpop.eup %12815 }
 0x802   :  { %v7816_v42 = vsel %vm6655_vm11, %v16002_v26, 0.0 }
 0x803   :  { %7817 = vadd.xlane.f32.xlu1 %v7816_v42 }
 0x806   :  { %12735 = vrot.lane.b32.xlu0 %v12734_v45, %s12866_s28 }
 0x81a   :  { %v7776_v0 = vpop.xlane.xlu1 %7775 }
 0x81b   :  { %v7794_v13 = vsub.f32 %v7762_v62, %v7776_v0 }
 0x81c   :  { %12740 = vrot.lane.b32.xlu1 %v12739_v17, %s12866_s28 }
 0x81d   :  { %v7804_v59 = vmul.f32 1.442695, %v7794_v13 }
 0x81f   :  { %12817 = vpow2.f32 %v7804_v59 }
 0x825   :  { %v16012_v6 = vpop.eup %12817 }
 0x826   :  { %v7822_v22 = vsel %vm6655_vm11, %v16012_v6, 0.0 }
 0x83e   :  { %v7779_v46 = vpop.xlane.xlu2 %7778 }
 0x83f   :  { %v7795_v20 = vsub.f32 %v7763_v15, %v7779_v46 }
 0x841   :  { %v7806_v7 = vmul.f32 1.442695, %v7795_v20 }
 0x846   :  { %7823 = vadd.xlane.f32.xlu1 %v7822_v22  ;;  %v7788_v14 = vpop.xlane.xlu2 %7787 }
 0x847   :  { %v7798_v40 = vsub.f32 %v7766_v9, %v7788_v14  ;;  %v7782_v52 = vpop.xlane.xlu0 %7781 }
 0x848   :  { %v7796_v21 = vsub.f32 %v7764_v25, %v7782_v52 }
 0x849   :  { %v7812_v43 = vmul.f32 1.442695, %v7798_v40 }
 0x84a   :  { %v7808_v49 = vmul.f32 1.442695, %v7796_v21 }
 0x84b   :  { %12819 = vpow2.f32 %v7812_v43 }
 0x84c   :  { %12821 = vpow2.f32 %v7808_v49 }
 0x84d   :  { %12823 = vpow2.f32 %v7806_v7 }
 0x851   :  { %v16016_v36 = vpop.eup %12819 }
 0x852   :  { %v16018_v38 = vpop.eup %12821  ;;  %v7785_v62 = vpop.xlane.xlu1 %7784  ;;  %v7834_v12 = vsel %vm6655_vm11, %v16016_v36, 0.0 }
 0x853   :  { %v7797_v30 = vsub.f32 %v7765_v8, %v7785_v62  ;;  %7835 = vadd.xlane.f32.xlu1 %v7834_v12  ;;  %v7828_v47 = vsel %vm6655_vm11, %v16018_v38, 0.0  ;;  %v12824_v60 = vpop.eup %12823 }
 0x854   :  { %7829 = vadd.xlane.f32.xlu2 %v7828_v47  ;;  %v7825_v9 = vsel %vm6655_vm11, %v12824_v60, 0.0 }
 0x855   :  { %v7810_v15 = vmul.f32 1.442695, %v7797_v30 }
 0x857   :  { %12825 = vpow2.f32 %v7810_v15 }
 0x85c   :  { %7826 = vadd.xlane.f32.xlu2 %v7825_v9  ;;  %v6337_v9 = vld [vmem:[%s16256_s3 + $0x20] sm:$0xff] }
 0x85d   :  { %v16025_v48 = vpop.eup %12825  ;;  %v7791_v25 = vpop.xlane.xlu0 %7790 }
 0x85e   :  { %v7831_v16 = vsel %vm6655_vm11, %v16025_v48, 0.0 }
 0x85f   :  { %7832 = vadd.xlane.f32.xlu0 %v7831_v16 }
 0x865   :  { %v7773_v37 = vpop.xlane.xlu0 %7772 }
 0x866   :  { %v7793_v39 = vsub.f32 %v7761_v3, %v7773_v37 }
 0x868   :  { %v7802_v29 = vmul.f32 1.442695, %v7793_v39 }
 0x86a   :  { %12827 = vpow2.f32 %v7802_v29 }
 0x86c   :  { %8038 = vrot.lane.b32.xlu1 %v15596_v51, %s12866_s28 }
 0x870   :  { %v12828_v8 = vpop.eup %12827 }
 0x871   :  { %v7819_v44 = vsel %vm6655_vm11, %v12828_v8, 0.0 }
 0x872   :  { %7820 = vadd.xlane.f32.xlu2 %v7819_v44 }
 0x873   :  { %8012 = vrot.lane.b32.xlu0 %v15572_v31, %s12866_s28 }
 0x874   :  { %7492 = vrot.lane.b32.xlu1 %v15966_v24, %s12867_s29  ;;  %v12744_v24 = vpack.i.bf16 %v15561_v61, %v15557_v54 }
 0x876   :  { %v7818_v18 = vpop.xlane.xlu1 %7817 }
 0x877   :  { %12829 = vrcp.f32 %v7818_v18 }
 0x878   :  { %v12736_v50 = vpop.permute.xlu0 %12735 }
 0x879   :  { %v12738_v3 = vunpack.i.h.bf16 %v12736_v50  ;;  %v12737_v11 = vunpack.i.l.bf16 %v12736_v50  ;;  %v8171_v50 = vld [vmem:[%s16256_s3 + $0x50] sm:$0xff] }
 0x87b   :  { %7488 = vrot.lane.b32.xlu0 %v15959_v32, %s12867_s29  ;;  %7877 = vmatpush.msrb.mxu0 %v12737_v11 }
 0x87c   :  { %7903 = vmatpush.msra.mxu1 %v12738_v3  ;;  %7494 = vrot.lane.b32.xlu1 %v15973_v35, %s12867_s29  ;;  %v7799_v35 = vsub.f32 %v15995_v19, %v7791_v25 }
 0x87d   :  { %v12830_v51 = vpop.eup %12829 }
 0x87e   :  { %v7848_v31 = vmul.f32 %v12830_v51, %v16002_v26  ;;  %v7814_v33 = vmul.f32 1.442695, %v7799_v35 }
 0x880   :  { %12067 = vmatmul.msk.f32.vlgmr.msrb.gmra.mxu0 %vm6655_vm11, %v7848_v31  ;;  %12831 = vpow2.f32 %v7814_v33 }
 0x883   :  { %7490 = vrot.lane.b32.xlu0 %v15977_v5, %s12867_s29 }
 0x886   :  { %v12832_v26 = vpop.eup %12831 }
 0x887   :  { %v7837_v42 = vsel %vm6655_vm11, %v12832_v26, 0.0 }
 0x88a   :  { %12745 = vrot.lane.b32.xlu2 %v12744_v24, %s12866_s28 }
 0x88e   :  { %v12741_v58 = vpop.permute.xlu1 %12740 }
 0x88f   :  { %v12743_v32 = vunpack.i.h.bf16 %v12741_v58  ;;  %v12742_v27 = vunpack.i.l.bf16 %v12741_v58 }
 0x891   :  { %7929 = vmatpush.msrb.mxu2 %v12742_v27  ;;  %7955 = vmatpush.msrb.mxu3 %v12743_v32 }
 0x8b3   :  { %7838 = vadd.xlane.f32.xlu2 %v7837_v42 }
 0x8b9   :  { %v7824_v45 = vpop.xlane.xlu1 %7823 }
 0x8ba   :  { %12833 = vrcp.f32 %v7824_v45 }
 0x8c0   :  { %v12834_v5 = vpop.eup %12833 }
 0x8c1   :  { %v7850_v54 = vmul.f32 %v12834_v5, %v16012_v6 }
 0x8c3   :  { %12069 = vmatmul.msk.f32.vlgmr.msrb.gmra.mxu2 %vm6655_vm11, %v7850_v54 }
 0x8c6   :  { %v7836_v13 = vpop.xlane.xlu1 %7835 }
 0x8c7   :  { %v7830_v61 = vpop.xlane.xlu2 %7829 }
 0x8cf   :  { %v7827_v17 = vpop.xlane.xlu2 %7826 }
 0x8d0   :  { %12835 = vrcp.f32 %v7827_v17 }
 0x8d1   :  { %12837 = vrcp.f32 %v7836_v13 }
 0x8d2   :  { %v7833_v19 = vpop.xlane.xlu0 %7832  ;;  %12839 = vrcp.f32 %v7830_v61 }
 0x8d6   :  { %v12836_v0 = vpop.eup %12835 }
 0x8d7   :  { %v7851_v59 = vmul.f32 %v12836_v0, %v12824_v60  ;;  %v12838_v22 = vpop.eup %12837 }
 0x8d8   :  { %v7854_v14 = vmul.f32 %v12838_v22, %v16016_v36  ;;  %v12840_v52 = vpop.eup %12839 }
 0x8d9   :  { %12070 = vmatmul.msk.f32.vlgmr.msrb.gmra.mxu3 %vm6655_vm11, %v7851_v59  ;;  %v7852_v62 = vmul.f32 %v12840_v52, %v16018_v38  ;;  %v6338_v38 = vld [vmem:[%s16256_s3 + $0x30] sm:$0xff]  ;;  %v8172_v52 = vld [vmem:[%s16256_s3 + $0x58] sm:$0xff] }
 0x8de   :  { %v8039_v46 = vpop.permute.xlu1 %8038 }
 0x8df   :  { %8059 = vmatpush.msra.mxu3 %v8039_v46 }
 0x8e1   :  { %8237 = vmatpush.msrb.mxu3 %v8171_v50  ;;  %v8459_v50 = vld [vmem:[%s16256_s3 + $0x100] sm:$0xff] }
 0x8e5   :  { %v7821_v40 = vpop.xlane.xlu2 %7820  ;;  %v8013_v6 = vpop.permute.xlu0 %8012 }
 0x8e6   :  { %12841 = vrcp.f32 %v7821_v40  ;;  %8033 = vmatpush.msra.mxu2 %v8013_v6  ;;  %v7493_v58 = vpop.permute.xlu1 %7492  ;;  %v8175_v40 = vld [vmem:[%s16256_s3 + $0x70] sm:$0xff]  ;;  %v8173_v6 = vld [vmem:[%s16256_s3 + $0x60] sm:$0xff] }
 0x8e7   :  { %12073 = vmatmul.msk.f32.vlgmr.msra.gmra.mxu2 %vm6655_vm11, %v7854_v14  ;;  %12843 = vrcp.f32 %v7833_v19  ;;  %v7514_v32 = vsel %vm6423_vm9, %v15818_v10, %v7493_v58 }
 0x8ec   :  { %v12842_v21 = vpop.eup %12841 }
 0x8ed   :  { %v7849_v43 = vmul.f32 %v12842_v21, %v12828_v8  ;;  %v12746_v20 = vpop.permute.xlu2 %12745  ;;  %v12844_v36 = vpop.eup %12843  ;;  %v8265_v21 = vld [vmem:[%s16256_s3 + $0x90] sm:$0xff] }
 0x8ee   :  { %v12748_v49 = vunpack.i.h.bf16 %v12746_v20  ;;  %v12747_v7 = vunpack.i.l.bf16 %v12746_v20  ;;  %v7853_v12 = vmul.f32 %v12844_v36, %v16025_v48  ;;  %v7489_v48 = vpop.permute.xlu0 %7488  ;;  %v7495_v33 = vpop.permute.xlu1 %7494  ;;  %v8170_v20 = vld [vmem:[%s16256_s3 + $0x48] sm:$0xff]  ;;  %v8361_v36 = vld [vmem:[%s16256_s3 + $0xc0] sm:$0xff] }
 0x8ef   :  { %12068 = vmatmul.msk.f32.vlgmr.msra.gmra.mxu1 %vm6655_vm11, %v7849_v43  ;;  %v7512_v25 = vsel %vm6423_vm9, %v15816_v55, %v7489_v48  ;;  %v7515_v42 = vsel %vm6423_vm9, %v15820_v53, %v7495_v33  ;;  %v8266_v43 = vld [vmem:[%s16256_s3 + $0x98] sm:$0xff] }
 0x8f0   :  { %7981 = vmatpush.msra.mxu0 %v12747_v7  ;;  %8007 = vmatpush.msrb.mxu1 %v12748_v49  ;;  %v8263_v49 = vld [vmem:[%s16256_s3 + $0x80] sm:$0xff]  ;;  %v8264_v7 = vld [vmem:[%s16256_s3 + $0x88] sm:$0xff] }
 0x8f1   :  { %12071 = vmatmul.msk.f32.vlgmr.msra.gmra.mxu0 %vm6655_vm11, %v7852_v62  ;;  %v8363_v62 = vld [vmem:[%s16256_s3 + $0xd0] sm:$0xff] }
 0x8f2   :  { %8142 = vmatpush.msrb.mxu0 %v6338_v38  ;;  %8194 = vmatpush.msra.mxu1 %v8175_v40  ;;  %v8315_v38 = vld [vmem:[%s16256_s3 + $0xb8] sm:$0xff] }
 0x8f4   :  { %8143 = vmatpush.msrb.mxu0 %v6337_v9  ;;  %8195 = vmatpush.msra.mxu1 %v8173_v6 }
 0x8f6   :  { %v7491_v3 = vpop.permute.xlu0 %7490 }
 0x8f7   :  { %12072 = vmatmul.msk.f32.vlgmr.msrb.gmra.mxu1 %vm6655_vm11, %v7853_v12  ;;  %v7513_v51 = vsel %vm6423_vm9, %v15844_v41, %v7491_v3 }
 0x8f8   :  { %8257 = vmatpush.msrb.mxu1 %v8172_v52 }
 0x8fa   :  { %8258 = vmatpush.msrb.mxu1 %v8170_v20 }
 0x8fd   :  { %v7879_v30 = vpop.f32.mrf.mxu0 }
 0x8fe   :  { %8072 = vrot.lane.b32.xlu2 %v7879_v30, %s12868_s30 }
 0x926   :  { %v7839_v47 = vpop.xlane.xlu2 %7838 }
 0x927   :  { %12845 = vrcp.f32 %v7839_v47  ;;  %v8314_v47 = vld [vmem:[%s16256_s3 + $0xb0] sm:$0xff] }
 0x92d   :  { %v12846_v15 = vpop.eup %12845 }
 0x92e   :  { %v7855_v60 = vmul.f32 %v12846_v15, %v12832_v26  ;;  %v8312_v15 = vld [vmem:[%s16256_s3 + $0xa0] sm:$0xff] }
 0x930   :  { %12074 = vmatmul.msk.f32.vlgmr.msra.gmra.mxu3 %vm6655_vm11, %v7855_v60  ;;  %v8313_v60 = vld [vmem:[%s16256_s3 + $0xa8] sm:$0xff] }
 0x946   :  { %v7931_v29 = vpop.f32.mrf.mxu2 }
 0x958   :  { %v8073_v16 = vpop.permute.xlu2 %8072 }
 0x959   :  { %v8096_v37 = vsel %vm6655_vm11, %v7512_v25, %v8073_v16  ;;  %v8364_v25 = vld [vmem:[%s16256_s3 + $0xd8] sm:$0xff]  ;;  %v8412_v16 = vld [vmem:[%s16256_s3 + $0xf0] sm:$0xff] }
 0x95a   :  { %12075 = vmatmul.msk.f32.vlgmr.msrb.gmra.mxu0 %vm6343_vm8, %v8096_v37  ;;  %v8413_v37 = vld [vmem:[%s16256_s3 + $0xf8] sm:$0xff] }
 0x95c   :  { %v7957_v39 = vpop.f32.mrf.mxu3 }
 0x95d   :  { %8078 = vrot.lane.b32.xlu2 %v7957_v39, %s12868_s30  ;;  %v8362_v39 = vld [vmem:[%s16256_s3 + $0xc8] sm:$0xff] }
 0x965   :  { %7498 = vrot.lane.b32.xlu2 %v15981_v34, %s12867_s29 }
 0x96a   :  { %v8035_v8 = vpop.f32.mrf.mxu2 }
 0x96c   :  { %v7905_v44 = vpop.f32.mrf.mxu1 }
 0x96d   :  { %8074 = vrot.lane.b32.xlu0 %v7905_v44, %s12868_s30  ;;  %8084 = vrot.lane.b32.xlu2 %v8035_v8, %s12868_s30  ;;  %v8411_v8 = vld [vmem:[%s16256_s3 + $0xe8] sm:$0xff] }
 0x96e   :  { %v7983_v18 = vpop.f32.mrf.mxu0 }
 0x96f   :  { %8080 = vrot.lane.b32.xlu1 %v7983_v18, %s12868_s30 }
 0x974   :  { %v8009_v55 = vpop.f32.mrf.mxu1 }
 0x975   :  { %8076 = vrot.lane.b32.xlu0 %v7931_v29, %s12868_s30  ;;  %v8410_v29 = vld [vmem:[%s16256_s3 + $0xe0] sm:$0xff] }
 0x977   :  { %7500 = vrot.lane.b32.xlu1 %v15968_v2, %s12867_s29  ;;  %v8169_v2 = vld [vmem:[%s16256_s3 + $0x40] sm:$0xff] }
 0x978   :  { %8238 = vmatpush.msrb.mxu3 %v8169_v2  ;;  %v8460_v2 = vld [vmem:[%s16256_s3 + $0x108] sm:$0xff] }
 0x97a   :  { %8304 = vmatpush.msra.mxu3 %v8266_v43 }
 0x97c   :  { %8305 = vmatpush.msra.mxu3 %v8264_v7 }
 0x97d   :  { %7496 = vrot.lane.b32.xlu0 %v15961_v57, %s12867_s29  ;;  %v16095_v57 = vld [vmem:[%s16256_s3 + $0x141] ss:$0 sm:$0xff] }
 0x985   :  { %8082 = vrot.lane.b32.xlu0 %v8009_v55, %s12868_s30  ;;  %v8461_v55 = vld [vmem:[%s16256_s3 + $0x110] sm:$0xff] }
 0x98d   :  { %7502 = vrot.lane.b32.xlu0 %v15975_v28, %s12867_s29 }
 0x9b3   :  { %v8061_v34 = vpop.f32.mrf.mxu3 }
 0x9b4   :  { %8086 = vrot.lane.b32.xlu1 %v8061_v34, %s12868_s30  ;;  %v8462_v34 = vld [vmem:[%s16256_s3 + $0x118] sm:$0xff] }
 0x9b7   :  { %v8079_v26 = vpop.permute.xlu2 %8078 }
 0x9b8   :  { %v8099_v41 = vsel %vm6655_vm11, %v7515_v42, %v8079_v26 }
 0x9bf   :  { %v7499_v61 = vpop.permute.xlu2 %7498 }
 0x9c0   :  { %v7517_v0 = vsel %vm6423_vm9, %v15822_v63, %v7499_v61 }
 0x9c7   :  { %v8085_v19 = vpop.permute.xlu2 %8084 }
 0x9d7   :  { %v8145_v28 = vpop.f32.mrf.mxu0 }
 0x9d8   :  { %v16098_v11 = vadd.f32 %v8145_v28, %v16095_v57 }
 0x9da   :  { %12085 = vmatmul.msk.f32.vlgmr.msrb.gmra.mxu3 %vm6343_vm8, %v16098_v11 }
 0x9db   :  { %8382 = vmatpush.msrb.mxu3 %v8363_v62 }
 0x9dd   :  { %8383 = vmatpush.msrb.mxu3 %v8361_v36 }
 0x9df   :  { %v8075_v31 = vpop.permute.xlu0 %8074 }
 0x9e0   :  { %v8097_v24 = vsel %vm6655_vm11, %v7513_v51, %v8075_v31  ;;  %v8510_v31 = vld [vmem:[%s16256_s3 + $0x130] sm:$0xff] }
 0x9e1   :  { %12076 = vmatmul.msk.f32.gmra.mxu0 %vm6343_vm8, %v8097_v24  ;;  %v8081_v54 = vpop.permute.xlu1 %8080  ;;  %v8511_v24 = vld [vmem:[%s16256_s3 + $0x138] sm:$0xff] }
 0x9e7   :  { %v8077_v27 = vpop.permute.xlu0 %8076 }
 0x9e8   :  { %v8098_v35 = vsel %vm6655_vm11, %v7514_v32, %v8077_v27  ;;  %v8508_v32 = vld [vmem:[%s16256_s3 + $0x120] sm:$0xff]  ;;  %v8509_v27 = vld [vmem:[%s16256_s3 + $0x128] sm:$0xff] }
 0x9e9   :  { %12077 = vmatmul.msk.f32.gmra.mxu0 %vm6343_vm8, %v8098_v35  ;;  %v7501_v13 = vpop.permute.xlu1 %7500 }
 0x9ea   :  { %v7518_v59 = vsel %vm6423_vm9, %v15824_v1, %v7501_v13  ;;  %v8176_v1 = vld [vmem:[%s16256_s3 + $0x78] sm:$0xff] }
 0x9eb   :  { %8214 = vmatpush.msrb.mxu2 %v8176_v1  ;;  %v11994_v1 = vld [vmem:[%s16256_s3 + $0x142] ss:$8 sm:$0x3] }
 0x9ec   :  { %v8559_v43 = vperm.slane %v11994_v1, 1 }
 0x9ef   :  { %v7497_v45 = vpop.permute.xlu0 %7496 }
 0x9f0   :  { %v7516_v5 = vsel %vm6423_vm9, %v15849_v56, %v7497_v45  ;;  %v8102_v56 = vsel %vm6655_vm11, %v7518_v59, %v8085_v19 }
 0x9f1   :  { %12078 = vmatmul.msk.f32.gmra.mxu0 %vm6343_vm8, %v8099_v41  ;;  %v8100_v10 = vsel %vm6655_vm11, %v7516_v5, %v8081_v54 }
 0x9f7   :  { %v8083_v17 = vpop.permute.xlu0 %8082 }
 0x9f8   :  { %v8101_v53 = vsel %vm6655_vm11, %v7517_v0, %v8083_v17 }
 0x9f9   :  { %12079 = vmatmul.msk.f32.gmra.mxu0 %vm6343_vm8, %v8100_v10 }
 0x9ff   :  { %v7503_v46 = vpop.permute.xlu0 %7502 }
 0xa00   :  { %v7519_v22 = vsel %vm6423_vm9, %v15851_v4, %v7503_v46  ;;  %v8174_v4 = vld [vmem:[%s16256_s3 + $0x68] sm:$0xff] }
 0xa01   :  { %12080 = vmatmul.msk.f32.gmra.mxu0 %vm6343_vm8, %v8101_v53  ;;  %8215 = vmatpush.msrb.mxu2 %v8174_v4 }
 0xa03   :  { %8284 = vmatpush.msra.mxu2 %v8265_v21 }
 0xa05   :  { %8285 = vmatpush.msra.mxu2 %v8263_v49 }
 0xa09   :  { %12081 = vmatmul.msk.f32.gmra.mxu0 %vm6343_vm8, %v8102_v56 }
 0xa26   :  { %v8087_v14 = vpop.permute.xlu1 %8086 }
 0xa27   :  { %v8103_v63 = vsel %vm6655_vm11, %v7519_v22, %v8087_v14 }
 0xa28   :  { %12082 = vmatmul.msk.f32.gmra.mxu0 %vm6343_vm8, %v8103_v63 }
 0xa5d   :  { %v8240_v5 = vpop.f32.mrf.mxu3 }
 0xa5e   :  { %v8148_v12 = vpop.f32.mrf.mxu0 }
 0xa5f   :  { %v8149_v30 = vadd.f32 %v8148_v12, %v16095_v57  ;;  %v8558_v12 = vperm.slane %v11994_v1, 0 }
 0xa61   :  { %12083 = vmatmul.msk.f32.vlgmr.msra.gmra.mxu1 %vm6343_vm8, %v8149_v30  ;;  %12084 = vmatmul.msk.f32.vlgmr.msrb.gmra.mxu2 %vm6343_vm8, %v8149_v30 }
 0xa62   :  { %8333 = vmatpush.msra.mxu1 %v8314_v47  ;;  %8353 = vmatpush.msrb.mxu2 %v8315_v38 }
 0xa64   :  { %8334 = vmatpush.msra.mxu1 %v8312_v15  ;;  %8354 = vmatpush.msrb.mxu2 %v8313_v60 }
 0xa66   :  { %v8151_v9 = vpop.f32.mrf.mxu0 }
 0xa67   :  { %v8152_v48 = vadd.f32 %v8151_v9, %v16095_v57 }
 0xa69   :  { %12086 = vmatmul.msk.f32.vlgmr.msrb.gmra.mxu1 %vm6343_vm8, %v16098_v11  ;;  %12087 = vmatmul.msk.f32.vlgmr.msra.gmra.mxu2 %vm6343_vm8, %v8152_v48 }
 0xa6a   :  { %12088 = vmatmul.msk.f32.vlgmr.msra.gmra.mxu3 %vm6343_vm8, %v8152_v48  ;;  %8402 = vmatpush.msrb.mxu1 %v8364_v25 }
 0xa6b   :  { %8431 = vmatpush.msra.mxu2 %v8412_v16  ;;  %8451 = vmatpush.msra.mxu3 %v8413_v37 }
 0xa6c   :  { %8403 = vmatpush.msrb.mxu1 %v8362_v39 }
 0xa6d   :  { %8432 = vmatpush.msra.mxu2 %v8410_v29  ;;  %8452 = vmatpush.msra.mxu3 %v8411_v8 }
 0xa6e   :  { %v8154_v44 = vpop.f32.mrf.mxu0 }
 0xa6f   :  { %v8155_v18 = vadd.f32 %v8154_v44, %v16095_v57 }
 0xa71   :  { %12089 = vmatmul.msk.f32.vlgmr.msra.gmra.mxu1 %vm6343_vm8, %v8155_v18  ;;  %12090 = vmatmul.msk.f32.vlgmr.msrb.gmra.mxu2 %vm6343_vm8, %v8155_v18 }
 0xa72   :  { %8480 = vmatpush.msra.mxu1 %v8461_v55  ;;  %8500 = vmatpush.msrb.mxu2 %v8462_v34 }
 0xa74   :  { %8481 = vmatpush.msra.mxu1 %v8459_v50  ;;  %8501 = vmatpush.msrb.mxu2 %v8460_v2 }
 0xa76   :  { %v8157_v3 = vpop.f32.mrf.mxu0 }
 0xa77   :  { %v8158_v28 = vadd.f32 %v8157_v3, %v16095_v57 }
 0xa79   :  { %12091 = vmatmul.msk.f32.vlgmr.msrb.gmra.mxu3 %vm6343_vm8, %v8158_v28  ;;  %12092 = vmatmul.msk.f32.vlgmr.msrb.gmra.mxu1 %vm6343_vm8, %v8158_v28 }
 0xa7a   :  { %8529 = vmatpush.msrb.mxu3 %v8510_v31  ;;  %8549 = vmatpush.msrb.mxu1 %v8511_v24 }
 0xa7c   :  { %8530 = vmatpush.msrb.mxu3 %v8508_v32  ;;  %8550 = vmatpush.msrb.mxu1 %v8509_v27 }
 0xa7e   :  { %v8160_v11 = vpop.f32.mrf.mxu0 }
 0xa7f   :  { %v8161_v51 = vadd.f32 %v8160_v11, %v16095_v57 }
 0xa81   :  { %12093 = vmatmul.msk.f32.vlgmr.msra.gmra.mxu2 %vm6343_vm8, %v8161_v51  ;;  %12094 = vmatmul.msk.f32.vlgmr.msra.gmra.mxu3 %vm6343_vm8, %v8161_v51 }
 0xa86   :  { %v8163_v58 = vpop.f32.mrf.mxu0 }
 0xa87   :  { %v8164_v35 = vadd.f32 %v8163_v58, %v16095_v57 }
 0xa89   :  { %12095 = vmatmul.msk.f32.vlgmr.msra.gmra.mxu1 %vm6343_vm8, %v8164_v35  ;;  %12096 = vmatmul.msk.f32.vlgmr.msrb.gmra.mxu2 %vm6343_vm8, %v8164_v35 }
 0xaa5   :  { %v8166_v33 = vpop.f32.mrf.mxu0 }
 0xaa6   :  { %v8167_v26 = vadd.f32 %v8166_v33, %v16095_v57 }
 0xaa8   :  { %12097 = vmatmul.msk.f32.vlgmr.msrb.gmra.mxu3 %vm6343_vm8, %v8167_v26  ;;  %12098 = vmatmul.msk.f32.vlgmr.msrb.gmra.mxu1 %vm6343_vm8, %v8167_v26 }
 0xade   :  { %v8197_v42 = vpop.f32.mrf.mxu1 }
 0xadf   :  { %v8241_v56 = vadd.f32 %v8240_v5, %v8197_v42 }
 0xae4   :  { %v8217_v41 = vpop.f32.mrf.mxu2 }
 0xae6   :  { %v8260_v45 = vpop.f32.mrf.mxu1 }
 0xae7   :  { %v8261_v59 = vadd.f32 %v8260_v45, %v8217_v41 }
 0xaec   :  { %v8287_v54 = vpop.f32.mrf.mxu2 }
 0xaed   :  { %v8307_v61 = vpop.f32.mrf.mxu3  ;;  %v8310_v22 = vadd.f32 %v8287_v54, %v8241_v56 }
 0xaee   :  { %v8336_v10 = vpop.f32.mrf.mxu1  ;;  %v8311_v19 = vadd.f32 %v8307_v61, %v8261_v59 }
 0xaef   :  { %v8359_v6 = vadd.f32 %v8336_v10, %v8310_v22 }
 0xaf4   :  { %v8356_v17 = vpop.f32.mrf.mxu2 }
 0xaf5   :  { %v8360_v46 = vadd.f32 %v8356_v17, %v8311_v19 }
 0xaf6   :  { %v8405_v0 = vpop.f32.mrf.mxu1 }
 0xaf7   :  { %v8409_v63 = vadd.f32 %v8405_v0, %v8360_v46 }
 0xafc   :  { %v8385_v53 = vpop.f32.mrf.mxu3 }
 0xafd   :  { %v8408_v52 = vadd.f32 %v8385_v53, %v8359_v6 }
 0xb04   :  { %v8434_v13 = vpop.f32.mrf.mxu2  ;;  %v8454_v14 = vpop.f32.mrf.mxu3 }
 0xb05   :  { %v8458_v4 = vadd.f32 %v8454_v14, %v8409_v63  ;;  %v8457_v49 = vadd.f32 %v8434_v13, %v8408_v52 }
 0xb06   :  { %v8483_v57 = vpop.f32.mrf.mxu1 }
 0xb07   :  { %v8506_v36 = vadd.f32 %v8483_v57, %v8457_v49 }
 0xb0c   :  { %v8503_v40 = vpop.f32.mrf.mxu2 }
 0xb0d   :  { %v8507_v21 = vadd.f32 %v8503_v40, %v8458_v4 }
 0xb25   :  { %v8552_v20 = vpop.f32.mrf.mxu1 }
 0xb26   :  { %v8556_v7 = vadd.f32 %v8552_v20, %v8507_v21 }
 0xb28   :  { %v8563_v62 = vadd.f32 %v8559_v43, %v8556_v7 }
 0xb2a   :  { %8602 = vst [vmem:[%s16257_s4 + $0x8] sm:$0xff] %v8563_v62 }
 0xb2b   :  { %v8532_v30 = vpop.f32.mrf.mxu3 }
 0xb2c   :  { %v8555_v47 = vadd.f32 %v8532_v30, %v8506_v36 }
 0xb2e   :  { %v8562_v38 = vadd.f32 %v8558_v12, %v8555_v47 }
 0xb30   :  { %v8567_v15 = vsel %vm8565_vm12, %v8562_v38, -1e+30 }
 0xb31   :  { %v8569_v60 = vmax.f32 %v8567_v15, -1e+30 }
 0xb33   :  { %8570 = vmax.xlane.f32.xlu2 %v8569_v60 }
 0xba6   :  { %v8571_v9 = vpop.xlane.xlu2 %8570 }
 0xba7   :  { %v8572_v48 = vsub.f32 %v8567_v15, %v8571_v9  ;;  %v8573_v25 = vsub.f32 -1e+30, %v8571_v9 }
 0xba9   :  { %v8574_v16 = vmul.f32 1.442695, %v8572_v48  ;;  %v8576_v37 = vmul.f32 1.442695, %v8573_v25 }
 0xbab   :  { %12847 = vpow2.f32 %v8574_v16 }
 0xbac   :  { %12849 = vpow2.f32 %v8576_v37 }
 0xbb1   :  { %v12848_v39 = vpop.eup %12847 }
 0xbb2   :  { %v12850_v29 = vpop.eup %12849 }
 0xbb3   :  { %v8578_v8 = vadd.f32 %v12850_v29, %v12848_v39 }
 0xbb5   :  { %8579 = vadd.xlane.f32.xlu0 %v8578_v8 }
 0xc28   :  { %v8580_v44 = vpop.xlane.xlu0 %8579 }
 0xc29   :  { %12851 = vrcp.f32 %v8580_v44  ;;  %v8592_v34 = vand.u32 2147483648, %v8580_v44  ;;  %v8590_v2 = vand.u32 2147483647, %v8580_v44  ;;  %vm8586_vm14 = vweird.f32 %v8580_v44 }
 0xc2b   :  { %v8593_v28 = vor.u32 1.1754944e-38, %v8592_v34  ;;  %vm8591_vm0 = vcmp.eq.f32.partialorder %v8590_v2, 8.507059e+37 }
 0xc2f   :  { %v12852_v18 = vpop.eup %12851 }
 0xc30   :  { %v8582_v55 = vmul.f32 %v12852_v18, %v8580_v44  ;;  %vm8587_vm13 = vweird.f32 %v12852_v18 }
 0xc31   :  { %vm8588_vm15 = vmor %vm8586_vm14, %vm8587_vm13 }
 0xc32   :  { %v8583_v23 = vsub.f32 1.0, %v8582_v55 }
 0xc34   :  { %v8584_v50 = vmul.f32 %v12852_v18, %v8583_v23 }
 0xc36   :  { %v8585_v3 = vadd.f32 %v12852_v18, %v8584_v50 }
 0xc38   :  { %v8589_v11 = vsel %vm8588_vm15, %v12852_v18, %v8585_v3 }
 0xc39   :  { %v8594_v51 = vsel %vm8591_vm0, %v8593_v28, %v8589_v11 }
 0xc3a   :  { %v8595_v31 = vmul.f32 %v12848_v39, %v8594_v51 }
 0xc3c   :  { %8601 = vst [vmem:[%s16257_s4] sm:$0xff] %v8595_v31 }

</bundles_post_ra>
